<compile_context>
chip_gen: v7x
topology: tpu7x:2x2x1
jax: 0.10.0
libtpu: 0.0.40
codegen_flags: <defaults>
</compile_context>

<pallas_src>
import functools

import jax
import jax.numpy as jnp
from jax.experimental import pallas as pl
from jax.experimental.pallas import tpu as pltpu


# ------------------------------------------------------------------ helpers
def _pick_row_tile(m, multiple, max_tile):
    """Largest row tile that divides m exactly (no pad/slice HBM copies).

    If m fits in one tile, take the whole thing (block == full array dim is a
    legal TPU block shape even when not 8-aligned). Otherwise search multiples
    of `multiple` (8 for plain matmul; 2*Ho*Wo (>=16) for the pool-fused conv).
    """
    if m <= max_tile:
        return m
    t = (max_tile // multiple) * multiple
    while t >= multiple:
        if m % t == 0:
            return t
        t -= multiple
    raise ValueError(f"no row tile divides m={m} with multiple={multiple}")


# ------------------------------------------------------------ Pallas kernels
def _conv_kernel(a_ref, w_ref, b_ref, *out_refs, pool_pair_rows, emit_stats):
    """y = a @ w + b  (bf16 MXU, f32 acc), optional pool-over-D-pairs epilogue
    and optional per-tile BN moments (sum, sum of squares) of the output."""
    y = jnp.dot(a_ref[...], w_ref[...], preferred_element_type=jnp.float32)
    y = y + b_ref[...]

    if pool_pair_rows is not None:
        # Rows are ordered (n, d, ho, wo); each D-pair spans 2*pool_pair_rows
        # consecutive rows (pool_pair_rows = ho*wo). MaxPool3d((2,1,1)) is a
        # max over the pair axis, done in-register (never hits HBM unpooled).
        tm, c = y.shape
        y = jnp.max(y.reshape(tm // (2 * pool_pair_rows), 2, pool_pair_rows, c),
                    axis=1)
        y = y.reshape(tm // 2, c)

    o_ref = out_refs[0]
    o_ref[...] = y.astype(o_ref.dtype)

    if emit_stats:
        c = y.shape[-1]
        out_refs[1][...] = jnp.sum(y, axis=0).reshape(1, 1, c)
        out_refs[2][...] = jnp.sum(y * y, axis=0).reshape(1, 1, c)


def _bn_relu_kernel(x_ref, s_ref, t_ref, o_ref):
    # o = relu(x * scale + shift); scale/shift broadcast over rows (f32 math).
    o_ref[...] = jnp.maximum(x_ref[...] * s_ref[...] + t_ref[...], 0.0).astype(
        o_ref.dtype)


# ------------------------------------------------------------ Pallas wrappers
def conv_matmul(a, w, b, *, pool_pair_rows=None, emit_stats=False,
                max_rows=512):
    """(M, K) @ (K, N) + (N,), tiled over M, bf16 operands / f32 accumulation.

    pool_pair_rows: if set (= Ho*Wo), fuse MaxPool3d((2,1,1)) into the epilogue
      and return an (M//2, N) pooled output.
    emit_stats: also return per-tile (grid, 1, N) sum and sum-of-squares of the
      (pooled) output for BatchNorm batch statistics.
    """
    m, k = a.shape
    k2, n = w.shape
    assert k == k2
    a = a.astype(jnp.bfloat16)
    w = w.astype(jnp.bfloat16)
    b = b.reshape(1, n).astype(jnp.float32)

    if pool_pair_rows is not None:
        assert m % (2 * pool_pair_rows) == 0, "D must be even for MaxPool(2,1,1)"
        # tile must hold whole D-pairs; halved output tile must stay 8-aligned
        multiple = max(2 * pool_pair_rows, 16)
    else:
        multiple = 8
    tm = _pick_row_tile(m, multiple, max_rows)
    grid_m = m // tm

    out_rows = m // 2 if pool_pair_rows is not None else m
    out_tm = tm // 2 if pool_pair_rows is not None else tm

    in_specs = [
        pl.BlockSpec((tm, k), lambda i: (i, 0)),
        pl.BlockSpec((k, n), lambda i: (0, 0)),
        pl.BlockSpec((1, n), lambda i: (0, 0)),
    ]
    main_shape = jax.ShapeDtypeStruct((out_rows, n), jnp.float32)
    main_spec = pl.BlockSpec((out_tm, n), lambda i: (i, 0))

    kernel = functools.partial(_conv_kernel, pool_pair_rows=pool_pair_rows,
                               emit_stats=emit_stats)
    params = pltpu.CompilerParams(dimension_semantics=("parallel",))

    if emit_stats:
        stat_shape = jax.ShapeDtypeStruct((grid_m, 1, n), jnp.float32)
        stat_spec = pl.BlockSpec((1, 1, n), lambda i: (i, 0, 0))
        out, s_sum, s_sq = pl.pallas_call(
            kernel,
            out_shape=(main_shape, stat_shape, stat_shape),
            grid=(grid_m,),
            in_specs=in_specs,
            out_specs=(main_spec, stat_spec, stat_spec),
            compiler_params=params,
        )(a, w, b)
        return out, s_sum, s_sq

    out = pl.pallas_call(
        kernel,
        out_shape=main_shape,
        grid=(grid_m,),
        in_specs=in_specs,
        out_specs=main_spec,
        compiler_params=params,
    )(a, w, b)
    return out


def bn_relu(x, scale, shift, *, max_rows=1024):
    """relu(x * scale + shift), per-channel scale/shift; x is (M, C) f32.

    For C in {32, 64} the slab is viewed lane-dense as (M*C/128, 128) (a free
    reshape of contiguous channels-last data) and scale/shift are lane-tiled,
    so stores are full-width vst instead of masked vst.msk.
    """
    m, c = x.shape
    if c < 128 and 128 % c == 0 and (m * c) % 128 == 0:
        width = 128
        rep = 128 // c
        xd = x.reshape((m * c) // 128, 128)
        s = jnp.tile(scale.astype(jnp.float32), rep).reshape(1, 128)
        t = jnp.tile(shift.astype(jnp.float32), rep).reshape(1, 128)
    else:
        width = c
        xd = x
        s = scale.reshape(1, c).astype(jnp.float32)
        t = shift.reshape(1, c).astype(jnp.float32)

    rows = xd.shape[0]
    tm = _pick_row_tile(rows, 8, max_rows)
    grid_m = rows // tm

    out = pl.pallas_call(
        _bn_relu_kernel,
        out_shape=jax.ShapeDtypeStruct((rows, width), jnp.float32),
        grid=(grid_m,),
        in_specs=[
            pl.BlockSpec((tm, width), lambda i: (i, 0)),
            pl.BlockSpec((1, width), lambda i: (0, 0)),
            pl.BlockSpec((1, width), lambda i: (0, 0)),
        ],
        out_specs=pl.BlockSpec((tm, width), lambda i: (i, 0)),
        compiler_params=pltpu.CompilerParams(dimension_semantics=("parallel",)),
    )(xd, s, t)
    return out.reshape(m, c)


# ------------------------------------------------------------ im2col glue
def im2col_2d(x):
    """Conv3d kernel (1,3,3), stride (1,2,2), padding (0,1,1) -> im2col rows.

    x: (N, D, H, W, C) f32 -> ((N*D*Ho*Wo, 9*C) bf16, (N, D, Ho, Wo)).
    Column order: (kh, kw) tap-major, input-channel minor. Cast to bf16 fuses
    into the XLA producer so the materialized slab is half the bytes.
    """
    n, d, h, w, c = x.shape
    ho = (h - 1) // 2 + 1
    wo = (w - 1) // 2 + 1
    xp = jnp.pad(x, ((0, 0), (0, 0), (1, 1), (1, 1), (0, 0)))
    taps = []
    for kh in range(3):
        for kw in range(3):
            taps.append(
                xp[:, :, kh: kh + 2 * (ho - 1) + 1: 2,
                       kw: kw + 2 * (wo - 1) + 1: 2, :]
            )
    p = jnp.stack(taps, axis=-2)  # (N, D, Ho, Wo, 9, C)
    return p.reshape(n * d * ho * wo, 9 * c).astype(jnp.bfloat16), (n, d, ho, wo)


def im2col_1d(x):
    """Conv3d kernel (3,1,1), stride 1, padding (1,0,0) -> im2col rows.

    x: (N, D, H, W, C) -> (N*D*H*W, 3*C) bf16, rows in (n, d, h, w) order.
    """
    n, d, h, w, c = x.shape
    xp = jnp.pad(x, ((0, 0), (1, 1), (0, 0), (0, 0), (0, 0)))
    taps = [xp[:, kd: kd + d] for kd in range(3)]
    p = jnp.stack(taps, axis=-2)  # (N, D, H, W, 3, C)
    return p.reshape(n * d * h * w, 3 * c).astype(jnp.bfloat16)


# ------------------------------------------------------------ batch-norm glue
def _finish_bn(sum_tiles, sq_tiles, m_rows, gamma, beta, eps=1e-5):
    """Finish BN batch stats from per-tile moments (training-mode, biased var)."""
    s = jnp.sum(sum_tiles, axis=(0, 1))
    q = jnp.sum(sq_tiles, axis=(0, 1))
    mean = s / m_rows
    var = jnp.maximum(q / m_rows - mean * mean, 0.0)
    scale = gamma / jnp.sqrt(var + eps)
    shift = beta - mean * scale
    return scale, shift


# ------------------------------------------------------------ parameters
def init_params(key, in_channels, n_classes):
    cfg = [(in_channels, 32, True), (32, 64, True),
           (64, 128, False), (128, 256, False)]
    keys = jax.random.split(key, 16)
    ki = 0
    params = {}
    for idx, (cin, cout, add_1d) in enumerate(cfg):
        p = {}
        fan2 = cin * 9
        # conv2d-in-3d weight already in matmul form (9*Cin, Cout)
        p["w2"] = jax.random.normal(keys[ki], (9 * cin, cout), jnp.float32) / jnp.sqrt(fan2)
        ki += 1
        p["b2"] = 0.01 * jax.random.normal(keys[ki], (cout,), jnp.float32)
        ki += 1
        if add_1d:
            fan1 = cout * 3
            # conv1d-in-3d weight in matmul form (3*Cout, Cout)
            p["w1"] = jax.random.normal(keys[ki], (3 * cout, cout), jnp.float32) / jnp.sqrt(fan1)
            ki += 1
            p["b1"] = 0.01 * jax.random.normal(keys[ki], (cout,), jnp.float32)
            ki += 1
        # BatchNorm affine params (PyTorch default init: weight=1, bias=0)
        p["gamma"] = jnp.ones((cout,), jnp.float32)
        p["beta"] = jnp.zeros((cout,), jnp.float32)
        params[f"b{idx + 1}"] = p
    params["dec_w"] = jax.random.normal(keys[ki], (256, n_classes), jnp.float32) / jnp.sqrt(256.0)
    ki += 1
    params["dec_b"] = jnp.zeros((n_classes,), jnp.float32)
    return params


# ------------------------------------------------------------ forward pass
def cnn25d_forward(x_ncdhw, params):
    # NCDHW -> NDHWC
    x = jnp.transpose(x_ncdhw, (0, 2, 3, 4, 1)).astype(jnp.float32)

    # blocks 1 & 2: Conv2d_in_3d -> Conv1d_in_3d -> MaxPool3d(2,1,1) -> BN -> ReLU
    for blk in ("b1", "b2"):
        p = params[blk]
        cout = p["w2"].shape[1]

        a2, (n, d, ho, wo) = im2col_2d(x)
        y = conv_matmul(a2, p["w2"], p["b2"])            # bias fused
        x = y.reshape(n, d, ho, wo, cout)

        # conv1d + fused MaxPool(2,1,1) + fused BN moments in one MXU pass
        a1 = im2col_1d(x)
        pooled, s_sum, s_sq = conv_matmul(
            a1, p["w1"], p["b1"], pool_pair_rows=ho * wo, emit_stats=True)
        d = d // 2
        scale, shift = _finish_bn(s_sum, s_sq, pooled.shape[0],
                                  p["gamma"], p["beta"])
        x = bn_relu(pooled, scale, shift).reshape(n, d, ho, wo, cout)

    # blocks 3 & 4: Conv2d_in_3d -> BN -> ReLU (BN moments fused into the conv)
    for blk in ("b3", "b4"):
        p = params[blk]
        cout = p["w2"].shape[1]
        a2, (n, d, ho, wo) = im2col_2d(x)
        y, s_sum, s_sq = conv_matmul(a2, p["w2"], p["b2"], emit_stats=True)
        scale, shift = _finish_bn(s_sum, s_sq, y.shape[0], p["gamma"], p["beta"])
        x = bn_relu(y, scale, shift).reshape(n, d, ho, wo, cout)

    # decoder: max_pool3d over full D, adaptive avg over (H, W), then Linear.
    # Tiny (N x 256) tensors: keep in plain XLA (pallas_call overhead > work).
    x = jnp.max(x, axis=1)            # (N, H, W, C)
    x = jnp.mean(x, axis=(1, 2))      # (N, 256)
    logits = jnp.dot(x, params["dec_w"]) + params["dec_b"]
    return logits


# ------------------------------------------------------------ main
if __name__ == "__main__":
    key = jax.random.PRNGKey(0)
    k_in, k_par = jax.random.split(key)

    in_channels, n_classes = 4, 10
    N, D, H, W = 2, 8, 16, 16          # x: (N, C, D, H, W) like PyTorch NCDHW

    x = jax.random.normal(k_in, (N, in_channels, D, H, W), jnp.float32)
    params = init_params(k_par, in_channels, n_classes)

    fwd = jax.jit(cnn25d_forward)
    out = fwd(x, params)
    jax.block_until_ready(out)

    assert out.shape == (N, n_classes), out.shape
    assert bool(jnp.all(jnp.isfinite(out)))
    print("KERNEL_OK")
</pallas_src>

<mosaic_0001>
module attributes {stable_mosaic.version = 11 : i64} {
  func.func @_conv_kernel(%arg0: i32, %arg1: memref<512x36xbf16, #tpu.memory_space<vmem>>, %arg2: memref<36x32xbf16, #tpu.memory_space<vmem>>, %arg3: memref<1x32xf32, #tpu.memory_space<vmem>>, %arg4: memref<512x32xf32, #tpu.memory_space<vmem>>) attributes {dimension_semantics = [#tpu.dimension_semantics<parallel>], iteration_bounds = array<i64: 2>, scalar_prefetch = 0 : i64, scratch_operands = 0 : i64, tpu.core_type = #tpu.core_type<tc>, window_params = [{transform_indices = @transform_0, window_bounds = array<i64: 512, 36>}, {pipeline_mode = #tpu.pipeline_mode<synchronous>, transform_indices = @transform_1, window_bounds = array<i64: 36, 32>}, {pipeline_mode = #tpu.pipeline_mode<synchronous>, transform_indices = @transform_2, window_bounds = array<i64: 1, 32>}, {transform_indices = @transform_3, window_bounds = array<i64: 512, 32>}]} {
    %c0 = arith.constant 0 : index
    %c0_0 = arith.constant 0 : index
    %0 = vector.load %arg1[%c0, %c0_0] : memref<512x36xbf16, #tpu.memory_space<vmem>>, vector<512x36xbf16>
    %c0_1 = arith.constant 0 : index
    %c0_2 = arith.constant 0 : index
    %1 = vector.load %arg2[%c0_1, %c0_2] : memref<36x32xbf16, #tpu.memory_space<vmem>>, vector<36x32xbf16>
    %cst = arith.constant dense<0.000000e+00> : vector<512x32xf32>
    %2 = tpu.matmul %0, %1, %cst {dimension_numbers = #tpu.dot_dimension_numbers<[1], [0], [0], [1], [0, 0, 1, 1], [], []>} : vector<512x36xbf16>, vector<36x32xbf16>, vector<512x32xf32> -> vector<512x32xf32>
    %c0_3 = arith.constant 0 : index
    %c0_4 = arith.constant 0 : index
    %3 = vector.load %arg3[%c0_3, %c0_4] : memref<1x32xf32, #tpu.memory_space<vmem>>, vector<1x32xf32>
    %4 = vector.broadcast %3 : vector<1x32xf32> to vector<512x32xf32>
    %5 = arith.addf %2, %4 : vector<512x32xf32>
    %c0_5 = arith.constant 0 : index
    %c0_6 = arith.constant 0 : index
    %6 = vector.load %arg4[%c0_5, %c0_6] : memref<512x32xf32, #tpu.memory_space<vmem>>, vector<512x32xf32>
    tpu.vector_store %arg4[%c0_5, %c0_6], %5 {strides = array<i32>} : memref<512x32xf32, #tpu.memory_space<vmem>>, vector<512x32xf32>,
    return
  }
  func.func @transform_0(%arg0: i32) -> (i32, i32) {
    %c0_i32 = arith.constant 0 : i32
    %c0_i32_0 = arith.constant 0 : i32
    return %arg0, %c0_i32 : i32, i32
  }
  func.func @transform_1(%arg0: i32) -> (i32, i32) {
    %c0_i32 = arith.constant 0 : i32
    %c0_i32_0 = arith.constant 0 : i32
    %c0_i32_1 = arith.constant 0 : i32
    return %c0_i32, %c0_i32_0 : i32, i32
  }
  func.func @transform_2(%arg0: i32) -> (i32, i32) {
    %c0_i32 = arith.constant 0 : i32
    %c0_i32_0 = arith.constant 0 : i32
    %c0_i32_1 = arith.constant 0 : i32
    return %c0_i32, %c0_i32_0 : i32, i32
  }
  func.func @transform_3(%arg0: i32) -> (i32, i32) {
    %c0_i32 = arith.constant 0 : i32
    %c0_i32_0 = arith.constant 0 : i32
    return %arg0, %c0_i32 : i32, i32
  }
}

module attributes {stable_mosaic.version = 11 : i64} {
  func.func @_conv_kernel(%arg0: i32, %arg1: memref<512x96xbf16, #tpu.memory_space<vmem>>, %arg2: memref<96x32xbf16, #tpu.memory_space<vmem>>, %arg3: memref<1x32xf32, #tpu.memory_space<vmem>>, %arg4: memref<256x32xf32, #tpu.memory_space<vmem>>, %arg5: memref<1x1x32xf32, #tpu.memory_space<vmem>>, %arg6: memref<1x1x32xf32, #tpu.memory_space<vmem>>) attributes {dimension_semantics = [#tpu.dimension_semantics<parallel>], iteration_bounds = array<i64: 2>, scalar_prefetch = 0 : i64, scratch_operands = 0 : i64, tpu.core_type = #tpu.core_type<tc>, window_params = [{transform_indices = @transform_0, window_bounds = array<i64: 512, 96>}, {pipeline_mode = #tpu.pipeline_mode<synchronous>, transform_indices = @transform_1, window_bounds = array<i64: 96, 32>}, {pipeline_mode = #tpu.pipeline_mode<synchronous>, transform_indices = @transform_2, window_bounds = array<i64: 1, 32>}, {transform_indices = @transform_3, window_bounds = array<i64: 256, 32>}, {transform_indices = @transform_4, window_bounds = array<i64: 1, 1, 32>}, {transform_indices = @transform_5, window_bounds = array<i64: 1, 1, 32>}]} {
    %c0 = arith.constant 0 : index
    %c0_0 = arith.constant 0 : index
    %0 = vector.load %arg1[%c0, %c0_0] : memref<512x96xbf16, #tpu.memory_space<vmem>>, vector<512x96xbf16>
    %c0_1 = arith.constant 0 : index
    %c0_2 = arith.constant 0 : index
    %1 = vector.load %arg2[%c0_1, %c0_2] : memref<96x32xbf16, #tpu.memory_space<vmem>>, vector<96x32xbf16>
    %cst = arith.constant dense<0.000000e+00> : vector<512x32xf32>
    %2 = tpu.matmul %0, %1, %cst {dimension_numbers = #tpu.dot_dimension_numbers<[1], [0], [0], [1], [0, 0, 1, 1], [], []>} : vector<512x96xbf16>, vector<96x32xbf16>, vector<512x32xf32> -> vector<512x32xf32>
    %c0_3 = arith.constant 0 : index
    %c0_4 = arith.constant 0 : index
    %3 = vector.load %arg3[%c0_3, %c0_4] : memref<1x32xf32, #tpu.memory_space<vmem>>, vector<1x32xf32>
    %4 = vector.broadcast %3 : vector<1x32xf32> to vector<512x32xf32>
    %5 = arith.addf %2, %4 : vector<512x32xf32>
    %6 = vector.shape_cast %5 : vector<512x32xf32> to vector<4x2x64x32xf32>
    %cst_5 = arith.constant dense<0xFF800000> : vector<4x64x32xf32>
    %7 = vector.multi_reduction <maximumf>, %6, %cst_5 [1] : vector<4x2x64x32xf32> to vector<4x64x32xf32>
    %8 = vector.shape_cast %7 : vector<4x64x32xf32> to vector<256x32xf32>
    %c0_6 = arith.constant 0 : index
    %c0_7 = arith.constant 0 : index
    %9 = vector.load %arg4[%c0_6, %c0_7] : memref<256x32xf32, #tpu.memory_space<vmem>>, vector<256x32xf32>
    tpu.vector_store %arg4[%c0_6, %c0_7], %8 {strides = array<i32>} : memref<256x32xf32, #tpu.memory_space<vmem>>, vector<256x32xf32>,
    %cst_8 = arith.constant dense<0.000000e+00> : vector<32xf32>
    %10 = vector.multi_reduction <add>, %8, %cst_8 [0] : vector<256x32xf32> to vector<32xf32>
    %11 = vector.shape_cast %10 : vector<32xf32> to vector<1x1x32xf32>
    %c0_9 = arith.constant 0 : index
    %c0_10 = arith.constant 0 : index
    %c0_11 = arith.constant 0 : index
    %12 = vector.load %arg5[%c0_9, %c0_10, %c0_11] : memref<1x1x32xf32, #tpu.memory_space<vmem>>, vector<1x1x32xf32>
    tpu.vector_store %arg5[%c0_9, %c0_10, %c0_11], %11 {strides = array<i32>} : memref<1x1x32xf32, #tpu.memory_space<vmem>>, vector<1x1x32xf32>,
    %13 = arith.mulf %8, %8 : vector<256x32xf32>
    %cst_12 = arith.constant dense<0.000000e+00> : vector<32xf32>
    %14 = vector.multi_reduction <add>, %13, %cst_12 [0] : vector<256x32xf32> to vector<32xf32>
    %15 = vector.shape_cast %14 : vector<32xf32> to vector<1x1x32xf32>
    %c0_13 = arith.constant 0 : index
    %c0_14 = arith.constant 0 : index
    %c0_15 = arith.constant 0 : index
    %16 = vector.load %arg6[%c0_13, %c0_14, %c0_15] : memref<1x1x32xf32, #tpu.memory_space<vmem>>, vector<1x1x32xf32>
    tpu.vector_store %arg6[%c0_13, %c0_14, %c0_15], %15 {strides = array<i32>} : memref<1x1x32xf32, #tpu.memory_space<vmem>>, vector<1x1x32xf32>,
    return
  }
  func.func @transform_0(%arg0: i32) -> (i32, i32) {
    %c0_i32 = arith.constant 0 : i32
    %c0_i32_0 = arith.constant 0 : i32
    return %arg0, %c0_i32 : i32, i32
  }
  func.func @transform_1(%arg0: i32) -> (i32, i32) {
    %c0_i32 = arith.constant 0 : i32
    %c0_i32_0 = arith.constant 0 : i32
    %c0_i32_1 = arith.constant 0 : i32
    return %c0_i32, %c0_i32_0 : i32, i32
  }
  func.func @transform_2(%arg0: i32) -> (i32, i32) {
    %c0_i32 = arith.constant 0 : i32
    %c0_i32_0 = arith.constant 0 : i32
    %c0_i32_1 = arith.constant 0 : i32
    return %c0_i32, %c0_i32_0 : i32, i32
  }
  func.func @transform_3(%arg0: i32) -> (i32, i32) {
    %c0_i32 = arith.constant 0 : i32
    %c0_i32_0 = arith.constant 0 : i32
    return %arg0, %c0_i32 : i32, i32
  }
  func.func @transform_4(%arg0: i32) -> (i32, i32, i32) {
    %c0_i32 = arith.constant 0 : i32
    %c0_i32_0 = arith.constant 0 : i32
    %c0_i32_1 = arith.constant 0 : i32
    return %arg0, %c0_i32, %c0_i32_0 : i32, i32, i32
  }
  func.func @transform_5(%arg0: i32) -> (i32, i32, i32) {
    %c0_i32 = arith.constant 0 : i32
    %c0_i32_0 = arith.constant 0 : i32
    %c0_i32_1 = arith.constant 0 : i32
    return %arg0, %c0_i32, %c0_i32_0 : i32, i32, i32
  }
}

module attributes {stable_mosaic.version = 11 : i64} {
  func.func @_bn_relu_kernel(%arg0: i32, %arg1: memref<128x128xf32, #tpu.memory_space<vmem>>, %arg2: memref<1x128xf32, #tpu.memory_space<vmem>>, %arg3: memref<1x128xf32, #tpu.memory_space<vmem>>, %arg4: memref<128x128xf32, #tpu.memory_space<vmem>>) attributes {dimension_semantics = [#tpu.dimension_semantics<parallel>], iteration_bounds = array<i64: 1>, scalar_prefetch = 0 : i64, scratch_operands = 0 : i64, tpu.core_type = #tpu.core_type<tc>, window_params = [{transform_indices = @transform_0, window_bounds = array<i64: 128, 128>}, {pipeline_mode = #tpu.pipeline_mode<synchronous>, transform_indices = @transform_1, window_bounds = array<i64: 1, 128>}, {pipeline_mode = #tpu.pipeline_mode<synchronous>, transform_indices = @transform_2, window_bounds = array<i64: 1, 128>}, {transform_indices = @transform_3, window_bounds = array<i64: 128, 128>}]} {
    %c0 = arith.constant 0 : index
    %c0_0 = arith.constant 0 : index
    %0 = vector.load %arg1[%c0, %c0_0] : memref<128x128xf32, #tpu.memory_space<vmem>>, vector<128x128xf32>
    %c0_1 = arith.constant 0 : index
    %c0_2 = arith.constant 0 : index
    %1 = vector.load %arg2[%c0_1, %c0_2] : memref<1x128xf32, #tpu.memory_space<vmem>>, vector<1x128xf32>
    %2 = vector.broadcast %1 : vector<1x128xf32> to vector<128x128xf32>
    %3 = arith.mulf %0, %2 : vector<128x128xf32>
    %c0_3 = arith.constant 0 : index
    %c0_4 = arith.constant 0 : index
    %4 = vector.load %arg3[%c0_3, %c0_4] : memref<1x128xf32, #tpu.memory_space<vmem>>, vector<1x128xf32>
    %5 = vector.broadcast %4 : vector<1x128xf32> to vector<128x128xf32>
    %6 = arith.addf %3, %5 : vector<128x128xf32>
    %cst = arith.constant 0.000000e+00 : f32
    %7 = vector.broadcast %cst : f32 to vector<128x128xf32>
    %8 = arith.maximumf %6, %7 : vector<128x128xf32>
    %c0_5 = arith.constant 0 : index
    %c0_6 = arith.constant 0 : index
    %9 = vector.load %arg4[%c0_5, %c0_6] : memref<128x128xf32, #tpu.memory_space<vmem>>, vector<128x128xf32>
    tpu.vector_store %arg4[%c0_5, %c0_6], %8 {strides = array<i32>} : memref<128x128xf32, #tpu.memory_space<vmem>>, vector<128x128xf32>,
    return
  }
  func.func @transform_0(%arg0: i32) -> (i32, i32) {
    %c0_i32 = arith.constant 0 : i32
    %c0_i32_0 = arith.constant 0 : i32
    return %arg0, %c0_i32 : i32, i32
  }
  func.func @transform_1(%arg0: i32) -> (i32, i32) {
    %c0_i32 = arith.constant 0 : i32
    %c0_i32_0 = arith.constant 0 : i32
    %c0_i32_1 = arith.constant 0 : i32
    return %c0_i32, %c0_i32_0 : i32, i32
  }
  func.func @transform_2(%arg0: i32) -> (i32, i32) {
    %c0_i32 = arith.constant 0 : i32
    %c0_i32_0 = arith.constant 0 : i32
    %c0_i32_1 = arith.constant 0 : i32
    return %c0_i32, %c0_i32_0 : i32, i32
  }
  func.func @transform_3(%arg0: i32) -> (i32, i32) {
    %c0_i32 = arith.constant 0 : i32
    %c0_i32_0 = arith.constant 0 : i32
    return %arg0, %c0_i32 : i32, i32
  }
}

module attributes {stable_mosaic.version = 11 : i64} {
  func.func @_conv_kernel(%arg0: i32, %arg1: memref<128x288xbf16, #tpu.memory_space<vmem>>, %arg2: memref<288x64xbf16, #tpu.memory_space<vmem>>, %arg3: memref<1x64xf32, #tpu.memory_space<vmem>>, %arg4: memref<128x64xf32, #tpu.memory_space<vmem>>) attributes {dimension_semantics = [#tpu.dimension_semantics<parallel>], iteration_bounds = array<i64: 1>, scalar_prefetch = 0 : i64, scratch_operands = 0 : i64, tpu.core_type = #tpu.core_type<tc>, window_params = [{transform_indices = @transform_0, window_bounds = array<i64: 128, 288>}, {pipeline_mode = #tpu.pipeline_mode<synchronous>, transform_indices = @transform_1, window_bounds = array<i64: 288, 64>}, {pipeline_mode = #tpu.pipeline_mode<synchronous>, transform_indices = @transform_2, window_bounds = array<i64: 1, 64>}, {transform_indices = @transform_3, window_bounds = array<i64: 128, 64>}]} {
    %c0 = arith.constant 0 : index
    %c0_0 = arith.constant 0 : index
    %0 = vector.load %arg1[%c0, %c0_0] : memref<128x288xbf16, #tpu.memory_space<vmem>>, vector<128x288xbf16>
    %c0_1 = arith.constant 0 : index
    %c0_2 = arith.constant 0 : index
    %1 = vector.load %arg2[%c0_1, %c0_2] : memref<288x64xbf16, #tpu.memory_space<vmem>>, vector<288x64xbf16>
    %cst = arith.constant dense<0.000000e+00> : vector<128x64xf32>
    %2 = tpu.matmul %0, %1, %cst {dimension_numbers = #tpu.dot_dimension_numbers<[1], [0], [0], [1], [0, 0, 1, 1], [], []>} : vector<128x288xbf16>, vector<288x64xbf16>, vector<128x64xf32> -> vector<128x64xf32>
    %c0_3 = arith.constant 0 : index
    %c0_4 = arith.constant 0 : index
    %3 = vector.load %arg3[%c0_3, %c0_4] : memref<1x64xf32, #tpu.memory_space<vmem>>, vector<1x64xf32>
    %4 = vector.broadcast %3 : vector<1x64xf32> to vector<128x64xf32>
    %5 = arith.addf %2, %4 : vector<128x64xf32>
    %c0_5 = arith.constant 0 : index
    %c0_6 = arith.constant 0 : index
    %6 = vector.load %arg4[%c0_5, %c0_6] : memref<128x64xf32, #tpu.memory_space<vmem>>, vector<128x64xf32>
    tpu.vector_store %arg4[%c0_5, %c0_6], %5 {strides = array<i32>} : memref<128x64xf32, #tpu.memory_space<vmem>>, vector<128x64xf32>,
    return
  }
  func.func @transform_0(%arg0: i32) -> (i32, i32) {
    %c0_i32 = arith.constant 0 : i32
    %c0_i32_0 = arith.constant 0 : i32
    return %arg0, %c0_i32 : i32, i32
  }
  func.func @transform_1(%arg0: i32) -> (i32, i32) {
    %c0_i32 = arith.constant 0 : i32
    %c0_i32_0 = arith.constant 0 : i32
    %c0_i32_1 = arith.constant 0 : i32
    return %c0_i32, %c0_i32_0 : i32, i32
  }
  func.func @transform_2(%arg0: i32) -> (i32, i32) {
    %c0_i32 = arith.constant 0 : i32
    %c0_i32_0 = arith.constant 0 : i32
    %c0_i32_1 = arith.constant 0 : i32
    return %c0_i32, %c0_i32_0 : i32, i32
  }
  func.func @transform_3(%arg0: i32) -> (i32, i32) {
    %c0_i32 = arith.constant 0 : i32
    %c0_i32_0 = arith.constant 0 : i32
    return %arg0, %c0_i32 : i32, i32
  }
}

module attributes {stable_mosaic.version = 11 : i64} {
  func.func @_conv_kernel(%arg0: i32, %arg1: memref<128x192xbf16, #tpu.memory_space<vmem>>, %arg2: memref<192x64xbf16, #tpu.memory_space<vmem>>, %arg3: memref<1x64xf32, #tpu.memory_space<vmem>>, %arg4: memref<64x64xf32, #tpu.memory_space<vmem>>, %arg5: memref<1x1x64xf32, #tpu.memory_space<vmem>>, %arg6: memref<1x1x64xf32, #tpu.memory_space<vmem>>) attributes {dimension_semantics = [#tpu.dimension_semantics<parallel>], iteration_bounds = array<i64: 1>, scalar_prefetch = 0 : i64, scratch_operands = 0 : i64, tpu.core_type = #tpu.core_type<tc>, window_params = [{transform_indices = @transform_0, window_bounds = array<i64: 128, 192>}, {pipeline_mode = #tpu.pipeline_mode<synchronous>, transform_indices = @transform_1, window_bounds = array<i64: 192, 64>}, {pipeline_mode = #tpu.pipeline_mode<synchronous>, transform_indices = @transform_2, window_bounds = array<i64: 1, 64>}, {transform_indices = @transform_3, window_bounds = array<i64: 64, 64>}, {transform_indices = @transform_4, window_bounds = array<i64: 1, 1, 64>}, {transform_indices = @transform_5, window_bounds = array<i64: 1, 1, 64>}]} {
    %c0 = arith.constant 0 : index
    %c0_0 = arith.constant 0 : index
    %0 = vector.load %arg1[%c0, %c0_0] : memref<128x192xbf16, #tpu.memory_space<vmem>>, vector<128x192xbf16>
    %c0_1 = arith.constant 0 : index
    %c0_2 = arith.constant 0 : index
    %1 = vector.load %arg2[%c0_1, %c0_2] : memref<192x64xbf16, #tpu.memory_space<vmem>>, vector<192x64xbf16>
    %cst = arith.constant dense<0.000000e+00> : vector<128x64xf32>
    %2 = tpu.matmul %0, %1, %cst {dimension_numbers = #tpu.dot_dimension_numbers<[1], [0], [0], [1], [0, 0, 1, 1], [], []>} : vector<128x192xbf16>, vector<192x64xbf16>, vector<128x64xf32> -> vector<128x64xf32>
    %c0_3 = arith.constant 0 : index
    %c0_4 = arith.constant 0 : index
    %3 = vector.load %arg3[%c0_3, %c0_4] : memref<1x64xf32, #tpu.memory_space<vmem>>, vector<1x64xf32>
    %4 = vector.broadcast %3 : vector<1x64xf32> to vector<128x64xf32>
    %5 = arith.addf %2, %4 : vector<128x64xf32>
    %6 = vector.shape_cast %5 : vector<128x64xf32> to vector<4x2x16x64xf32>
    %cst_5 = arith.constant dense<0xFF800000> : vector<4x16x64xf32>
    %7 = vector.multi_reduction <maximumf>, %6, %cst_5 [1] : vector<4x2x16x64xf32> to vector<4x16x64xf32>
    %8 = vector.shape_cast %7 : vector<4x16x64xf32> to vector<64x64xf32>
    %c0_6 = arith.constant 0 : index
    %c0_7 = arith.constant 0 : index
    %9 = vector.load %arg4[%c0_6, %c0_7] : memref<64x64xf32, #tpu.memory_space<vmem>>, vector<64x64xf32>
    tpu.vector_store %arg4[%c0_6, %c0_7], %8 {strides = array<i32>} : memref<64x64xf32, #tpu.memory_space<vmem>>, vector<64x64xf32>,
    %cst_8 = arith.constant dense<0.000000e+00> : vector<64xf32>
    %10 = vector.multi_reduction <add>, %8, %cst_8 [0] : vector<64x64xf32> to vector<64xf32>
    %11 = vector.shape_cast %10 : vector<64xf32> to vector<1x1x64xf32>
    %c0_9 = arith.constant 0 : index
    %c0_10 = arith.constant 0 : index
    %c0_11 = arith.constant 0 : index
    %12 = vector.load %arg5[%c0_9, %c0_10, %c0_11] : memref<1x1x64xf32, #tpu.memory_space<vmem>>, vector<1x1x64xf32>
    tpu.vector_store %arg5[%c0_9, %c0_10, %c0_11], %11 {strides = array<i32>} : memref<1x1x64xf32, #tpu.memory_space<vmem>>, vector<1x1x64xf32>,
    %13 = arith.mulf %8, %8 : vector<64x64xf32>
    %cst_12 = arith.constant dense<0.000000e+00> : vector<64xf32>
    %14 = vector.multi_reduction <add>, %13, %cst_12 [0] : vector<64x64xf32> to vector<64xf32>
    %15 = vector.shape_cast %14 : vector<64xf32> to vector<1x1x64xf32>
    %c0_13 = arith.constant 0 : index
    %c0_14 = arith.constant 0 : index
    %c0_15 = arith.constant 0 : index
    %16 = vector.load %arg6[%c0_13, %c0_14, %c0_15] : memref<1x1x64xf32, #tpu.memory_space<vmem>>, vector<1x1x64xf32>
    tpu.vector_store %arg6[%c0_13, %c0_14, %c0_15], %15 {strides = array<i32>} : memref<1x1x64xf32, #tpu.memory_space<vmem>>, vector<1x1x64xf32>,
    return
  }
  func.func @transform_0(%arg0: i32) -> (i32, i32) {
    %c0_i32 = arith.constant 0 : i32
    %c0_i32_0 = arith.constant 0 : i32
    return %arg0, %c0_i32 : i32, i32
  }
  func.func @transform_1(%arg0: i32) -> (i32, i32) {
    %c0_i32 = arith.constant 0 : i32
    %c0_i32_0 = arith.constant 0 : i32
    %c0_i32_1 = arith.constant 0 : i32
    return %c0_i32, %c0_i32_0 : i32, i32
  }
  func.func @transform_2(%arg0: i32) -> (i32, i32) {
    %c0_i32 = arith.constant 0 : i32
    %c0_i32_0 = arith.constant 0 : i32
    %c0_i32_1 = arith.constant 0 : i32
    return %c0_i32, %c0_i32_0 : i32, i32
  }
  func.func @transform_3(%arg0: i32) -> (i32, i32) {
    %c0_i32 = arith.constant 0 : i32
    %c0_i32_0 = arith.constant 0 : i32
    return %arg0, %c0_i32 : i32, i32
  }
  func.func @transform_4(%arg0: i32) -> (i32, i32, i32) {
    %c0_i32 = arith.constant 0 : i32
    %c0_i32_0 = arith.constant 0 : i32
    %c0_i32_1 = arith.constant 0 : i32
    return %arg0, %c0_i32, %c0_i32_0 : i32, i32, i32
  }
  func.func @transform_5(%arg0: i32) -> (i32, i32, i32) {
    %c0_i32 = arith.constant 0 : i32
    %c0_i32_0 = arith.constant 0 : i32
    %c0_i32_1 = arith.constant 0 : i32
    return %arg0, %c0_i32, %c0_i32_0 : i32, i32, i32
  }
}

module attributes {stable_mosaic.version = 11 : i64} {
  func.func @_bn_relu_kernel(%arg0: i32, %arg1: memref<32x128xf32, #tpu.memory_space<vmem>>, %arg2: memref<1x128xf32, #tpu.memory_space<vmem>>, %arg3: memref<1x128xf32, #tpu.memory_space<vmem>>, %arg4: memref<32x128xf32, #tpu.memory_space<vmem>>) attributes {dimension_semantics = [#tpu.dimension_semantics<parallel>], iteration_bounds = array<i64: 1>, scalar_prefetch = 0 : i64, scratch_operands = 0 : i64, tpu.core_type = #tpu.core_type<tc>, window_params = [{transform_indices = @transform_0, window_bounds = array<i64: 32, 128>}, {pipeline_mode = #tpu.pipeline_mode<synchronous>, transform_indices = @transform_1, window_bounds = array<i64: 1, 128>}, {pipeline_mode = #tpu.pipeline_mode<synchronous>, transform_indices = @transform_2, window_bounds = array<i64: 1, 128>}, {transform_indices = @transform_3, window_bounds = array<i64: 32, 128>}]} {
    %c0 = arith.constant 0 : index
    %c0_0 = arith.constant 0 : index
    %0 = vector.load %arg1[%c0, %c0_0] : memref<32x128xf32, #tpu.memory_space<vmem>>, vector<32x128xf32>
    %c0_1 = arith.constant 0 : index
    %c0_2 = arith.constant 0 : index
    %1 = vector.load %arg2[%c0_1, %c0_2] : memref<1x128xf32, #tpu.memory_space<vmem>>, vector<1x128xf32>
    %2 = vector.broadcast %1 : vector<1x128xf32> to vector<32x128xf32>
    %3 = arith.mulf %0, %2 : vector<32x128xf32>
    %c0_3 = arith.constant 0 : index
    %c0_4 = arith.constant 0 : index
    %4 = vector.load %arg3[%c0_3, %c0_4] : memref<1x128xf32, #tpu.memory_space<vmem>>, vector<1x128xf32>
    %5 = vector.broadcast %4 : vector<1x128xf32> to vector<32x128xf32>
    %6 = arith.addf %3, %5 : vector<32x128xf32>
    %cst = arith.constant 0.000000e+00 : f32
    %7 = vector.broadcast %cst : f32 to vector<32x128xf32>
    %8 = arith.maximumf %6, %7 : vector<32x128xf32>
    %c0_5 = arith.constant 0 : index
    %c0_6 = arith.constant 0 : index
    %9 = vector.load %arg4[%c0_5, %c0_6] : memref<32x128xf32, #tpu.memory_space<vmem>>, vector<32x128xf32>
    tpu.vector_store %arg4[%c0_5, %c0_6], %8 {strides = array<i32>} : memref<32x128xf32, #tpu.memory_space<vmem>>, vector<32x128xf32>,
    return
  }
  func.func @transform_0(%arg0: i32) -> (i32, i32) {
    %c0_i32 = arith.constant 0 : i32
    %c0_i32_0 = arith.constant 0 : i32
    return %arg0, %c0_i32 : i32, i32
  }
  func.func @transform_1(%arg0: i32) -> (i32, i32) {
    %c0_i32 = arith.constant 0 : i32
    %c0_i32_0 = arith.constant 0 : i32
    %c0_i32_1 = arith.constant 0 : i32
    return %c0_i32, %c0_i32_0 : i32, i32
  }
  func.func @transform_2(%arg0: i32) -> (i32, i32) {
    %c0_i32 = arith.constant 0 : i32
    %c0_i32_0 = arith.constant 0 : i32
    %c0_i32_1 = arith.constant 0 : i32
    return %c0_i32, %c0_i32_0 : i32, i32
  }
  func.func @transform_3(%arg0: i32) -> (i32, i32) {
    %c0_i32 = arith.constant 0 : i32
    %c0_i32_0 = arith.constant 0 : i32
    return %arg0, %c0_i32 : i32, i32
  }
}

module attributes {stable_mosaic.version = 11 : i64} {
  func.func @_bn_relu_kernel(%arg0: i32, %arg1: memref<16x128xf32, #tpu.memory_space<vmem>>, %arg2: memref<1x128xf32, #tpu.memory_space<vmem>>, %arg3: memref<1x128xf32, #tpu.memory_space<vmem>>, %arg4: memref<16x128xf32, #tpu.memory_space<vmem>>) attributes {dimension_semantics = [#tpu.dimension_semantics<parallel>], iteration_bounds = array<i64: 1>, scalar_prefetch = 0 : i64, scratch_operands = 0 : i64, tpu.core_type = #tpu.core_type<tc>, window_params = [{transform_indices = @transform_0, window_bounds = array<i64: 16, 128>}, {pipeline_mode = #tpu.pipeline_mode<synchronous>, transform_indices = @transform_1, window_bounds = array<i64: 1, 128>}, {pipeline_mode = #tpu.pipeline_mode<synchronous>, transform_indices = @transform_2, window_bounds = array<i64: 1, 128>}, {transform_indices = @transform_3, window_bounds = array<i64: 16, 128>}]} {
    %c0 = arith.constant 0 : index
    %c0_0 = arith.constant 0 : index
    %0 = vector.load %arg1[%c0, %c0_0] : memref<16x128xf32, #tpu.memory_space<vmem>>, vector<16x128xf32>
    %c0_1 = arith.constant 0 : index
    %c0_2 = arith.constant 0 : index
    %1 = vector.load %arg2[%c0_1, %c0_2] : memref<1x128xf32, #tpu.memory_space<vmem>>, vector<1x128xf32>
    %2 = vector.broadcast %1 : vector<1x128xf32> to vector<16x128xf32>
    %3 = arith.mulf %0, %2 : vector<16x128xf32>
    %c0_3 = arith.constant 0 : index
    %c0_4 = arith.constant 0 : index
    %4 = vector.load %arg3[%c0_3, %c0_4] : memref<1x128xf32, #tpu.memory_space<vmem>>, vector<1x128xf32>
    %5 = vector.broadcast %4 : vector<1x128xf32> to vector<16x128xf32>
    %6 = arith.addf %3, %5 : vector<16x128xf32>
    %cst = arith.constant 0.000000e+00 : f32
    %7 = vector.broadcast %cst : f32 to vector<16x128xf32>
    %8 = arith.maximumf %6, %7 : vector<16x128xf32>
    %c0_5 = arith.constant 0 : index
    %c0_6 = arith.constant 0 : index
    %9 = vector.load %arg4[%c0_5, %c0_6] : memref<16x128xf32, #tpu.memory_space<vmem>>, vector<16x128xf32>
    tpu.vector_store %arg4[%c0_5, %c0_6], %8 {strides = array<i32>} : memref<16x128xf32, #tpu.memory_space<vmem>>, vector<16x128xf32>,
    return
  }
  func.func @transform_0(%arg0: i32) -> (i32, i32) {
    %c0_i32 = arith.constant 0 : i32
    %c0_i32_0 = arith.constant 0 : i32
    return %arg0, %c0_i32 : i32, i32
  }
  func.func @transform_1(%arg0: i32) -> (i32, i32) {
    %c0_i32 = arith.constant 0 : i32
    %c0_i32_0 = arith.constant 0 : i32
    %c0_i32_1 = arith.constant 0 : i32
    return %c0_i32, %c0_i32_0 : i32, i32
  }
  func.func @transform_2(%arg0: i32) -> (i32, i32) {
    %c0_i32 = arith.constant 0 : i32
    %c0_i32_0 = arith.constant 0 : i32
    %c0_i32_1 = arith.constant 0 : i32
    return %c0_i32, %c0_i32_0 : i32, i32
  }
  func.func @transform_3(%arg0: i32) -> (i32, i32) {
    %c0_i32 = arith.constant 0 : i32
    %c0_i32_0 = arith.constant 0 : i32
    return %arg0, %c0_i32 : i32, i32
  }
}

module attributes {stable_mosaic.version = 11 : i64} {
  func.func @_conv_kernel(%arg0: i32, %arg1: memref<16x576xbf16, #tpu.memory_space<vmem>>, %arg2: memref<576x128xbf16, #tpu.memory_space<vmem>>, %arg3: memref<1x128xf32, #tpu.memory_space<vmem>>, %arg4: memref<16x128xf32, #tpu.memory_space<vmem>>, %arg5: memref<1x1x128xf32, #tpu.memory_space<vmem>>, %arg6: memref<1x1x128xf32, #tpu.memory_space<vmem>>) attributes {dimension_semantics = [#tpu.dimension_semantics<parallel>], iteration_bounds = array<i64: 1>, scalar_prefetch = 0 : i64, scratch_operands = 0 : i64, tpu.core_type = #tpu.core_type<tc>, window_params = [{transform_indices = @transform_0, window_bounds = array<i64: 16, 576>}, {pipeline_mode = #tpu.pipeline_mode<synchronous>, transform_indices = @transform_1, window_bounds = array<i64: 576, 128>}, {pipeline_mode = #tpu.pipeline_mode<synchronous>, transform_indices = @transform_2, window_bounds = array<i64: 1, 128>}, {transform_indices = @transform_3, window_bounds = array<i64: 16, 128>}, {transform_indices = @transform_4, window_bounds = array<i64: 1, 1, 128>}, {transform_indices = @transform_5, window_bounds = array<i64: 1, 1, 128>}]} {
    %c0 = arith.constant 0 : index
    %c0_0 = arith.constant 0 : index
    %0 = vector.load %arg1[%c0, %c0_0] : memref<16x576xbf16, #tpu.memory_space<vmem>>, vector<16x576xbf16>
    %c0_1 = arith.constant 0 : index
    %c0_2 = arith.constant 0 : index
    %1 = vector.load %arg2[%c0_1, %c0_2] : memref<576x128xbf16, #tpu.memory_space<vmem>>, vector<576x128xbf16>
    %cst = arith.constant dense<0.000000e+00> : vector<16x128xf32>
    %2 = tpu.matmul %0, %1, %cst {dimension_numbers = #tpu.dot_dimension_numbers<[1], [0], [0], [1], [0, 0, 1, 1], [], []>} : vector<16x576xbf16>, vector<576x128xbf16>, vector<16x128xf32> -> vector<16x128xf32>
    %c0_3 = arith.constant 0 : index
    %c0_4 = arith.constant 0 : index
    %3 = vector.load %arg3[%c0_3, %c0_4] : memref<1x128xf32, #tpu.memory_space<vmem>>, vector<1x128xf32>
    %4 = vector.broadcast %3 : vector<1x128xf32> to vector<16x128xf32>
    %5 = arith.addf %2, %4 : vector<16x128xf32>
    %c0_5 = arith.constant 0 : index
    %c0_6 = arith.constant 0 : index
    %6 = vector.load %arg4[%c0_5, %c0_6] : memref<16x128xf32, #tpu.memory_space<vmem>>, vector<16x128xf32>
    tpu.vector_store %arg4[%c0_5, %c0_6], %5 {strides = array<i32>} : memref<16x128xf32, #tpu.memory_space<vmem>>, vector<16x128xf32>,
    %cst_7 = arith.constant dense<0.000000e+00> : vector<128xf32>
    %7 = vector.multi_reduction <add>, %5, %cst_7 [0] : vector<16x128xf32> to vector<128xf32>
    %8 = vector.shape_cast %7 : vector<128xf32> to vector<1x1x128xf32>
    %c0_8 = arith.constant 0 : index
    %c0_9 = arith.constant 0 : index
    %c0_10 = arith.constant 0 : index
    %9 = vector.load %arg5[%c0_8, %c0_9, %c0_10] : memref<1x1x128xf32, #tpu.memory_space<vmem>>, vector<1x1x128xf32>
    tpu.vector_store %arg5[%c0_8, %c0_9, %c0_10], %8 {strides = array<i32>} : memref<1x1x128xf32, #tpu.memory_space<vmem>>, vector<1x1x128xf32>,
    %10 = arith.mulf %5, %5 : vector<16x128xf32>
    %cst_11 = arith.constant dense<0.000000e+00> : vector<128xf32>
    %11 = vector.multi_reduction <add>, %10, %cst_11 [0] : vector<16x128xf32> to vector<128xf32>
    %12 = vector.shape_cast %11 : vector<128xf32> to vector<1x1x128xf32>
    %c0_12 = arith.constant 0 : index
    %c0_13 = arith.constant 0 : index
    %c0_14 = arith.constant 0 : index
    %13 = vector.load %arg6[%c0_12, %c0_13, %c0_14] : memref<1x1x128xf32, #tpu.memory_space<vmem>>, vector<1x1x128xf32>
    tpu.vector_store %arg6[%c0_12, %c0_13, %c0_14], %12 {strides = array<i32>} : memref<1x1x128xf32, #tpu.memory_space<vmem>>, vector<1x1x128xf32>,
    return
  }
  func.func @transform_0(%arg0: i32) -> (i32, i32) {
    %c0_i32 = arith.constant 0 : i32
    %c0_i32_0 = arith.constant 0 : i32
    return %arg0, %c0_i32 : i32, i32
  }
  func.func @transform_1(%arg0: i32) -> (i32, i32) {
    %c0_i32 = arith.constant 0 : i32
    %c0_i32_0 = arith.constant 0 : i32
    %c0_i32_1 = arith.constant 0 : i32
    return %c0_i32, %c0_i32_0 : i32, i32
  }
  func.func @transform_2(%arg0: i32) -> (i32, i32) {
    %c0_i32 = arith.constant 0 : i32
    %c0_i32_0 = arith.constant 0 : i32
    %c0_i32_1 = arith.constant 0 : i32
    return %c0_i32, %c0_i32_0 : i32, i32
  }
  func.func @transform_3(%arg0: i32) -> (i32, i32) {
    %c0_i32 = arith.constant 0 : i32
    %c0_i32_0 = arith.constant 0 : i32
    return %arg0, %c0_i32 : i32, i32
  }
  func.func @transform_4(%arg0: i32) -> (i32, i32, i32) {
    %c0_i32 = arith.constant 0 : i32
    %c0_i32_0 = arith.constant 0 : i32
    %c0_i32_1 = arith.constant 0 : i32
    return %arg0, %c0_i32, %c0_i32_0 : i32, i32, i32
  }
  func.func @transform_5(%arg0: i32) -> (i32, i32, i32) {
    %c0_i32 = arith.constant 0 : i32
    %c0_i32_0 = arith.constant 0 : i32
    %c0_i32_1 = arith.constant 0 : i32
    return %arg0, %c0_i32, %c0_i32_0 : i32, i32, i32
  }
}

module attributes {stable_mosaic.version = 11 : i64} {
  func.func @_conv_kernel(%arg0: i32, %arg1: memref<4x1152xbf16, #tpu.memory_space<vmem>>, %arg2: memref<1152x256xbf16, #tpu.memory_space<vmem>>, %arg3: memref<1x256xf32, #tpu.memory_space<vmem>>, %arg4: memref<4x256xf32, #tpu.memory_space<vmem>>, %arg5: memref<1x1x256xf32, #tpu.memory_space<vmem>>, %arg6: memref<1x1x256xf32, #tpu.memory_space<vmem>>) attributes {dimension_semantics = [#tpu.dimension_semantics<parallel>], iteration_bounds = array<i64: 1>, scalar_prefetch = 0 : i64, scratch_operands = 0 : i64, tpu.core_type = #tpu.core_type<tc>, window_params = [{transform_indices = @transform_0, window_bounds = array<i64: 4, 1152>}, {pipeline_mode = #tpu.pipeline_mode<synchronous>, transform_indices = @transform_1, window_bounds = array<i64: 1152, 256>}, {pipeline_mode = #tpu.pipeline_mode<synchronous>, transform_indices = @transform_2, window_bounds = array<i64: 1, 256>}, {transform_indices = @transform_3, window_bounds = array<i64: 4, 256>}, {transform_indices = @transform_4, window_bounds = array<i64: 1, 1, 256>}, {transform_indices = @transform_5, window_bounds = array<i64: 1, 1, 256>}]} {
    %c0 = arith.constant 0 : index
    %c0_0 = arith.constant 0 : index
    %0 = vector.load %arg1[%c0, %c0_0] : memref<4x1152xbf16, #tpu.memory_space<vmem>>, vector<4x1152xbf16>
    %c0_1 = arith.constant 0 : index
    %c0_2 = arith.constant 0 : index
    %1 = vector.load %arg2[%c0_1, %c0_2] : memref<1152x256xbf16, #tpu.memory_space<vmem>>, vector<1152x256xbf16>
    %cst = arith.constant dense<0.000000e+00> : vector<4x256xf32>
    %2 = tpu.matmul %0, %1, %cst {dimension_numbers = #tpu.dot_dimension_numbers<[1], [0], [0], [1], [0, 0, 1, 1], [], []>} : vector<4x1152xbf16>, vector<1152x256xbf16>, vector<4x256xf32> -> vector<4x256xf32>
    %c0_3 = arith.constant 0 : index
    %c0_4 = arith.constant 0 : index
    %3 = vector.load %arg3[%c0_3, %c0_4] : memref<1x256xf32, #tpu.memory_space<vmem>>, vector<1x256xf32>
    %4 = vector.broadcast %3 : vector<1x256xf32> to vector<4x256xf32>
    %5 = arith.addf %2, %4 : vector<4x256xf32>
    %c0_5 = arith.constant 0 : index
    %c0_6 = arith.constant 0 : index
    %6 = vector.load %arg4[%c0_5, %c0_6] : memref<4x256xf32, #tpu.memory_space<vmem>>, vector<4x256xf32>
    tpu.vector_store %arg4[%c0_5, %c0_6], %5 {strides = array<i32>} : memref<4x256xf32, #tpu.memory_space<vmem>>, vector<4x256xf32>,
    %cst_7 = arith.constant dense<0.000000e+00> : vector<256xf32>
    %7 = vector.multi_reduction <add>, %5, %cst_7 [0] : vector<4x256xf32> to vector<256xf32>
    %8 = vector.shape_cast %7 : vector<256xf32> to vector<1x1x256xf32>
    %c0_8 = arith.constant 0 : index
    %c0_9 = arith.constant 0 : index
    %c0_10 = arith.constant 0 : index
    %9 = vector.load %arg5[%c0_8, %c0_9, %c0_10] : memref<1x1x256xf32, #tpu.memory_space<vmem>>, vector<1x1x256xf32>
    tpu.vector_store %arg5[%c0_8, %c0_9, %c0_10], %8 {strides = array<i32>} : memref<1x1x256xf32, #tpu.memory_space<vmem>>, vector<1x1x256xf32>,
    %10 = arith.mulf %5, %5 : vector<4x256xf32>
    %cst_11 = arith.constant dense<0.000000e+00> : vector<256xf32>
    %11 = vector.multi_reduction <add>, %10, %cst_11 [0] : vector<4x256xf32> to vector<256xf32>
    %12 = vector.shape_cast %11 : vector<256xf32> to vector<1x1x256xf32>
    %c0_12 = arith.constant 0 : index
    %c0_13 = arith.constant 0 : index
    %c0_14 = arith.constant 0 : index
    %13 = vector.load %arg6[%c0_12, %c0_13, %c0_14] : memref<1x1x256xf32, #tpu.memory_space<vmem>>, vector<1x1x256xf32>
    tpu.vector_store %arg6[%c0_12, %c0_13, %c0_14], %12 {strides = array<i32>} : memref<1x1x256xf32, #tpu.memory_space<vmem>>, vector<1x1x256xf32>,
    return
  }
  func.func @transform_0(%arg0: i32) -> (i32, i32) {
    %c0_i32 = arith.constant 0 : i32
    %c0_i32_0 = arith.constant 0 : i32
    return %arg0, %c0_i32 : i32, i32
  }
  func.func @transform_1(%arg0: i32) -> (i32, i32) {
    %c0_i32 = arith.constant 0 : i32
    %c0_i32_0 = arith.constant 0 : i32
    %c0_i32_1 = arith.constant 0 : i32
    return %c0_i32, %c0_i32_0 : i32, i32
  }
  func.func @transform_2(%arg0: i32) -> (i32, i32) {
    %c0_i32 = arith.constant 0 : i32
    %c0_i32_0 = arith.constant 0 : i32
    %c0_i32_1 = arith.constant 0 : i32
    return %c0_i32, %c0_i32_0 : i32, i32
  }
  func.func @transform_3(%arg0: i32) -> (i32, i32) {
    %c0_i32 = arith.constant 0 : i32
    %c0_i32_0 = arith.constant 0 : i32
    return %arg0, %c0_i32 : i32, i32
  }
  func.func @transform_4(%arg0: i32) -> (i32, i32, i32) {
    %c0_i32 = arith.constant 0 : i32
    %c0_i32_0 = arith.constant 0 : i32
    %c0_i32_1 = arith.constant 0 : i32
    return %arg0, %c0_i32, %c0_i32_0 : i32, i32, i32
  }
  func.func @transform_5(%arg0: i32) -> (i32, i32, i32) {
    %c0_i32 = arith.constant 0 : i32
    %c0_i32_0 = arith.constant 0 : i32
    %c0_i32_1 = arith.constant 0 : i32
    return %arg0, %c0_i32, %c0_i32_0 : i32, i32, i32
  }
}

module attributes {stable_mosaic.version = 11 : i64} {
  func.func @_bn_relu_kernel(%arg0: i32, %arg1: memref<4x256xf32, #tpu.memory_space<vmem>>, %arg2: memref<1x256xf32, #tpu.memory_space<vmem>>, %arg3: memref<1x256xf32, #tpu.memory_space<vmem>>, %arg4: memref<4x256xf32, #tpu.memory_space<vmem>>) attributes {dimension_semantics = [#tpu.dimension_semantics<parallel>], iteration_bounds = array<i64: 1>, scalar_prefetch = 0 : i64, scratch_operands = 0 : i64, tpu.core_type = #tpu.core_type<tc>, window_params = [{transform_indices = @transform_0, window_bounds = array<i64: 4, 256>}, {pipeline_mode = #tpu.pipeline_mode<synchronous>, transform_indices = @transform_1, window_bounds = array<i64: 1, 256>}, {pipeline_mode = #tpu.pipeline_mode<synchronous>, transform_indices = @transform_2, window_bounds = array<i64: 1, 256>}, {transform_indices = @transform_3, window_bounds = array<i64: 4, 256>}]} {
    %c0 = arith.constant 0 : index
    %c0_0 = arith.constant 0 : index
    %0 = vector.load %arg1[%c0, %c0_0] : memref<4x256xf32, #tpu.memory_space<vmem>>, vector<4x256xf32>
    %c0_1 = arith.constant 0 : index
    %c0_2 = arith.constant 0 : index
    %1 = vector.load %arg2[%c0_1, %c0_2] : memref<1x256xf32, #tpu.memory_space<vmem>>, vector<1x256xf32>
    %2 = vector.broadcast %1 : vector<1x256xf32> to vector<4x256xf32>
    %3 = arith.mulf %0, %2 : vector<4x256xf32>
    %c0_3 = arith.constant 0 : index
    %c0_4 = arith.constant 0 : index
    %4 = vector.load %arg3[%c0_3, %c0_4] : memref<1x256xf32, #tpu.memory_space<vmem>>, vector<1x256xf32>
    %5 = vector.broadcast %4 : vector<1x256xf32> to vector<4x256xf32>
    %6 = arith.addf %3, %5 : vector<4x256xf32>
    %cst = arith.constant 0.000000e+00 : f32
    %7 = vector.broadcast %cst : f32 to vector<4x256xf32>
    %8 = arith.maximumf %6, %7 : vector<4x256xf32>
    %c0_5 = arith.constant 0 : index
    %c0_6 = arith.constant 0 : index
    %9 = vector.load %arg4[%c0_5, %c0_6] : memref<4x256xf32, #tpu.memory_space<vmem>>, vector<4x256xf32>
    tpu.vector_store %arg4[%c0_5, %c0_6], %8 {strides = array<i32>} : memref<4x256xf32, #tpu.memory_space<vmem>>, vector<4x256xf32>,
    return
  }
  func.func @transform_0(%arg0: i32) -> (i32, i32) {
    %c0_i32 = arith.constant 0 : i32
    %c0_i32_0 = arith.constant 0 : i32
    return %arg0, %c0_i32 : i32, i32
  }
  func.func @transform_1(%arg0: i32) -> (i32, i32) {
    %c0_i32 = arith.constant 0 : i32
    %c0_i32_0 = arith.constant 0 : i32
    %c0_i32_1 = arith.constant 0 : i32
    return %c0_i32, %c0_i32_0 : i32, i32
  }
  func.func @transform_2(%arg0: i32) -> (i32, i32) {
    %c0_i32 = arith.constant 0 : i32
    %c0_i32_0 = arith.constant 0 : i32
    %c0_i32_1 = arith.constant 0 : i32
    return %c0_i32, %c0_i32_0 : i32, i32
  }
  func.func @transform_3(%arg0: i32) -> (i32, i32) {
    %c0_i32 = arith.constant 0 : i32
    %c0_i32_0 = arith.constant 0 : i32
    return %arg0, %c0_i32 : i32, i32
  }
}

</mosaic_0001>

<bundles_post_ra>
// kernel: cnn25d_forward.10
= control target key start
LH: loop header
LB: loop body
LE: loop exit
PB: predicated region body
PF: predicated region fallthrough
CT: control target
= control target key end

     0   :  { %s1200_s12 = smov 0   ;;  %s1495_s0 = inlined_call_operand.vmem [shape: bf16[1024,36], index: 0, kind: input, shape index: {}]   ;;  %s1496_s1 = inlined_call_operand.vmem [shape: bf16[36,32], index: 1, kind: input, shape index: {}]   ;;  %s1497_s2 = inlined_call_operand.vmem [shape: f32[1,32], index: 2, kind: input, shape index: {}]   ;;  %s1498_s3 = inlined_call_operand.vmem [shape: f32[1024,32], index: 3, kind: output, shape index: {}]  }
   0x1 LB: > { %s937_s13 = sadd.s32 4294967295, %s1178_s12   ;;  %p941_p0 = scmp.ge.s32.totalorder %s1178_s12, 1  ;;  %s1178_s12 = sphi %s1200_s12, %s13_s12  }
   0x2   : > { %p138_p1 = scmp.lt.s32.totalorder %s1178_s12, 3 }
   0x4   : > { %p139_p2 = pnand %p941_p0, %p138_p1 }
   0x5   : > { %v1137_v0 = vld [vmem:[%s1496_s1] sm:$0xff] (!%p139_p2)   ;;  %v1138_v1 = vld [vmem:[%s1496_s1 + $0x8] sm:$0xff] (!%p139_p2)   ;;  %s942_s18 = sshll.u32 (!%p139_p2), %s937_s13, 6  ;;  %v1139_v2 = vld [vmem:[%s1496_s1 + $0x10] ss:$0 sps:$4 sm:$0x33] (!%p139_p2)  }
   0x6   : > { %142 = sbr.rel (%p139_p2) target bundleno = 293 (0x125), region = 32  ;;  %1051 = vmatprep.subr.bf16.mxu0 (!%p139_p2), %v1137_v0  ;;  %1121 = vmatprep.subr.bf16.mxu1 (!%p139_p2), %v1137_v0  ;;  %p163_p3 = scmp.lt.s32.totalorder (!%p139_p2), %s942_s18, 127  ;;  %vm523_vm0 = vcmask (!%p139_p2), 1041408   ;;  %vm426_vm1 = vcmask (!%p139_p2), 293888   ;;  %v1293_v36 = vld [vmem:[%s1497_s2] ss:$0 sm:$0xff] (!%p139_p2) }
   0x7   : > { %1052 = vmatpush3.bf16.msra.mxu0 (!%p139_p2), %v1137_v0  ;;  %1124 = vmatpush3.bf16.msra.mxu1 (!%p139_p2), %v1137_v0  ;;  %v525_v3 = vsel (!%p139_p2), %vm523_vm0, %v1139_v2, 0  ;;  %vm816_vm2 = vcmask (!%p139_p2), 261120  }
   0x8   : > { %1053 = vmatprep.subr.bf16.mxu0 (!%p139_p2), %v1138_v1  ;;  %1122 = vmatprep.subr.bf16.mxu1 (!%p139_p2), %v1138_v1 }
   0xb   : > { %1054 = vmatpush3.bf16.msra.mxu0 (!%p139_p2), %v1138_v1  ;;  %1125 = vmatpush3.bf16.msra.mxu1 (!%p139_p2), %v1138_v1 }
   0xc   : > { %1127 = vmatprep.subr.msk.bf16.mxu0 (!%p139_p2), %vm523_vm0, %v1139_v2  ;;  %1128 = vmatprep.subr.msk.bf16.mxu1 (!%p139_p2), %vm523_vm0, %v1139_v2 }
   0xd   : > { %s1500_s18 = smov (!%p163_p3, %s942_s18), 127 }
   0xe   : > { %s943_s21 = sshll.u32 %s1500_s18, 2  ;;  %s945_s25 = sshll.u32 %s1500_s18, 3 }
   0xf   : > { %s1223_s24 = scalar_lea.vmem %s1495_s0, %s943_s21  ;;  %1056 = vmatpush3.bf16.msra.mxu0 %v525_v3  ;;  %1126 = vmatpush3.bf16.msra.mxu1 %v525_v3  ;;  %s1298_s30 = scalar_lea.vmem %s1498_s3, %s945_s25 }
  0x10   : > { %v1140_v4 = vld [vmem:[%s1223_s24] sm:$0xff]   ;;  %v1142_v6 = vld [vmem:[%s1223_s24 + $0x8] sm:$0xff]   ;;  %v1144_v8 = vld [vmem:[%s1223_s24 + $0x10] sm:$0xff]  }
  0x11   : > { %v1141_v5 = vld [vmem:[%s1223_s24 + $0x80] sm:$0xff]   ;;  %1057 = vmatprep.mubr.msk.bf16.mxu0 %vm426_vm1, %v1140_v4  ;;  %v1143_v7 = vld [vmem:[%s1223_s24 + $0x88] sm:$0xff]   ;;  %v1145_v9 = vld [vmem:[%s1223_s24 + $0x90] sm:$0xff]  }
  0x12   : > { %1089 = vmatprep.mubr.msk.bf16.mxu1 %vm426_vm1, %v1141_v5  ;;  %1058 = vmatmul.mubr.msk.bf16.vlgmr.msra.gmra.mrb[0].mxu0 %vm426_vm1, %v1142_v6  ;;  %v1146_v10 = vld [vmem:[%s1223_s24 + $0x18] sm:$0xff]   ;;  %v1148_v12 = vld [vmem:[%s1223_s24 + $0x20] sm:$0xff]   ;;  %v1150_v14 = vld [vmem:[%s1223_s24 + $0x28] sm:$0xff]  }
  0x13   : > { %1090 = vmatmul.mubr.msk.bf16.vlgmr.msra.gmra.mrb[0].mxu1 %vm426_vm1, %v1143_v7  ;;  %1061 = vmatprep.mubr.msk.bf16.mxu0 %vm426_vm1, %v1144_v8  ;;  %v1147_v11 = vld [vmem:[%s1223_s24 + $0x98] sm:$0xff]   ;;  %v1149_v13 = vld [vmem:[%s1223_s24 + $0xa0] sm:$0xff]   ;;  %v1151_v15 = vld [vmem:[%s1223_s24 + $0xa8] sm:$0xff]  }
  0x14   : > { %1093 = vmatprep.mubr.msk.bf16.mxu1 %vm426_vm1, %v1145_v9  ;;  %v1152_v16 = vld [vmem:[%s1223_s24 + $0x30] sm:$0xff]   ;;  %v1154_v18 = vld [vmem:[%s1223_s24 + $0x38] sm:$0xff]   ;;  %v1156_v20 = vld [vmem:[%s1223_s24 + $0x40] sm:$0xff]  }
  0x15   : > { %v1153_v17 = vld [vmem:[%s1223_s24 + $0xb0] sm:$0xff]   ;;  %v1155_v19 = vld [vmem:[%s1223_s24 + $0xb8] sm:$0xff]   ;;  %v1157_v21 = vld [vmem:[%s1223_s24 + $0xc0] sm:$0xff]  }
  0x16   : > { %v1158_v22 = vld [vmem:[%s1223_s24 + $0x48] sm:$0xff]   ;;  %v1160_v24 = vld [vmem:[%s1223_s24 + $0x50] sm:$0xff]   ;;  %v1162_v26 = vld [vmem:[%s1223_s24 + $0x58] sm:$0xff]  }
  0x17   : > { %v1159_v23 = vld [vmem:[%s1223_s24 + $0xc8] sm:$0xff]   ;;  %v1161_v25 = vld [vmem:[%s1223_s24 + $0xd0] sm:$0xff]   ;;  %v1163_v27 = vld [vmem:[%s1223_s24 + $0xd8] sm:$0xff]  }
  0x18   : > { %v1164_v28 = vld [vmem:[%s1223_s24 + $0x60] sm:$0xff]   ;;  %v1166_v30 = vld [vmem:[%s1223_s24 + $0x68] sm:$0xff]   ;;  %v1168_v32 = vld [vmem:[%s1223_s24 + $0x70] sm:$0xff]  }
  0x19   : > { %v1165_v29 = vld [vmem:[%s1223_s24 + $0xe0] sm:$0xff]   ;;  %v1167_v31 = vld [vmem:[%s1223_s24 + $0xe8] sm:$0xff]   ;;  %v1169_v33 = vld [vmem:[%s1223_s24 + $0xf0] sm:$0xff]  }
  0x1a   : > { %1062 = vmatmul.mubr.msk.bf16.gmra.mrb[4].mxu0 %vm426_vm1, %v1146_v10  ;;  %v1170_v34 = vld [vmem:[%s1223_s24 + $0x78] sm:$0xff]  }
  0x1b   : > { %1094 = vmatmul.mubr.msk.bf16.gmra.mrb[4].mxu1 %vm426_vm1, %v1147_v11  ;;  %1065 = vmatprep.mubr.msk.bf16.mxu0 %vm426_vm1, %v1148_v12  ;;  %v1171_v35 = vld [vmem:[%s1223_s24 + $0xf8] sm:$0xff]  }
  0x1c   : > { %1097 = vmatprep.mubr.msk.bf16.mxu1 %vm426_vm1, %v1149_v13 }
  0x22   : > { %1066 = vmatmul.mubr.msk.bf16.gmra.mrb[8].mxu0 %vm426_vm1, %v1150_v14 }
  0x23   : > { %1098 = vmatmul.mubr.msk.bf16.gmra.mrb[8].mxu1 %vm426_vm1, %v1151_v15  ;;  %1069 = vmatprep.mubr.msk.bf16.mxu0 %vm426_vm1, %v1152_v16 }
  0x24   : > { %1101 = vmatprep.mubr.msk.bf16.mxu1 %vm426_vm1, %v1153_v17 }
  0x2a   : > { %1070 = vmatmul.mubr.msk.bf16.gmra.mrb[12].mxu0 %vm426_vm1, %v1154_v18 }
  0x2b   : > { %1102 = vmatmul.mubr.msk.bf16.gmra.mrb[12].mxu1 %vm426_vm1, %v1155_v19  ;;  %1073 = vmatprep.mubr.msk.bf16.mxu0 %vm426_vm1, %v1156_v20 }
  0x2c   : > { %1105 = vmatprep.mubr.msk.bf16.mxu1 %vm426_vm1, %v1157_v21 }
  0x32   : > { %1074 = vmatmul.mubr.msk.bf16.gmra.mrb[16].mxu0 %vm426_vm1, %v1158_v22 }
  0x33   : > { %1106 = vmatmul.mubr.msk.bf16.gmra.mrb[16].mxu1 %vm426_vm1, %v1159_v23  ;;  %1077 = vmatprep.mubr.msk.bf16.mxu0 %vm426_vm1, %v1160_v24 }
  0x34   : > { %1109 = vmatprep.mubr.msk.bf16.mxu1 %vm426_vm1, %v1161_v25 }
  0x3a   : > { %1078 = vmatmul.mubr.msk.bf16.gmra.mrb[20].mxu0 %vm426_vm1, %v1162_v26 }
  0x3b   : > { %1110 = vmatmul.mubr.msk.bf16.gmra.mrb[20].mxu1 %vm426_vm1, %v1163_v27  ;;  %1081 = vmatprep.mubr.msk.bf16.mxu0 %vm426_vm1, %v1164_v28 }
  0x3c   : > { %1113 = vmatprep.mubr.msk.bf16.mxu1 %vm426_vm1, %v1165_v29 }
  0x42   : > { %1082 = vmatmul.mubr.msk.bf16.gmra.mrb[24].mxu0 %vm426_vm1, %v1166_v30 }
  0x43   : > { %1114 = vmatmul.mubr.msk.bf16.gmra.mrb[24].mxu1 %vm426_vm1, %v1167_v31  ;;  %1085 = vmatprep.mubr.msk.bf16.mxu0 %vm426_vm1, %v1168_v32 }
  0x44   : > { %1117 = vmatprep.mubr.msk.bf16.mxu1 %vm426_vm1, %v1169_v33 }
  0x4a   : > { %1086 = vmatmul.mubr.msk.bf16.gmra.mrb[28].mxu0 %vm426_vm1, %v1170_v34 }
  0x4b   : > { %1118 = vmatmul.mubr.msk.bf16.gmra.mrb[28].mxu1 %vm426_vm1, %v1171_v35 }
  0xe5   : > { %v1059_v37 = vpop.f32.mrb[0].mxu0 }
  0xe6   : > { %v1091_v38 = vpop.f32.mrb[0].mxu1  ;;  %v570_v39 = vadd.f32 %v1059_v37, %v1293_v36  ;;  %v561_v41 = vpop.f32.mrb[1].mxu0 }
  0xe7   : > { %v698_v40 = vadd.f32 %v1091_v38, %v1293_v36  ;;  %v689_v42 = vpop.f32.mrb[1].mxu1  ;;  %v562_v43 = vadd.f32 %v1293_v36, %v561_v41  ;;  %v1060_v45 = vpop.f32.mrb[2].mxu0 }
  0xe8   : > { %v690_v44 = vadd.f32 %v1293_v36, %v689_v42  ;;  %v1092_v46 = vpop.f32.mrb[2].mxu1  ;;  %819 = vst.msk [vmem:[%s1298_s30 + $0x10] sm:$0xff] %vm816_vm2, %v570_v39  ;;  %v573_v47 = vadd.f32 %v1060_v45, %v1293_v36  ;;  %v564_v49 = vpop.f32.mrb[3].mxu0 }
  0xe9   : > { %851 = vst.msk [vmem:[%s1298_s30 + $0x110] sm:$0xff] %vm816_vm2, %v698_v40  ;;  %v701_v48 = vadd.f32 %v1092_v46, %v1293_v36  ;;  %v692_v50 = vpop.f32.mrb[3].mxu1  ;;  %817 = vst.msk [vmem:[%s1298_s30] sm:$0xff] %vm816_vm2, %v562_v43  ;;  %v565_v51 = vadd.f32 %v1293_v36, %v564_v49 }
  0xea   : > { %849 = vst.msk [vmem:[%s1298_s30 + $0x100] sm:$0xff] %vm816_vm2, %v690_v44  ;;  %v693_v52 = vadd.f32 %v1293_v36, %v692_v50  ;;  %820 = vst.msk [vmem:[%s1298_s30 + $0x18] sm:$0xff] %vm816_vm2, %v573_v47 }
  0xeb   : > { %852 = vst.msk [vmem:[%s1298_s30 + $0x118] sm:$0xff] %vm816_vm2, %v701_v48  ;;  %818 = vst.msk [vmem:[%s1298_s30 + $0x8] sm:$0xff] %vm816_vm2, %v565_v51 }
  0xec   : > { %850 = vst.msk [vmem:[%s1298_s30 + $0x108] sm:$0xff] %vm816_vm2, %v693_v52 }
  0xed   : > { %v1063_v53 = vpop.f32.mrb[4].mxu0 }
  0xee   : > { %v1095_v54 = vpop.f32.mrb[4].mxu1  ;;  %v586_v55 = vadd.f32 %v1063_v53, %v1293_v36  ;;  %v577_v57 = vpop.f32.mrb[5].mxu0 }
  0xef   : > { %v714_v56 = vadd.f32 %v1095_v54, %v1293_v36  ;;  %v705_v58 = vpop.f32.mrb[5].mxu1  ;;  %v578_v59 = vadd.f32 %v1293_v36, %v577_v57  ;;  %v1064_v61 = vpop.f32.mrb[6].mxu0 }
  0xf0   : > { %v706_v60 = vadd.f32 %v1293_v36, %v705_v58  ;;  %v1096_v62 = vpop.f32.mrb[6].mxu1  ;;  %823 = vst.msk [vmem:[%s1298_s30 + $0x30] sm:$0xff] %vm816_vm2, %v586_v55  ;;  %v589_v63 = vadd.f32 %v1064_v61, %v1293_v36  ;;  %v580_v1 = vpop.f32.mrb[7].mxu0 }
  0xf1   : > { %855 = vst.msk [vmem:[%s1298_s30 + $0x130] sm:$0xff] %vm816_vm2, %v714_v56  ;;  %v717_v0 = vadd.f32 %v1096_v62, %v1293_v36  ;;  %v708_v2 = vpop.f32.mrb[7].mxu1  ;;  %821 = vst.msk [vmem:[%s1298_s30 + $0x20] sm:$0xff] %vm816_vm2, %v578_v59  ;;  %v581_v3 = vadd.f32 %v1293_v36, %v580_v1 }
  0xf2   : > { %853 = vst.msk [vmem:[%s1298_s30 + $0x120] sm:$0xff] %vm816_vm2, %v706_v60  ;;  %v709_v4 = vadd.f32 %v1293_v36, %v708_v2  ;;  %824 = vst.msk [vmem:[%s1298_s30 + $0x38] sm:$0xff] %vm816_vm2, %v589_v63 }
  0xf3   : > { %856 = vst.msk [vmem:[%s1298_s30 + $0x138] sm:$0xff] %vm816_vm2, %v717_v0  ;;  %822 = vst.msk [vmem:[%s1298_s30 + $0x28] sm:$0xff] %vm816_vm2, %v581_v3 }
  0xf4   : > { %854 = vst.msk [vmem:[%s1298_s30 + $0x128] sm:$0xff] %vm816_vm2, %v709_v4 }
  0xf5   : > { %v1067_v5 = vpop.f32.mrb[8].mxu0 }
  0xf6   : > { %v1099_v6 = vpop.f32.mrb[8].mxu1  ;;  %v602_v7 = vadd.f32 %v1067_v5, %v1293_v36  ;;  %v593_v9 = vpop.f32.mrb[9].mxu0 }
  0xf7   : > { %v730_v8 = vadd.f32 %v1099_v6, %v1293_v36  ;;  %v721_v10 = vpop.f32.mrb[9].mxu1  ;;  %v594_v11 = vadd.f32 %v1293_v36, %v593_v9  ;;  %v1068_v13 = vpop.f32.mrb[10].mxu0 }
  0xf8   : > { %v722_v12 = vadd.f32 %v1293_v36, %v721_v10  ;;  %v1100_v14 = vpop.f32.mrb[10].mxu1  ;;  %827 = vst.msk [vmem:[%s1298_s30 + $0x50] sm:$0xff] %vm816_vm2, %v602_v7  ;;  %v605_v15 = vadd.f32 %v1068_v13, %v1293_v36  ;;  %v596_v17 = vpop.f32.mrb[11].mxu0 }
  0xf9   : > { %859 = vst.msk [vmem:[%s1298_s30 + $0x150] sm:$0xff] %vm816_vm2, %v730_v8  ;;  %v733_v16 = vadd.f32 %v1100_v14, %v1293_v36  ;;  %v724_v18 = vpop.f32.mrb[11].mxu1  ;;  %825 = vst.msk [vmem:[%s1298_s30 + $0x40] sm:$0xff] %vm816_vm2, %v594_v11  ;;  %v597_v19 = vadd.f32 %v1293_v36, %v596_v17 }
  0xfa   : > { %857 = vst.msk [vmem:[%s1298_s30 + $0x140] sm:$0xff] %vm816_vm2, %v722_v12  ;;  %v725_v20 = vadd.f32 %v1293_v36, %v724_v18  ;;  %828 = vst.msk [vmem:[%s1298_s30 + $0x58] sm:$0xff] %vm816_vm2, %v605_v15 }
  0xfb   : > { %860 = vst.msk [vmem:[%s1298_s30 + $0x158] sm:$0xff] %vm816_vm2, %v733_v16  ;;  %826 = vst.msk [vmem:[%s1298_s30 + $0x48] sm:$0xff] %vm816_vm2, %v597_v19 }
  0xfc   : > { %858 = vst.msk [vmem:[%s1298_s30 + $0x148] sm:$0xff] %vm816_vm2, %v725_v20 }
  0xfd   : > { %v1071_v21 = vpop.f32.mrb[12].mxu0 }
  0xfe   : > { %v1103_v22 = vpop.f32.mrb[12].mxu1  ;;  %v618_v23 = vadd.f32 %v1071_v21, %v1293_v36  ;;  %v609_v25 = vpop.f32.mrb[13].mxu0 }
  0xff   : > { %v746_v24 = vadd.f32 %v1103_v22, %v1293_v36  ;;  %v737_v26 = vpop.f32.mrb[13].mxu1  ;;  %v610_v27 = vadd.f32 %v1293_v36, %v609_v25  ;;  %v1072_v29 = vpop.f32.mrb[14].mxu0 }
 0x100   : > { %v738_v28 = vadd.f32 %v1293_v36, %v737_v26  ;;  %v1104_v30 = vpop.f32.mrb[14].mxu1  ;;  %831 = vst.msk [vmem:[%s1298_s30 + $0x70] sm:$0xff] %vm816_vm2, %v618_v23  ;;  %v621_v31 = vadd.f32 %v1072_v29, %v1293_v36  ;;  %v612_v33 = vpop.f32.mrb[15].mxu0 }
 0x101   : > { %863 = vst.msk [vmem:[%s1298_s30 + $0x170] sm:$0xff] %vm816_vm2, %v746_v24  ;;  %v749_v32 = vadd.f32 %v1104_v30, %v1293_v36  ;;  %v740_v34 = vpop.f32.mrb[15].mxu1  ;;  %829 = vst.msk [vmem:[%s1298_s30 + $0x60] sm:$0xff] %vm816_vm2, %v610_v27  ;;  %v613_v35 = vadd.f32 %v1293_v36, %v612_v33 }
 0x102   : > { %861 = vst.msk [vmem:[%s1298_s30 + $0x160] sm:$0xff] %vm816_vm2, %v738_v28  ;;  %v741_v37 = vadd.f32 %v1293_v36, %v740_v34  ;;  %832 = vst.msk [vmem:[%s1298_s30 + $0x78] sm:$0xff] %vm816_vm2, %v621_v31 }
 0x103   : > { %864 = vst.msk [vmem:[%s1298_s30 + $0x178] sm:$0xff] %vm816_vm2, %v749_v32  ;;  %830 = vst.msk [vmem:[%s1298_s30 + $0x68] sm:$0xff] %vm816_vm2, %v613_v35 }
 0x104   : > { %862 = vst.msk [vmem:[%s1298_s30 + $0x168] sm:$0xff] %vm816_vm2, %v741_v37 }
 0x105   : > { %v1075_v38 = vpop.f32.mrb[16].mxu0 }
 0x106   : > { %v1107_v39 = vpop.f32.mrb[16].mxu1  ;;  %v634_v40 = vadd.f32 %v1075_v38, %v1293_v36  ;;  %v625_v42 = vpop.f32.mrb[17].mxu0 }
 0x107   : > { %v762_v41 = vadd.f32 %v1107_v39, %v1293_v36  ;;  %v753_v43 = vpop.f32.mrb[17].mxu1  ;;  %v626_v44 = vadd.f32 %v1293_v36, %v625_v42  ;;  %v1076_v46 = vpop.f32.mrb[18].mxu0 }
 0x108   : > { %v754_v45 = vadd.f32 %v1293_v36, %v753_v43  ;;  %v1108_v47 = vpop.f32.mrb[18].mxu1  ;;  %835 = vst.msk [vmem:[%s1298_s30 + $0x90] sm:$0xff] %vm816_vm2, %v634_v40  ;;  %v637_v48 = vadd.f32 %v1076_v46, %v1293_v36  ;;  %v628_v50 = vpop.f32.mrb[19].mxu0 }
 0x109   : > { %867 = vst.msk [vmem:[%s1298_s30 + $0x190] sm:$0xff] %vm816_vm2, %v762_v41  ;;  %v765_v49 = vadd.f32 %v1108_v47, %v1293_v36  ;;  %v756_v51 = vpop.f32.mrb[19].mxu1  ;;  %833 = vst.msk [vmem:[%s1298_s30 + $0x80] sm:$0xff] %vm816_vm2, %v626_v44  ;;  %v629_v52 = vadd.f32 %v1293_v36, %v628_v50 }
 0x10a   : > { %865 = vst.msk [vmem:[%s1298_s30 + $0x180] sm:$0xff] %vm816_vm2, %v754_v45  ;;  %v757_v53 = vadd.f32 %v1293_v36, %v756_v51  ;;  %836 = vst.msk [vmem:[%s1298_s30 + $0x98] sm:$0xff] %vm816_vm2, %v637_v48 }
 0x10b   : > { %868 = vst.msk [vmem:[%s1298_s30 + $0x198] sm:$0xff] %vm816_vm2, %v765_v49  ;;  %834 = vst.msk [vmem:[%s1298_s30 + $0x88] sm:$0xff] %vm816_vm2, %v629_v52 }
 0x10c   : > { %866 = vst.msk [vmem:[%s1298_s30 + $0x188] sm:$0xff] %vm816_vm2, %v757_v53 }
 0x10d   : > { %v1079_v54 = vpop.f32.mrb[20].mxu0 }
 0x10e   : > { %v1111_v55 = vpop.f32.mrb[20].mxu1  ;;  %v650_v56 = vadd.f32 %v1079_v54, %v1293_v36  ;;  %v641_v58 = vpop.f32.mrb[21].mxu0 }
 0x10f   : > { %v778_v57 = vadd.f32 %v1111_v55, %v1293_v36  ;;  %v769_v59 = vpop.f32.mrb[21].mxu1  ;;  %v642_v60 = vadd.f32 %v1293_v36, %v641_v58  ;;  %v1080_v62 = vpop.f32.mrb[22].mxu0 }
 0x110   : > { %v770_v61 = vadd.f32 %v1293_v36, %v769_v59  ;;  %v1112_v63 = vpop.f32.mrb[22].mxu1  ;;  %839 = vst.msk [vmem:[%s1298_s30 + $0xb0] sm:$0xff] %vm816_vm2, %v650_v56  ;;  %v653_v0 = vadd.f32 %v1080_v62, %v1293_v36  ;;  %v644_v2 = vpop.f32.mrb[23].mxu0 }
 0x111   : > { %871 = vst.msk [vmem:[%s1298_s30 + $0x1b0] sm:$0xff] %vm816_vm2, %v778_v57  ;;  %v781_v1 = vadd.f32 %v1112_v63, %v1293_v36  ;;  %v772_v3 = vpop.f32.mrb[23].mxu1  ;;  %837 = vst.msk [vmem:[%s1298_s30 + $0xa0] sm:$0xff] %vm816_vm2, %v642_v60  ;;  %v645_v4 = vadd.f32 %v1293_v36, %v644_v2 }
 0x112   : > { %869 = vst.msk [vmem:[%s1298_s30 + $0x1a0] sm:$0xff] %vm816_vm2, %v770_v61  ;;  %v773_v5 = vadd.f32 %v1293_v36, %v772_v3  ;;  %840 = vst.msk [vmem:[%s1298_s30 + $0xb8] sm:$0xff] %vm816_vm2, %v653_v0 }
 0x113   : > { %872 = vst.msk [vmem:[%s1298_s30 + $0x1b8] sm:$0xff] %vm816_vm2, %v781_v1  ;;  %838 = vst.msk [vmem:[%s1298_s30 + $0xa8] sm:$0xff] %vm816_vm2, %v645_v4 }
 0x114   : > { %870 = vst.msk [vmem:[%s1298_s30 + $0x1a8] sm:$0xff] %vm816_vm2, %v773_v5 }
 0x115   : > { %v1083_v6 = vpop.f32.mrb[24].mxu0 }
 0x116   : > { %v1115_v7 = vpop.f32.mrb[24].mxu1  ;;  %v666_v8 = vadd.f32 %v1083_v6, %v1293_v36  ;;  %v657_v10 = vpop.f32.mrb[25].mxu0 }
 0x117   : > { %v794_v9 = vadd.f32 %v1115_v7, %v1293_v36  ;;  %v785_v11 = vpop.f32.mrb[25].mxu1  ;;  %v658_v12 = vadd.f32 %v1293_v36, %v657_v10  ;;  %v1084_v14 = vpop.f32.mrb[26].mxu0 }
 0x118   : > { %v786_v13 = vadd.f32 %v1293_v36, %v785_v11  ;;  %v1116_v15 = vpop.f32.mrb[26].mxu1  ;;  %843 = vst.msk [vmem:[%s1298_s30 + $0xd0] sm:$0xff] %vm816_vm2, %v666_v8  ;;  %v669_v16 = vadd.f32 %v1084_v14, %v1293_v36  ;;  %v660_v18 = vpop.f32.mrb[27].mxu0 }
 0x119   : > { %875 = vst.msk [vmem:[%s1298_s30 + $0x1d0] sm:$0xff] %vm816_vm2, %v794_v9  ;;  %v797_v17 = vadd.f32 %v1116_v15, %v1293_v36  ;;  %v788_v19 = vpop.f32.mrb[27].mxu1  ;;  %841 = vst.msk [vmem:[%s1298_s30 + $0xc0] sm:$0xff] %vm816_vm2, %v658_v12  ;;  %v661_v20 = vadd.f32 %v1293_v36, %v660_v18 }
 0x11a   : > { %873 = vst.msk [vmem:[%s1298_s30 + $0x1c0] sm:$0xff] %vm816_vm2, %v786_v13  ;;  %v789_v21 = vadd.f32 %v1293_v36, %v788_v19  ;;  %844 = vst.msk [vmem:[%s1298_s30 + $0xd8] sm:$0xff] %vm816_vm2, %v669_v16 }
 0x11b   : > { %876 = vst.msk [vmem:[%s1298_s30 + $0x1d8] sm:$0xff] %vm816_vm2, %v797_v17  ;;  %842 = vst.msk [vmem:[%s1298_s30 + $0xc8] sm:$0xff] %vm816_vm2, %v661_v20 }
 0x11c   : > { %874 = vst.msk [vmem:[%s1298_s30 + $0x1c8] sm:$0xff] %vm816_vm2, %v789_v21 }
 0x11d   : > { %v1087_v22 = vpop.f32.mrb[28].mxu0 }
 0x11e   : > { %v1119_v23 = vpop.f32.mrb[28].mxu1  ;;  %v682_v24 = vadd.f32 %v1087_v22, %v1293_v36  ;;  %v673_v26 = vpop.f32.mrb[29].mxu0 }
 0x11f   : > { %v810_v25 = vadd.f32 %v1119_v23, %v1293_v36  ;;  %v801_v27 = vpop.f32.mrb[29].mxu1  ;;  %v674_v28 = vadd.f32 %v1293_v36, %v673_v26  ;;  %v1088_v30 = vpop.f32.mrb[30].mxu0 }
 0x120   : > { %v802_v29 = vadd.f32 %v1293_v36, %v801_v27  ;;  %v1120_v31 = vpop.f32.mrb[30].mxu1  ;;  %847 = vst.msk [vmem:[%s1298_s30 + $0xf0] sm:$0xff] %vm816_vm2, %v682_v24  ;;  %v685_v32 = vadd.f32 %v1088_v30, %v1293_v36  ;;  %v676_v34 = vpop.f32.mrb[31].mxu0 }
 0x121   : > { %879 = vst.msk [vmem:[%s1298_s30 + $0x1f0] sm:$0xff] %vm816_vm2, %v810_v25  ;;  %v813_v33 = vadd.f32 %v1120_v31, %v1293_v36  ;;  %v804_v35 = vpop.f32.mrb[31].mxu1  ;;  %845 = vst.msk [vmem:[%s1298_s30 + $0xe0] sm:$0xff] %vm816_vm2, %v674_v28  ;;  %v677_v37 = vadd.f32 %v1293_v36, %v676_v34 }
 0x122   : > { %877 = vst.msk [vmem:[%s1298_s30 + $0x1e0] sm:$0xff] %vm816_vm2, %v802_v29  ;;  %v805_v38 = vadd.f32 %v1293_v36, %v804_v35  ;;  %848 = vst.msk [vmem:[%s1298_s30 + $0xf8] sm:$0xff] %vm816_vm2, %v685_v32 }
 0x123   : > { %880 = vst.msk [vmem:[%s1298_s30 + $0x1f8] sm:$0xff] %vm816_vm2, %v813_v33  ;;  %846 = vst.msk [vmem:[%s1298_s30 + $0xe8] sm:$0xff] %vm816_vm2, %v677_v37 }
 0x124   : > { %878 = vst.msk [vmem:[%s1298_s30 + $0x1e8] sm:$0xff] %vm816_vm2, %v805_v38 }
 0x125 PF: > { %s13_s12 = sadd.s32 1, %s1178_s12  }
 0x126   : > { %p10_p4 = scmp.ge.s32.totalorder %s13_s12, 4  }
 0x128   :  { %12 = sbr.rel (!%p10_p4) target bundleno = 1 (0x1), region = 62 }

// kernel: cnn25d_forward.11
= control target key start
LH: loop header
LB: loop body
LE: loop exit
PB: predicated region body
PF: predicated region fallthrough
CT: control target
= control target key end

     0   :  { %s1611_s18 = smov 0   ;;  %s2170_s0 = inlined_call_operand.vmem [shape: bf16[1024,96], index: 0, kind: input, shape index: {}]   ;;  %s2171_s1 = inlined_call_operand.vmem [shape: bf16[96,32], index: 1, kind: input, shape index: {}]   ;;  %s2172_s2 = inlined_call_operand.vmem [shape: f32[1,32], index: 2, kind: input, shape index: {}]   ;;  %s2173_s3 = inlined_call_operand.vmem [shape: f32[512,32], index: 3, kind: output, shape index: {0}]   ;;  %s2174_s4 = inlined_call_operand.vmem [shape: f32[2,1,32], index: 4, kind: output, shape index: {1}]   ;;  %s2175_s5 = inlined_call_operand.vmem [shape: f32[2,1,32], index: 5, kind: output, shape index: {2}]  }
   0x1 LB: > { %s1617_s19 = sadd.s32 4294967295, %s1579_s18   ;;  %p1323_p0 = scmp.ge.s32.totalorder %s1579_s18, 1  ;;  %s1579_s18 = sphi %s1611_s18, %s16_s18  }
   0x2   : > { %p193_p1 = scmp.lt.s32.totalorder %s1579_s18, 3 }
   0x4   : > { %p194_p2 = pnand %p1323_p0, %p193_p1 }
   0x5   : > { %v1535_v0 = vld [vmem:[%s2171_s1] sm:$0xff] (!%p194_p2)   ;;  %s1324_s22 = sshll.u32 (!%p194_p2), %s1617_s19, 6  ;;  %v1536_v1 = vld [vmem:[%s2171_s1 + $0x8] sm:$0xff] (!%p194_p2)   ;;  %v1537_v2 = vld [vmem:[%s2171_s1 + $0x10] sm:$0xff] (!%p194_p2)   ;;  %vm525_vm0 = vcmask (!%p194_p2), 785408   ;;  %s1326_s12 = sshll.u32 (!%p194_p2), %s1617_s19, 5 }
   0x6   : > { %197 = sbr.rel (%p194_p2) target bundleno = 361 (0x169), region = 32  ;;  %p228_p3 = scmp.lt.s32.totalorder (!%p194_p2), %s1324_s22, 127  ;;  %1439 = vmatprep.subr.bf16.mxu0 (!%p194_p2), %v1535_v0  ;;  %1515 = vmatprep.subr.bf16.mxu1 (!%p194_p2), %v1535_v0  ;;  %v1538_v4 = vld [vmem:[%s2171_s1 + $0x18] sm:$0xff] (!%p194_p2)   ;;  %v1539_v6 = vld [vmem:[%s2171_s1 + $0x20] sm:$0xff] (!%p194_p2)   ;;  %v1540_v7 = vld [vmem:[%s2171_s1 + $0x28] sm:$0xff] (!%p194_p2)   ;;  %vm911_vm1 = vcmask (!%p194_p2), 261120  }
   0x7   : > { %1440 = vmatpush3.bf16.msra.mxu0 (!%p194_p2), %v1535_v0  ;;  %1521 = vmatpush3.bf16.msra.mxu1 (!%p194_p2), %v1535_v0  ;;  %v1713_v46 = vld [vmem:[%s2172_s2] ss:$0 sm:$0xff] (!%p194_p2)  ;;  %p234_p4 = scmp.lt.s32.totalorder (!%p194_p2), %s1326_s12, 63  ;;  %p239_p5 = scmp.lt.s32.totalorder (!%p194_p2), %s1617_s19, 1  ;;  %vm1109_vm2 = vcmask (!%p194_p2), 253952  }
   0x8   : > { %1441 = vmatprep.subr.bf16.mxu0 (!%p194_p2), %v1536_v1  ;;  %1516 = vmatprep.subr.bf16.mxu1 (!%p194_p2), %v1536_v1 }
   0xb   : > { %1442 = vmatpush3.bf16.msra.mxu0 (!%p194_p2), %v1536_v1  ;;  %1522 = vmatpush3.bf16.msra.mxu1 (!%p194_p2), %v1536_v1 }
   0xc   : > { %1443 = vmatprep.subr.bf16.mxu0 (!%p194_p2), %v1537_v2  ;;  %1517 = vmatprep.subr.bf16.mxu1 (!%p194_p2), %v1537_v2 }
   0xd   : > { %s2177_s22 = smov (!%p228_p3, %s1324_s22), 127  ;;  %s2179_s12 = smov (!%p234_p4, %s1326_s12), 63 }
   0xe   : > { %s1325_s27 = sshll.u32 %s2177_s22, 2  ;;  %s1327_s15 = sshll.u32 %s2179_s12, 3 }
   0xf   : > { %s1634_s30 = scalar_lea.vmem %s2170_s0, %s1325_s27  ;;  %1444 = vmatpush3.bf16.msra.mxu0 %v1537_v2  ;;  %1523 = vmatpush3.bf16.msra.mxu1 %v1537_v2  ;;  %s1753_s20 = scalar_lea.vmem %s2173_s3, %s1327_s15 }
  0x10   : > { %v1541_v3 = vld [vmem:[%s1634_s30] sm:$0xff]   ;;  %1445 = vmatprep.subr.bf16.mxu0 %v1538_v4  ;;  %1518 = vmatprep.subr.bf16.mxu1 %v1538_v4  ;;  %v1542_v8 = vld [vmem:[%s1634_s30 + $0x8] sm:$0xff]   ;;  %v1543_v9 = vld [vmem:[%s1634_s30 + $0x10] sm:$0xff]   ;;  %s2181_s19 = smov (!%p239_p5, %s1617_s19), 1 }
  0x11   : > { %1451 = vmatprep.mubr.msk.bf16.mxu0 %vm525_vm0, %v1541_v3  ;;  %v1545_v5 = vld [vmem:[%s1634_s30 + $0x80] sm:$0xff]   ;;  %v1546_v10 = vld [vmem:[%s1634_s30 + $0x88] sm:$0xff]   ;;  %v1549_v11 = vld [vmem:[%s1634_s30 + $0x90] sm:$0xff]   ;;  %s241_s23 = scalar_lea.vmem %s2174_s4, %s2181_s19  ;;  %s244_s26 = scalar_lea.vmem %s2175_s5, %s2181_s19 }
  0x12   : > { %1483 = vmatprep.mubr.msk.bf16.mxu1 %vm525_vm0, %v1545_v5  ;;  %v1544_v12 = vld [vmem:[%s1634_s30 + $0x18] sm:$0xff]   ;;  %v1547_v13 = vld [vmem:[%s1634_s30 + $0x20] sm:$0xff]   ;;  %v1548_v16 = vld [vmem:[%s1634_s30 + $0x28] sm:$0xff]  }
  0x13   : > { %1446 = vmatpush3.bf16.msra.mxu0 %v1538_v4  ;;  %1524 = vmatpush3.bf16.msra.mxu1 %v1538_v4  ;;  %v1550_v14 = vld [vmem:[%s1634_s30 + $0x98] sm:$0xff]   ;;  %v1553_v15 = vld [vmem:[%s1634_s30 + $0xa0] sm:$0xff]   ;;  %v1554_v17 = vld [vmem:[%s1634_s30 + $0xa8] sm:$0xff]  }
  0x14   : > { %1447 = vmatprep.subr.bf16.mxu0 %v1539_v6  ;;  %1519 = vmatprep.subr.bf16.mxu1 %v1539_v6  ;;  %v1551_v18 = vld [vmem:[%s1634_s30 + $0x30] sm:$0xff]   ;;  %v1552_v20 = vld [vmem:[%s1634_s30 + $0x38] sm:$0xff]   ;;  %v1555_v22 = vld [vmem:[%s1634_s30 + $0x40] sm:$0xff]  }
  0x15   : > { %v1557_v19 = vld [vmem:[%s1634_s30 + $0xb0] sm:$0xff]   ;;  %v1558_v21 = vld [vmem:[%s1634_s30 + $0xb8] sm:$0xff]   ;;  %v1561_v23 = vld [vmem:[%s1634_s30 + $0xc0] sm:$0xff]  }
  0x16   : > { %v1556_v24 = vld [vmem:[%s1634_s30 + $0x48] sm:$0xff]   ;;  %v1559_v26 = vld [vmem:[%s1634_s30 + $0x50] sm:$0xff]   ;;  %v1560_v28 = vld [vmem:[%s1634_s30 + $0x58] sm:$0xff]  }
  0x17   : > { %1448 = vmatpush3.bf16.msra.mxu0 %v1539_v6  ;;  %1525 = vmatpush3.bf16.msra.mxu1 %v1539_v6  ;;  %v1562_v25 = vld [vmem:[%s1634_s30 + $0xc8] sm:$0xff]   ;;  %v1565_v27 = vld [vmem:[%s1634_s30 + $0xd0] sm:$0xff]   ;;  %v1566_v29 = vld [vmem:[%s1634_s30 + $0xd8] sm:$0xff]  }
  0x18   : > { %1449 = vmatprep.subr.bf16.mxu0 %v1540_v7  ;;  %1520 = vmatprep.subr.bf16.mxu1 %v1540_v7  ;;  %v1563_v30 = vld [vmem:[%s1634_s30 + $0x60] sm:$0xff]   ;;  %v1564_v32 = vld [vmem:[%s1634_s30 + $0x68] sm:$0xff]   ;;  %v1567_v34 = vld [vmem:[%s1634_s30 + $0x70] sm:$0xff]  }
  0x19   : > { %v1569_v31 = vld [vmem:[%s1634_s30 + $0xe0] sm:$0xff]   ;;  %v1570_v33 = vld [vmem:[%s1634_s30 + $0xe8] sm:$0xff]   ;;  %v1571_v35 = vld [vmem:[%s1634_s30 + $0xf0] sm:$0xff]  }
  0x1a   : > { %v1568_v36 = vld [vmem:[%s1634_s30 + $0x78] sm:$0xff]  }
  0x1b   : > { %1450 = vmatpush3.bf16.msra.mxu0 %v1540_v7  ;;  %1526 = vmatpush3.bf16.msra.mxu1 %v1540_v7  ;;  %v1572_v37 = vld [vmem:[%s1634_s30 + $0xf8] sm:$0xff]  }
  0x1e   : > { %1452 = vmatmul.mubr.msk.bf16.vlgmr.msra.gmra.mrb[0].mxu0 %vm525_vm0, %v1542_v8  ;;  %1484 = vmatmul.mubr.msk.bf16.vlgmr.msra.gmra.mrb[0].mxu1 %vm525_vm0, %v1546_v10 }
  0x1f   : > { %1455 = vmatprep.mubr.msk.bf16.mxu0 %vm525_vm0, %v1543_v9  ;;  %1487 = vmatprep.mubr.msk.bf16.mxu1 %vm525_vm0, %v1549_v11 }
  0x26   : > { %1456 = vmatmul.mubr.msk.bf16.gmra.mrb[4].mxu0 %vm525_vm0, %v1544_v12  ;;  %1488 = vmatmul.mubr.msk.bf16.gmra.mrb[4].mxu1 %vm525_vm0, %v1550_v14 }
  0x27   : > { %1459 = vmatprep.mubr.msk.bf16.mxu0 %vm525_vm0, %v1547_v13  ;;  %1491 = vmatprep.mubr.msk.bf16.mxu1 %vm525_vm0, %v1553_v15 }
  0x2e   : > { %1460 = vmatmul.mubr.msk.bf16.gmra.mrb[8].mxu0 %vm525_vm0, %v1548_v16  ;;  %1492 = vmatmul.mubr.msk.bf16.gmra.mrb[8].mxu1 %vm525_vm0, %v1554_v17 }
  0x2f   : > { %1463 = vmatprep.mubr.msk.bf16.mxu0 %vm525_vm0, %v1551_v18  ;;  %1495 = vmatprep.mubr.msk.bf16.mxu1 %vm525_vm0, %v1557_v19 }
  0x36   : > { %1464 = vmatmul.mubr.msk.bf16.gmra.mrb[12].mxu0 %vm525_vm0, %v1552_v20  ;;  %1496 = vmatmul.mubr.msk.bf16.gmra.mrb[12].mxu1 %vm525_vm0, %v1558_v21 }
  0x37   : > { %1467 = vmatprep.mubr.msk.bf16.mxu0 %vm525_vm0, %v1555_v22  ;;  %1499 = vmatprep.mubr.msk.bf16.mxu1 %vm525_vm0, %v1561_v23 }
  0x3e   : > { %1468 = vmatmul.mubr.msk.bf16.gmra.mrb[16].mxu0 %vm525_vm0, %v1556_v24  ;;  %1500 = vmatmul.mubr.msk.bf16.gmra.mrb[16].mxu1 %vm525_vm0, %v1562_v25 }
  0x3f   : > { %1471 = vmatprep.mubr.msk.bf16.mxu0 %vm525_vm0, %v1559_v26  ;;  %1503 = vmatprep.mubr.msk.bf16.mxu1 %vm525_vm0, %v1565_v27 }
  0x46   : > { %1472 = vmatmul.mubr.msk.bf16.gmra.mrb[20].mxu0 %vm525_vm0, %v1560_v28  ;;  %1504 = vmatmul.mubr.msk.bf16.gmra.mrb[20].mxu1 %vm525_vm0, %v1566_v29 }
  0x47   : > { %1475 = vmatprep.mubr.msk.bf16.mxu0 %vm525_vm0, %v1563_v30  ;;  %1507 = vmatprep.mubr.msk.bf16.mxu1 %vm525_vm0, %v1569_v31 }
  0x4e   : > { %1476 = vmatmul.mubr.msk.bf16.gmra.mrb[24].mxu0 %vm525_vm0, %v1564_v32  ;;  %1508 = vmatmul.mubr.msk.bf16.gmra.mrb[24].mxu1 %vm525_vm0, %v1570_v33 }
  0x4f   : > { %1479 = vmatprep.mubr.msk.bf16.mxu0 %vm525_vm0, %v1567_v34  ;;  %1511 = vmatprep.mubr.msk.bf16.mxu1 %vm525_vm0, %v1571_v35 }
  0x56   : > { %1480 = vmatmul.mubr.msk.bf16.gmra.mrb[28].mxu0 %vm525_vm0, %v1568_v36  ;;  %1512 = vmatmul.mubr.msk.bf16.gmra.mrb[28].mxu1 %vm525_vm0, %v1572_v37 }
  0xf1   : > { %v1453_v38 = vpop.f32.mrb[0].mxu0  ;;  %v1485_v39 = vpop.f32.mrb[0].mxu1 }
  0xf2   : > { %v656_v40 = vpop.f32.mrb[1].mxu0  ;;  %v784_v41 = vpop.f32.mrb[1].mxu1  ;;  %v665_v53 = vadd.f32 %v1453_v38, %v1713_v46  ;;  %v793_v56 = vadd.f32 %v1485_v39, %v1713_v46 }
  0xf3   : > { %v1454_v42 = vpop.f32.mrb[2].mxu0  ;;  %v1486_v43 = vpop.f32.mrb[2].mxu1  ;;  %v657_v54 = vadd.f32 %v1713_v46, %v656_v40  ;;  %v785_v59 = vadd.f32 %v1713_v46, %v784_v41 }
  0xf4   : > { %v659_v44 = vpop.f32.mrb[3].mxu0  ;;  %v787_v45 = vpop.f32.mrb[3].mxu1  ;;  %v668_v58 = vadd.f32 %v1454_v42, %v1713_v46  ;;  %v796_v60 = vadd.f32 %v1486_v43, %v1713_v46  ;;  %v918_v61 = vsel %vm911_vm1, %v665_v53, -inf  ;;  %v966_v63 = vsel %vm911_vm1, %v793_v56, -inf }
  0xf5   : > { %v912_v62 = vsel %vm911_vm1, %v657_v54, -inf  ;;  %v660_v1 = vadd.f32 %v1713_v46, %v659_v44  ;;  %v1735_v3 = vsel %vm911_vm1, %v785_v59, -inf  ;;  %v1738_v4 = vadd.f32 %v1713_v46, %v787_v45 }
  0xf6   : > { %v921_v0 = vsel %vm911_vm1, %v668_v58, -inf  ;;  %v1743_v9 = vsel %vm911_vm1, %v796_v60, -inf }
  0xf7   : > { %v915_v28 = vsel %vm911_vm1, %v660_v1, -inf }
  0xf9   : > { %v1457_v47 = vpop.f32.mrb[4].mxu0  ;;  %v1715_v48 = vpop.f32.mrb[4].mxu1 }
  0xfa   : > { %v672_v49 = vpop.f32.mrb[5].mxu0  ;;  %v1717_v50 = vpop.f32.mrb[5].mxu1  ;;  %v681_v6 = vadd.f32 %v1457_v47, %v1713_v46 }
  0xfb   : > { %v1458_v51 = vpop.f32.mrb[6].mxu0  ;;  %v1719_v52 = vpop.f32.mrb[6].mxu1  ;;  %v673_v12 = vadd.f32 %v1713_v46, %v672_v49 }
  0xfc   : > { %v675_v55 = vpop.f32.mrb[7].mxu0  ;;  %v1724_v57 = vpop.f32.mrb[7].mxu1  ;;  %v684_v13 = vadd.f32 %v1458_v51, %v1713_v46  ;;  %v930_v29 = vsel %vm911_vm1, %v681_v6, -inf }
  0xfd   : > { %v676_v14 = vadd.f32 %v1713_v46, %v675_v55  ;;  %v924_v32 = vsel %vm911_vm1, %v673_v12, -inf }
  0xfe   : > { %v933_v36 = vsel %vm911_vm1, %v684_v13, -inf }
  0xff   : > { %v927_v37 = vsel %vm911_vm1, %v676_v14, -inf }
 0x101   : > { %v1461_v2 = vpop.f32.mrb[8].mxu0  ;;  %v1493_v5 = vpop.f32.mrb[8].mxu1 }
 0x102   : > { %v697_v7 = vadd.f32 %v1461_v2, %v1713_v46  ;;  %v688_v8 = vpop.f32.mrb[9].mxu0  ;;  %v825_v10 = vadd.f32 %v1493_v5, %v1713_v46  ;;  %v816_v11 = vpop.f32.mrb[9].mxu1 }
 0x103   : > { %v689_v15 = vadd.f32 %v1713_v46, %v688_v8  ;;  %v1462_v16 = vpop.f32.mrb[10].mxu0  ;;  %v1494_v17 = vpop.f32.mrb[10].mxu1  ;;  %v817_v22 = vadd.f32 %v1713_v46, %v816_v11 }
 0x104   : > { %v919_v18 = vsel %vm911_vm1, %v697_v7, -inf  ;;  %v700_v19 = vadd.f32 %v1462_v16, %v1713_v46  ;;  %v691_v20 = vpop.f32.mrb[11].mxu0  ;;  %v967_v21 = vsel %vm911_vm1, %v825_v10, -inf  ;;  %v1759_v23 = vpop.f32.mrb[11].mxu1  ;;  %v828_v44 = vadd.f32 %v1494_v17, %v1713_v46 }
 0x105   : > { %v920_v24 = vmax.f32 %v918_v61, %v919_v18  ;;  %v913_v25 = vsel %vm911_vm1, %v689_v15, -inf  ;;  %v692_v26 = vadd.f32 %v1713_v46, %v691_v20  ;;  %v1763_v27 = vmax.f32 %v966_v63, %v967_v21 }
 0x106   : > { %v914_v30 = vmax.f32 %v912_v62, %v913_v25  ;;  %v922_v31 = vsel %vm911_vm1, %v700_v19, -inf  ;;  %v961_v43 = vsel %vm911_vm1, %v817_v22, -inf  ;;  %v970_v18 = vsel %vm911_vm1, %v828_v44, -inf }
 0x107   : > { %1010 = vst.msk [vmem:[%s1753_s20 + $0x10] sm:$0xff] %vm911_vm1, %v920_v24  ;;  %v1113_v33 = vmul.f32 %v920_v24, %v920_v24  ;;  %v923_v34 = vmax.f32 %v921_v0, %v922_v31  ;;  %v916_v35 = vsel %vm911_vm1, %v692_v26, -inf  ;;  %1026 = vst.msk [vmem:[%s1753_s20 + $0x90] sm:$0xff] %vm911_vm1, %v1763_v27  ;;  %v1043_v40 = vsel %vm911_vm1, %v920_v24, 0.0 }
 0x108   : > { %1008 = vst.msk [vmem:[%s1753_s20] sm:$0xff] %vm911_vm1, %v914_v30  ;;  %v1111_v38 = vmul.f32 %v914_v30, %v914_v30  ;;  %v917_v39 = vmax.f32 %v915_v28, %v916_v35  ;;  %v1040_v41 = vsel %vm911_vm1, %v914_v30, 0.0  ;;  %v1802_v5 = vmax.f32 %v1735_v3, %v961_v43 }
 0x109   : > { %1011 = vst.msk [vmem:[%s1753_s20 + $0x18] sm:$0xff] %vm911_vm1, %v923_v34  ;;  %v1465_v42 = vpop.f32.mrb[12].mxu0  ;;  %v1785_v45 = vpop.f32.mrb[12].mxu1  ;;  %v1146_v47 = vsel %vm911_vm1, %v1113_v33, 0.0  ;;  %v1114_v58 = vmul.f32 %v923_v34, %v923_v34  ;;  %v1045_v12 = vsel %vm911_vm1, %v923_v34, 0.0 }
 0x10a   : > { %1009 = vst.msk [vmem:[%s1753_s20 + $0x8] sm:$0xff] %vm911_vm1, %v917_v39  ;;  %v1041_v49 = vsel %vm911_vm1, %v917_v39, 0.0  ;;  %v1112_v51 = vmul.f32 %v917_v39, %v917_v39  ;;  %v713_v53 = vadd.f32 %v1465_v42, %v1713_v46  ;;  %v704_v54 = vpop.f32.mrb[13].mxu0  ;;  %v1792_v55 = vpop.f32.mrb[13].mxu1  ;;  %v1143_v56 = vsel %vm911_vm1, %v1111_v38, 0.0  ;;  %1024 = vst.msk [vmem:[%s1753_s20 + $0x80] sm:$0xff] %vm911_vm1, %v1802_v5 }
 0x10b   : > { %v1042_v59 = vadd.f32 %v1041_v49, %v1040_v41  ;;  %v705_v60 = vadd.f32 %v1713_v46, %v704_v54  ;;  %v1466_v61 = vpop.f32.mrb[14].mxu0  ;;  %v1796_v62 = vpop.f32.mrb[14].mxu1  ;;  %v1148_v3 = vsel %vm911_vm1, %v1114_v58, 0.0  ;;  %v1837_v38 = vmax.f32 %v1743_v9, %v970_v18 }
 0x10c   : > { %v1144_v63 = vsel %vm911_vm1, %v1112_v51, 0.0  ;;  %v931_v0 = vsel %vm911_vm1, %v713_v53, -inf  ;;  %v716_v1 = vadd.f32 %v1466_v61, %v1713_v46  ;;  %v707_v2 = vpop.f32.mrb[15].mxu0  ;;  %v1804_v6 = vpop.f32.mrb[15].mxu1  ;;  %v801_v41 = vadd.f32 %v1713_v46, %v1717_v50 }
 0x10d   : > { %v1044_v7 = vadd.f32 %v1043_v40, %v1042_v59  ;;  %v1145_v8 = vadd.f32 %v1144_v63, %v1143_v56  ;;  %v932_v10 = vmax.f32 %v930_v29, %v931_v0  ;;  %v925_v11 = vsel %vm911_vm1, %v705_v60, -inf  ;;  %1027 = vst.msk [vmem:[%s1753_s20 + $0x98] sm:$0xff] %vm911_vm1, %v1837_v38 }
 0x10e   : > { %v926_v13 = vmax.f32 %v924_v32, %v925_v11  ;;  %v934_v14 = vsel %vm911_vm1, %v716_v1, -inf  ;;  %v708_v15 = vadd.f32 %v1713_v46, %v707_v2  ;;  %v809_v32 = vadd.f32 %v1715_v48, %v1713_v46 }
 0x10f   : > { %v1147_v16 = vadd.f32 %v1146_v47, %v1145_v8  ;;  %1014 = vst.msk [vmem:[%s1753_s20 + $0x30] sm:$0xff] %vm911_vm1, %v932_v10  ;;  %v1046_v17 = vadd.f32 %v1045_v12, %v1044_v7  ;;  %v1820_v21 = vmax.f32 %v933_v36, %v934_v14  ;;  %v1117_v30 = vmul.f32 %v932_v10, %v932_v10 }
 0x110   : > { %1012 = vst.msk [vmem:[%s1753_s20 + $0x20] sm:$0xff] %vm911_vm1, %v926_v13  ;;  %v1047_v19 = vsel %vm911_vm1, %v926_v13, 0.0  ;;  %v1115_v20 = vmul.f32 %v926_v13, %v926_v13  ;;  %v928_v22 = vsel %vm911_vm1, %v708_v15, -inf  ;;  %v963_v48 = vsel %vm911_vm1, %v1738_v4, -inf }
 0x111   : > { %v1048_v24 = vadd.f32 %v1047_v19, %v1046_v17  ;;  %v1149_v25 = vadd.f32 %v1148_v3, %v1147_v16  ;;  %v929_v26 = vmax.f32 %v927_v37, %v928_v22  ;;  %v1469_v28 = vpop.f32.mrb[16].mxu0  ;;  %v1823_v29 = vpop.f32.mrb[16].mxu1  ;;  %1015 = vst.msk [vmem:[%s1753_s20 + $0x38] sm:$0xff] %vm911_vm1, %v1820_v21  ;;  %v1051_v47 = vsel %vm911_vm1, %v932_v10, 0.0 }
 0x112   : > { %v1150_v31 = vsel %vm911_vm1, %v1115_v20, 0.0  ;;  %v720_v33 = vpop.f32.mrb[17].mxu0  ;;  %v1831_v34 = vpop.f32.mrb[17].mxu1  ;;  %v812_v9 = vadd.f32 %v1719_v52, %v1713_v46  ;;  %v820_v4 = vadd.f32 %v1713_v46, %v1759_v23  ;;  %v1154_v53 = vsel %vm911_vm1, %v1117_v30, 0.0 }
 0x113   : > { %v1151_v35 = vadd.f32 %v1150_v31, %v1149_v25  ;;  %1013 = vst.msk [vmem:[%s1753_s20 + $0x28] sm:$0xff] %vm911_vm1, %v929_v26  ;;  %v1049_v36 = vsel %vm911_vm1, %v929_v26, 0.0  ;;  %v1116_v37 = vmul.f32 %v929_v26, %v929_v26  ;;  %v1470_v39 = vpop.f32.mrb[18].mxu0  ;;  %v1839_v40 = vpop.f32.mrb[18].mxu1  ;;  %v978_v54 = vsel %vm911_vm1, %v809_v32, -inf }
 0x114   : > { %v1050_v42 = vadd.f32 %v1049_v36, %v1048_v24  ;;  %v723_v43 = vpop.f32.mrb[19].mxu0  ;;  %v1845_v44 = vpop.f32.mrb[19].mxu1  ;;  %v964_v56 = vsel %vm911_vm1, %v820_v4, -inf  ;;  %v804_v59 = vadd.f32 %v1713_v46, %v1724_v57  ;;  %v841_v60 = vadd.f32 %v1785_v45, %v1713_v46 }
 0x115   : > { %v1152_v49 = vsel %vm911_vm1, %v1116_v37, 0.0  ;;  %v1861_v52 = vmax.f32 %v963_v48, %v964_v56  ;;  %v972_v23 = vsel %vm911_vm1, %v801_v41, -inf  ;;  %v981_v61 = vsel %vm911_vm1, %v812_v9, -inf }
 0x116   : > { %v1052_v51 = vadd.f32 %v1051_v47, %v1050_v42  ;;  %v1153_v50 = vadd.f32 %v1152_v49, %v1151_v35  ;;  %v833_v63 = vadd.f32 %v1713_v46, %v1792_v55  ;;  %v844_v0 = vadd.f32 %v1796_v62, %v1713_v46 }
 0x117   : > { %1025 = vst.msk [vmem:[%s1753_s20 + $0x88] sm:$0xff] %vm911_vm1, %v1861_v52  ;;  %v979_v57 = vsel %vm911_vm1, %v841_v60, -inf  ;;  %v836_v62 = vadd.f32 %v1713_v46, %v1804_v6  ;;  %v1118_v13 = vmul.f32 %v1820_v21, %v1820_v21  ;;  %v975_v14 = vsel %vm911_vm1, %v804_v59, -inf }
 0x118   : > { %v1155_v58 = vadd.f32 %v1154_v53, %v1153_v50  ;;  %v1879_v8 = vmax.f32 %v978_v54, %v979_v57  ;;  %v973_v10 = vsel %vm911_vm1, %v833_v63, -inf  ;;  %v982_v55 = vsel %vm911_vm1, %v844_v0, -inf }
 0x119   : > { %v1473_v1 = vpop.f32.mrb[20].mxu0  ;;  %v1871_v2 = vpop.f32.mrb[20].mxu1  ;;  %v1890_v15 = vmax.f32 %v972_v23, %v973_v10  ;;  %v1892_v3 = vmax.f32 %v981_v61, %v982_v55  ;;  %v729_v18 = vadd.f32 %v1469_v28, %v1713_v46  ;;  %v976_v6 = vsel %vm911_vm1, %v836_v62, -inf }
 0x11a   : > { %v736_v45 = vpop.f32.mrb[21].mxu0  ;;  %v1877_v7 = vpop.f32.mrb[21].mxu1  ;;  %1030 = vst.msk [vmem:[%s1753_s20 + $0xb0] sm:$0xff] %vm911_vm1, %v1879_v8  ;;  %v1903_v19 = vsel %vm911_vm1, %v1763_v27, 0.0  ;;  %v1907_v20 = vmul.f32 %v1763_v27, %v1763_v27  ;;  %v721_v22 = vadd.f32 %v1713_v46, %v720_v33  ;;  %v732_v24 = vadd.f32 %v1470_v39, %v1713_v46 }
 0x11b   : > { %v1474_v11 = vpop.f32.mrb[22].mxu0  ;;  %v1885_v12 = vpop.f32.mrb[22].mxu1  ;;  %1028 = vst.msk [vmem:[%s1753_s20 + $0xa0] sm:$0xff] %vm911_vm1, %v1890_v15  ;;  %1031 = vst.msk [vmem:[%s1753_s20 + $0xb8] sm:$0xff] %vm911_vm1, %v1892_v3  ;;  %v1053_v25 = vsel %vm911_vm1, %v1820_v21, 0.0  ;;  %v724_v26 = vadd.f32 %v1713_v46, %v723_v43  ;;  %v745_v28 = vadd.f32 %v1473_v1, %v1713_v46  ;;  %v1921_v27 = vmax.f32 %v975_v14, %v976_v6 }
 0x11c   : > { %v739_v16 = vpop.f32.mrb[23].mxu0  ;;  %v1894_v17 = vpop.f32.mrb[23].mxu1  ;;  %v1156_v30 = vsel %vm911_vm1, %v1118_v13, 0.0  ;;  %v737_v31 = vadd.f32 %v1713_v46, %v736_v45  ;;  %v748_v32 = vadd.f32 %v1474_v11, %v1713_v46  ;;  %v1054_v33 = vadd.f32 %v1053_v25, %v1052_v51 }
 0x11d   : > { %v1928_v35 = vsel %vm911_vm1, %v1802_v5, 0.0  ;;  %v1932_v21 = vmul.f32 %v1802_v5, %v1802_v5  ;;  %v942_v36 = vsel %vm911_vm1, %v729_v18, -inf  ;;  %1029 = vst.msk [vmem:[%s1753_s20 + $0xa8] sm:$0xff] %vm911_vm1, %v1921_v27  ;;  %v1157_v39 = vadd.f32 %v1156_v30, %v1155_v58 }
 0x11e   : > { %v936_v41 = vsel %vm911_vm1, %v721_v22, -inf  ;;  %v945_v42 = vsel %vm911_vm1, %v732_v24, -inf  ;;  %v740_v43 = vadd.f32 %v1713_v46, %v739_v16  ;;  %v1948_v9 = vmul.f32 %v1861_v52, %v1861_v52 }
 0x11f   : > { %v939_v4 = vsel %vm911_vm1, %v724_v26, -inf  ;;  %v954_v51 = vsel %vm911_vm1, %v745_v28, -inf  ;;  %v948_v56 = vsel %vm911_vm1, %v737_v31, -inf  ;;  %v1957_v58 = vsel %vm911_vm1, %v748_v32, -inf }
 0x120   : > { %v857_v57 = vadd.f32 %v1823_v29, %v1713_v46  ;;  %v951_v45 = vsel %vm911_vm1, %v740_v43, -inf  ;;  %v849_v62 = vadd.f32 %v1713_v46, %v1831_v34  ;;  %v860_v14 = vadd.f32 %v1839_v40, %v1713_v46 }
 0x121   : > { %v1477_v37 = vpop.f32.mrb[24].mxu0  ;;  %v1938_v48 = vpop.f32.mrb[24].mxu1  ;;  %v852_v29 = vadd.f32 %v1713_v46, %v1845_v44  ;;  %v873_v40 = vadd.f32 %v1871_v2, %v1713_v46 }
 0x122   : > { %v761_v47 = vadd.f32 %v1477_v37, %v1713_v46  ;;  %v752_v49 = vpop.f32.mrb[25].mxu0  ;;  %v1944_v5 = vpop.f32.mrb[25].mxu1  ;;  %v1985_v25 = vsel %vm911_vm1, %v857_v57, -inf }
 0x123   : > { %v753_v50 = vadd.f32 %v1713_v46, %v752_v49  ;;  %v1478_v53 = vpop.f32.mrb[26].mxu0  ;;  %v1953_v54 = vpop.f32.mrb[26].mxu1 }
 0x124   : > { %v943_v59 = vsel %vm911_vm1, %v761_v47, -inf  ;;  %v764_v60 = vadd.f32 %v1478_v53, %v1713_v46  ;;  %v755_v23 = vpop.f32.mrb[27].mxu0  ;;  %v1961_v61 = vpop.f32.mrb[27].mxu1 }
 0x125   : > { %v944_v63 = vmax.f32 %v942_v36, %v943_v59  ;;  %v937_v0 = vsel %vm911_vm1, %v753_v50, -inf  ;;  %v756_v1 = vadd.f32 %v1713_v46, %v755_v23 }
 0x126   : > { %v938_v10 = vmax.f32 %v936_v41, %v937_v0  ;;  %v946_v55 = vsel %vm911_vm1, %v764_v60, -inf }
 0x127   : > { %1018 = vst.msk [vmem:[%s1753_s20 + $0x50] sm:$0xff] %vm911_vm1, %v944_v63  ;;  %v947_v11 = vmax.f32 %v945_v42, %v946_v55  ;;  %v940_v13 = vsel %vm911_vm1, %v756_v1, -inf  ;;  %v1121_v16 = vmul.f32 %v944_v63, %v944_v63  ;;  %v1059_v34 = vsel %vm911_vm1, %v944_v63, 0.0 }
 0x128   : > { %1016 = vst.msk [vmem:[%s1753_s20 + $0x40] sm:$0xff] %vm911_vm1, %v938_v10  ;;  %v1055_v18 = vsel %vm911_vm1, %v938_v10, 0.0  ;;  %v1119_v6 = vmul.f32 %v938_v10, %v938_v10  ;;  %v941_v22 = vmax.f32 %v939_v4, %v940_v13 }
 0x129   : > { %v1056_v24 = vadd.f32 %v1055_v18, %v1054_v33  ;;  %1019 = vst.msk [vmem:[%s1753_s20 + $0x58] sm:$0xff] %vm911_vm1, %v947_v11  ;;  %v1481_v26 = vpop.f32.mrb[28].mxu0  ;;  %v1989_v44 = vpop.f32.mrb[28].mxu1  ;;  %v1122_v41 = vmul.f32 %v947_v11, %v947_v11  ;;  %v1162_v49 = vsel %vm911_vm1, %v1121_v16, 0.0  ;;  %v1061_v1 = vsel %vm911_vm1, %v947_v11, 0.0 }
 0x12a   : > { %v1158_v28 = vsel %vm911_vm1, %v1119_v6, 0.0  ;;  %1017 = vst.msk [vmem:[%s1753_s20 + $0x48] sm:$0xff] %vm911_vm1, %v941_v22  ;;  %v1057_v30 = vsel %vm911_vm1, %v941_v22, 0.0  ;;  %v1120_v31 = vmul.f32 %v941_v22, %v941_v22  ;;  %v777_v32 = vadd.f32 %v1481_v26, %v1713_v46  ;;  %v768_v33 = vpop.f32.mrb[29].mxu0  ;;  %v1996_v36 = vpop.f32.mrb[29].mxu1 }
 0x12b   : > { %v1159_v37 = vadd.f32 %v1158_v28, %v1157_v39  ;;  %v1058_v42 = vadd.f32 %v1057_v30, %v1056_v24  ;;  %v769_v43 = vadd.f32 %v1713_v46, %v768_v33  ;;  %v1482_v2 = vpop.f32.mrb[30].mxu0  ;;  %v1999_v47 = vpop.f32.mrb[30].mxu1  ;;  %v1164_v13 = vsel %vm911_vm1, %v1122_v41, 0.0 }
 0x12c   : > { %v1160_v4 = vsel %vm911_vm1, %v1120_v31, 0.0  ;;  %v955_v50 = vsel %vm911_vm1, %v777_v32, -inf  ;;  %v780_v53 = vadd.f32 %v1482_v2, %v1713_v46  ;;  %v771_v59 = vpop.f32.mrb[31].mxu0  ;;  %v2005_v60 = vpop.f32.mrb[31].mxu1  ;;  %v993_v30 = vsel %vm911_vm1, %v860_v14, -inf }
 0x12d   : > { %v1060_v39 = vadd.f32 %v1059_v34, %v1058_v42  ;;  %v1161_v23 = vadd.f32 %v1160_v4, %v1159_v37  ;;  %v956_v63 = vmax.f32 %v954_v51, %v955_v50  ;;  %v949_v0 = vsel %vm911_vm1, %v769_v43, -inf }
 0x12e   : > { %v950_v57 = vmax.f32 %v948_v56, %v949_v0  ;;  %v958_v10 = vsel %vm911_vm1, %v780_v53, -inf  ;;  %v772_v55 = vadd.f32 %v1713_v46, %v771_v59  ;;  %v984_v34 = vsel %vm911_vm1, %v849_v62, -inf }
 0x12f   : > { %v1163_v16 = vadd.f32 %v1162_v49, %v1161_v23  ;;  %1022 = vst.msk [vmem:[%s1753_s20 + $0x70] sm:$0xff] %vm911_vm1, %v956_v63  ;;  %v1125_v18 = vmul.f32 %v956_v63, %v956_v63  ;;  %v1062_v6 = vadd.f32 %v1061_v1, %v1060_v39  ;;  %v959_v56 = vmax.f32 %v1957_v58, %v958_v10 }
 0x130   : > { %1020 = vst.msk [vmem:[%s1753_s20 + $0x60] sm:$0xff] %vm911_vm1, %v950_v57  ;;  %v1063_v51 = vsel %vm911_vm1, %v950_v57, 0.0  ;;  %v1123_v22 = vmul.f32 %v950_v57, %v950_v57  ;;  %v952_v11 = vsel %vm911_vm1, %v772_v55, -inf  ;;  %v987_v31 = vsel %vm911_vm1, %v852_v29, -inf }
 0x131   : > { %v1064_v24 = vadd.f32 %v1063_v51, %v1062_v6  ;;  %v1165_v26 = vadd.f32 %v1164_v13, %v1163_v16  ;;  %v953_v28 = vmax.f32 %v951_v45, %v952_v11  ;;  %v1002_v33 = vsel %vm911_vm1, %v873_v40, -inf  ;;  %1023 = vst.msk [vmem:[%s1753_s20 + $0x78] sm:$0xff] %vm911_vm1, %v959_v56 }
 0x132   : > { %v1166_v32 = vsel %vm911_vm1, %v1123_v22, 0.0  ;;  %v1067_v37 = vsel %vm911_vm1, %v956_v63, 0.0  ;;  %v1170_v45 = vsel %vm911_vm1, %v1125_v18, 0.0  ;;  %v1069_v14 = vsel %vm911_vm1, %v959_v56, 0.0 }
 0x133   : > { %v1167_v58 = vadd.f32 %v1166_v32, %v1165_v26  ;;  %1021 = vst.msk [vmem:[%s1753_s20 + $0x68] sm:$0xff] %vm911_vm1, %v953_v28  ;;  %v1065_v62 = vsel %vm911_vm1, %v953_v28, 0.0  ;;  %v1124_v41 = vmul.f32 %v953_v28, %v953_v28  ;;  %v889_v29 = vadd.f32 %v1938_v48, %v1713_v46 }
 0x134   : > { %v1066_v42 = vadd.f32 %v1065_v62, %v1064_v24  ;;  %v1126_v43 = vmul.f32 %v959_v56, %v959_v56  ;;  %v881_v2 = vadd.f32 %v1713_v46, %v1944_v5  ;;  %v892_v49 = vadd.f32 %v1953_v54, %v1713_v46 }
 0x135   : > { %v1168_v40 = vsel %vm911_vm1, %v1124_v41, 0.0  ;;  %v991_v53 = vsel %vm911_vm1, %v889_v29, -inf  ;;  %v884_v59 = vadd.f32 %v1713_v46, %v1961_v61  ;;  %v905_v5 = vadd.f32 %v1989_v44, %v1713_v46 }
 0x136   : > { %v1068_v4 = vadd.f32 %v1067_v37, %v1066_v42  ;;  %v1169_v50 = vadd.f32 %v1168_v40, %v1167_v58  ;;  %v2043_v39 = vmax.f32 %v1985_v25, %v991_v53  ;;  %v985_v48 = vsel %vm911_vm1, %v881_v2, -inf }
 0x137   : > { %v994_v23 = vsel %vm911_vm1, %v892_v49, -inf  ;;  %v2049_v0 = vmax.f32 %v984_v34, %v985_v48  ;;  %v1172_v61 = vsel %vm911_vm1, %v1126_v43, 0.0  ;;  %v865_v25 = vadd.f32 %v1713_v46, %v1877_v7 }
 0x138   : > { %v1070_v54 = vadd.f32 %v1069_v14, %v1068_v4  ;;  %v1171_v63 = vadd.f32 %v1170_v45, %v1169_v50  ;;  %v2051_v1 = vmax.f32 %v993_v30, %v994_v23  ;;  %1034 = vst.msk [vmem:[%s1753_s20 + $0xd0] sm:$0xff] %vm911_vm1, %v2043_v39  ;;  %v988_v57 = vsel %vm911_vm1, %v884_v59, -inf }
 0x139   : > { %v1003_v10 = vsel %vm911_vm1, %v905_v5, -inf  ;;  %v1178_v44 = vsel %vm911_vm1, %v1907_v20, 0.0  ;;  %v1130_v55 = vmul.f32 %v1837_v38, %v1837_v38  ;;  %1032 = vst.msk [vmem:[%s1753_s20 + $0xc0] sm:$0xff] %vm911_vm1, %v2049_v0  ;;  %v1174_v7 = vsel %vm911_vm1, %v1932_v21, 0.0 }
 0x13a   : > { %v1072_v13 = vadd.f32 %v1928_v35, %v1070_v54  ;;  %v1173_v16 = vadd.f32 %v1172_v61, %v1171_v63  ;;  %1035 = vst.msk [vmem:[%s1753_s20 + $0xd8] sm:$0xff] %vm911_vm1, %v2051_v1  ;;  %v1073_v18 = vsel %vm911_vm1, %v1861_v52, 0.0  ;;  %v876_v20 = vadd.f32 %v1885_v12, %v1713_v46 }
 0x13b   : > { %v989_v6 = vmax.f32 %v987_v31, %v988_v57  ;;  %v868_v22 = vadd.f32 %v1713_v46, %v1894_v17  ;;  %v2080_v56 = vmax.f32 %v1002_v33, %v1003_v10  ;;  %v1077_v11 = vsel %vm911_vm1, %v1837_v38, 0.0 }
 0x13c   : > { %v1074_v51 = vadd.f32 %v1073_v18, %v1072_v13  ;;  %v1175_v35 = vadd.f32 %v1174_v7, %v1173_v16  ;;  %v1176_v21 = vsel %vm911_vm1, %v1948_v9, 0.0  ;;  %v996_v52 = vsel %vm911_vm1, %v865_v25, -inf }
 0x13d   : > { %1033 = vst.msk [vmem:[%s1753_s20 + $0xc8] sm:$0xff] %vm911_vm1, %v989_v6  ;;  %v897_v12 = vadd.f32 %v1713_v46, %v1996_v36  ;;  %v1180_v34 = vsel %vm911_vm1, %v1130_v55, 0.0  ;;  %v1131_v17 = vmul.f32 %v1890_v15, %v1890_v15  ;;  %1038 = vst.msk [vmem:[%s1753_s20 + $0xf0] sm:$0xff] %vm911_vm1, %v2080_v56  ;;  %v1005_v38 = vsel %vm911_vm1, %v876_v20, -inf }
 0x13e   : > { %v1076_v24 = vadd.f32 %v1903_v19, %v1074_v51  ;;  %v1177_v26 = vadd.f32 %v1176_v21, %v1175_v35  ;;  %v908_v28 = vadd.f32 %v1999_v47, %v1713_v46  ;;  %v900_v36 = vadd.f32 %v1713_v46, %v2005_v60 }
 0x13f   : > { %v997_v9 = vsel %vm911_vm1, %v897_v12, -inf  ;;  %v999_v31 = vsel %vm911_vm1, %v868_v22, -inf  ;;  %v1079_v33 = vsel %vm911_vm1, %v1890_v15, 0.0  ;;  %v1132_v37 = vmul.f32 %v1921_v27, %v1921_v27 }
 0x140   : > { %v1179_v30 = vadd.f32 %v1178_v44, %v1177_v26  ;;  %v1078_v32 = vadd.f32 %v1077_v11, %v1076_v24  ;;  %v998_v19 = vmax.f32 %v996_v52, %v997_v9  ;;  %v1006_v58 = vsel %vm911_vm1, %v908_v28, -inf }
 0x141   : > { %v1000_v47 = vsel %vm911_vm1, %v900_v36, -inf  ;;  %v1133_v46 = vmul.f32 %v1879_v8, %v1879_v8  ;;  %v1182_v41 = vsel %vm911_vm1, %v1131_v17, 0.0  ;;  %v1081_v15 = vsel %vm911_vm1, %v1921_v27, 0.0 }
 0x142   : > { %v1080_v60 = vadd.f32 %v1079_v33, %v1078_v32  ;;  %v1181_v62 = vadd.f32 %v1180_v34, %v1179_v30  ;;  %1036 = vst.msk [vmem:[%s1753_s20 + $0xe0] sm:$0xff] %vm911_vm1, %v998_v19  ;;  %v1007_v45 = vmax.f32 %v1005_v38, %v1006_v58  ;;  %v1001_v14 = vmax.f32 %v999_v31, %v1000_v47 }
 0x143   : > { %v1083_v43 = vsel %vm911_vm1, %v1879_v8, 0.0  ;;  %v1134_v40 = vmul.f32 %v1892_v3, %v1892_v3  ;;  %v1184_v2 = vsel %vm911_vm1, %v1132_v37, 0.0  ;;  %v1186_v27 = vsel %vm911_vm1, %v1133_v46, 0.0 }
 0x144   : > { %v1082_v42 = vadd.f32 %v1081_v15, %v1080_v60  ;;  %v1183_v29 = vadd.f32 %v1182_v41, %v1181_v62  ;;  %1039 = vst.msk [vmem:[%s1753_s20 + $0xf8] sm:$0xff] %vm911_vm1, %v1007_v45  ;;  %1037 = vst.msk [vmem:[%s1753_s20 + $0xe8] sm:$0xff] %vm911_vm1, %v1001_v14  ;;  %v1085_v50 = vsel %vm911_vm1, %v1892_v3, 0.0  ;;  %v1135_v53 = vmul.f32 %v2049_v0, %v2049_v0 }
 0x145   : > { %v1188_v48 = vsel %vm911_vm1, %v1134_v40, 0.0  ;;  %v1087_v23 = vsel %vm911_vm1, %v2049_v0, 0.0  ;;  %v1136_v5 = vmul.f32 %v989_v6, %v989_v6  ;;  %v1137_v61 = vmul.f32 %v2043_v39, %v2043_v39 }
 0x146   : > { %v1084_v49 = vadd.f32 %v1083_v43, %v1082_v42  ;;  %v1185_v4 = vadd.f32 %v1184_v2, %v1183_v29  ;;  %v1190_v25 = vsel %vm911_vm1, %v1135_v53, 0.0  ;;  %v1089_v3 = vsel %vm911_vm1, %v989_v6, 0.0 }
 0x147   : > { %v1091_v44 = vsel %vm911_vm1, %v2043_v39, 0.0  ;;  %v1138_v55 = vmul.f32 %v2051_v1, %v2051_v1  ;;  %v1192_v0 = vsel %vm911_vm1, %v1136_v5, 0.0  ;;  %v1194_v7 = vsel %vm911_vm1, %v1137_v61, 0.0 }
 0x148   : > { %v1086_v8 = vadd.f32 %v1085_v50, %v1084_v49  ;;  %v1187_v59 = vadd.f32 %v1186_v27, %v1185_v4  ;;  %v1093_v18 = vsel %vm911_vm1, %v2051_v1, 0.0  ;;  %v1139_v20 = vmul.f32 %v998_v19, %v998_v19 }
 0x149   : > { %v1196_v35 = vsel %vm911_vm1, %v1138_v55, 0.0  ;;  %v1095_v22 = vsel %vm911_vm1, %v998_v19, 0.0  ;;  %v1140_v39 = vmul.f32 %v1001_v14, %v1001_v14  ;;  %v1141_v52 = vmul.f32 %v2080_v56, %v2080_v56 }
 0x14a   : > { %v1088_v54 = vadd.f32 %v1087_v23, %v1086_v8  ;;  %v1189_v63 = vadd.f32 %v1188_v48, %v1187_v59  ;;  %v1198_v12 = vsel %vm911_vm1, %v1139_v20, 0.0  ;;  %v1097_v34 = vsel %vm911_vm1, %v1001_v14, 0.0 }
 0x14b   : > { %v1099_v24 = vsel %vm911_vm1, %v2080_v56, 0.0  ;;  %v1142_v26 = vmul.f32 %v1007_v45, %v1007_v45  ;;  %v1200_v38 = vsel %vm911_vm1, %v1140_v39, 0.0  ;;  %v1202_v36 = vsel %vm911_vm1, %v1141_v52, 0.0 }
 0x14c   : > { %v1191_v57 = vadd.f32 %v1190_v25, %v1189_v63  ;;  %v1090_v10 = vadd.f32 %v1089_v3, %v1088_v54  ;;  %v1101_v30 = vsel %vm911_vm1, %v1007_v45, 0.0 }
 0x14d   : > { %v1204_v19 = vsel %vm911_vm1, %v1142_v26, 0.0 }
 0x14e   : > { %v1092_v13 = vadd.f32 %v1091_v44, %v1090_v10  ;;  %v1193_v16 = vadd.f32 %v1192_v0, %v1191_v57 }
 0x150   : > { %v1195_v51 = vadd.f32 %v1194_v7, %v1193_v16  ;;  %v1094_v6 = vadd.f32 %v1093_v18, %v1092_v13 }
 0x152   : > { %v1096_v11 = vadd.f32 %v1095_v22, %v1094_v6  ;;  %v1197_v21 = vadd.f32 %v1196_v35, %v1195_v51 }
 0x154   : > { %v1199_v17 = vadd.f32 %v1198_v12, %v1197_v21  ;;  %v1098_v1 = vadd.f32 %v1097_v34, %v1096_v11 }
 0x156   : > { %v1100_v9 = vadd.f32 %v1099_v24, %v1098_v1  ;;  %v1201_v28 = vadd.f32 %v1200_v38, %v1199_v17 }
 0x158   : > { %v1102_v31 = vadd.f32 %v1101_v30, %v1100_v9  ;;  %v1203_v32 = vadd.f32 %v1202_v36, %v1201_v28 }
 0x15a   : > { %v1103_v33 = vrot.slane %v1102_v31, 4  ;;  %v1205_v37 = vadd.f32 %v1204_v19, %v1203_v32 }
 0x15c   : > { %v1104_v58 = vadd.f32 %v1103_v33, %v1102_v31  ;;  %v1206_v47 = vrot.slane %v1205_v37, 4 }
 0x15e   : > { %v1105_v56 = vrot.slane %v1104_v58, 2  ;;  %v1207_v46 = vadd.f32 %v1206_v47, %v1205_v37 }
 0x160   : > { %v1106_v60 = vadd.f32 %v1105_v56, %v1104_v58  ;;  %v1208_v62 = vrot.slane %v1207_v46, 2 }
 0x162   : > { %v1107_v41 = vrot.slane %v1106_v60, 1  ;;  %v1209_v15 = vadd.f32 %v1208_v62, %v1207_v46 }
 0x164   : > { %v1108_v45 = vadd.f32 %v1107_v41, %v1106_v60  ;;  %v1210_v14 = vrot.slane %v1209_v15, 1 }
 0x166   : > { %1110 = vst.msk [vmem:[%s241_s23] sm:$0x1] %vm1109_vm2, %v1108_v45  ;;  %v1211_v42 = vadd.f32 %v1210_v14, %v1209_v15 }
 0x168   : > { %1212 = vst.msk [vmem:[%s244_s26] sm:$0x1] %vm1109_vm2, %v1211_v42 }
 0x169 PF: > { %s16_s18 = sadd.s32 1, %s1579_s18  }
 0x16a   : > { %p13_p6 = scmp.ge.s32.totalorder %s16_s18, 4  }
 0x16c   :  { %15 = sbr.rel (!%p13_p6) target bundleno = 1 (0x1), region = 86 }

// kernel: tile.23
= control target key start
LH: loop header
LB: loop body
LE: loop exit
PB: predicated region body
PF: predicated region fallthrough
CT: control target
= control target key end

     0   :  { %s22_s0 = inlined_call_operand.vmem [shape: f32[32], index: 0, kind: input, shape index: {}]   ;;  %s23_s1 = inlined_call_operand.vmem [shape: f32[4,32], index: 1, kind: output, shape index: {}]  }
   0x1   :  { %v4_v0 = vld [vmem:[%s22_s0] ss:$0 sm:$0xff] }
   0x2   :  { %5 = vst [vmem:[%s23_s1] sm:$0xf] %v4_v0 }

// kernel: tile.24
= control target key start
LH: loop header
LB: loop body
LE: loop exit
PB: predicated region body
PF: predicated region fallthrough
CT: control target
= control target key end

     0   :  { %vm7_vm0 = vcmask 261120   ;;  %s37_s8 = smov 32   ;;  %s38_s9 = smov 64   ;;  %vm13_vm1 = vcmask 1048320   ;;  %vm19_vm2 = vcmask 785920   ;;  %vm25_vm3 = vcmask 523520   ;;  %s55_s0 = inlined_call_operand.vmem [shape: f32[4,32], index: 0, kind: input, shape index: {}]   ;;  %s56_s1 = inlined_call_operand.vmem [shape: f32[1,128], index: 1, kind: output, shape index: {}]  }
   0x1   :  { %v4_v0 = vld [vmem:[%s55_s0] sm:$0xf]  ;;  %s36_s0 = smov 96  }
   0x2   :  { %5 = vst [vmem:[#allocation1] sm:$0xf] %v4_v0 }
   0x9   :  { %v10_v1 = vld [vmem:[#allocation1 + $0x3] sm:$0x1]   ;;  %v22_v2 = vld [vmem:[#allocation1 + $0x1] sm:$0x1]   ;;  %v6_v3 = vld [vmem:[#allocation1] sm:$0x1]  }
   0xa   :  { %11 = vrot.lane.b32.xlu0 %v10_v1, %s36_s0  ;;  %23 = vrot.lane.b32.xlu1 %v22_v2, %s37_s8  ;;  %v16_v4 = vld [vmem:[#allocation1 + $0x2] sm:$0x1]   ;;  %8 = vst.msk [vmem:[#allocation0] sm:$0x1] %vm7_vm0, %v6_v3  }
   0xe   :  { %17 = vrot.lane.b32.xlu0 %v16_v4, %s38_s9 }
  0x7c   :  { %v12_v5 = vpop.permute.xlu0 %11   ;;  %v24_v6 = vpop.permute.xlu1 %23  }
  0x7d   :  { %14 = vst.msk [vmem:[#allocation0] sm:$0x1] %vm13_vm1, %v12_v5  }
  0x80   :  { %v18_v7 = vpop.permute.xlu0 %17  }
  0x81   :  { %20 = vst.msk [vmem:[#allocation0] sm:$0x1] %vm19_vm2, %v18_v7  }
  0x82   :  { %26 = vst.msk [vmem:[#allocation0] sm:$0x1] %vm25_vm3, %v24_v6  }
  0x89   :  { %v30_v8 = vld [vmem:[#allocation0] sm:$0x1] }
  0x8a   :  { %32 = vst [vmem:[%s56_s1] sm:$0x1] %v30_v8 }

// kernel: cnn25d_forward.12
= control target key start
LH: loop header
LB: loop body
LE: loop exit
PB: predicated region body
PF: predicated region fallthrough
CT: control target
= control target key end

     0   :  { %s254_s0 = inlined_call_operand.vmem [shape: f32[128,128], index: 0, kind: input, shape index: {}]   ;;  %s255_s1 = inlined_call_operand.vmem [shape: f32[1,128], index: 1, kind: input, shape index: {}]   ;;  %s256_s2 = inlined_call_operand.vmem [shape: f32[1,128], index: 2, kind: input, shape index: {}]   ;;  %s257_s3 = inlined_call_operand.vmem [shape: f32[128,128], index: 3, kind: output, shape index: {}]  }
   0x1   :  { %v14_v0 = vld [vmem:[%s254_s0] sm:$0xff]  ;;  %v15_v4 = vld [vmem:[%s254_s0 + $0x8] sm:$0xff]  ;;  %v16_v5 = vld [vmem:[%s254_s0 + $0x10] sm:$0xff] }
   0x2   :  { %v112_v1 = vld [vmem:[%s255_s1] ss:$0 sm:$0xff]  ;;  %v17_v6 = vld [vmem:[%s254_s0 + $0x18] sm:$0xff]  ;;  %v19_v11 = vld [vmem:[%s254_s0 + $0x28] sm:$0xff] }
   0x3   :  { %v143_v2 = vld [vmem:[%s256_s2] ss:$0 sm:$0xff]  ;;  %v37_v3 = vmul.f32 %v112_v1, %v14_v0  ;;  %v38_v7 = vmul.f32 %v112_v1, %v15_v4  ;;  %v39_v8 = vmul.f32 %v112_v1, %v16_v5  ;;  %v40_v9 = vmul.f32 %v112_v1, %v17_v6  ;;  %v20_v12 = vld [vmem:[%s254_s0 + $0x30] sm:$0xff]  ;;  %v21_v17 = vld [vmem:[%s254_s0 + $0x38] sm:$0xff] }
   0x4   :  { %v18_v10 = vld [vmem:[%s254_s0 + $0x20] sm:$0xff]  ;;  %v42_v15 = vmul.f32 %v112_v1, %v19_v11  ;;  %v43_v16 = vmul.f32 %v112_v1, %v20_v12  ;;  %v44_v21 = vmul.f32 %v112_v1, %v21_v17  ;;  %v23_v27 = vld [vmem:[%s254_s0 + $0x48] sm:$0xff]  ;;  %v24_v28 = vld [vmem:[%s254_s0 + $0x50] sm:$0xff] }
   0x5   :  { %v60_v13 = vadd.f32 %v143_v2, %v37_v3  ;;  %v41_v14 = vmul.f32 %v112_v1, %v18_v10  ;;  %v61_v18 = vadd.f32 %v143_v2, %v38_v7  ;;  %v62_v19 = vadd.f32 %v143_v2, %v39_v8  ;;  %v22_v22 = vld [vmem:[%s254_s0 + $0x40] sm:$0xff]  ;;  %v25_v29 = vld [vmem:[%s254_s0 + $0x58] sm:$0xff]  ;;  %v27_v35 = vld [vmem:[%s254_s0 + $0x68] sm:$0xff] }
   0x6   :  { %v63_v20 = vadd.f32 %v143_v2, %v40_v9  ;;  %v65_v25 = vadd.f32 %v143_v2, %v42_v15  ;;  %v66_v26 = vadd.f32 %v143_v2, %v43_v16  ;;  %v67_v33 = vadd.f32 %v143_v2, %v44_v21  ;;  %v26_v34 = vld [vmem:[%s254_s0 + $0x60] sm:$0xff]  ;;  %v28_v36 = vld [vmem:[%s254_s0 + $0x70] sm:$0xff]  ;;  %v29_v41 = vld [vmem:[%s254_s0 + $0x78] sm:$0xff] }
   0x7   :  { %v76_v23 = vmax.f32 %v60_v13, 0.0  ;;  %v64_v24 = vadd.f32 %v143_v2, %v41_v14  ;;  %v77_v30 = vmax.f32 %v61_v18, 0.0  ;;  %v78_v31 = vmax.f32 %v62_v19, 0.0 }
   0x8   :  { %v79_v32 = vmax.f32 %v63_v20, 0.0  ;;  %v81_v38 = vmax.f32 %v65_v25, 0.0  ;;  %v82_v39 = vmax.f32 %v66_v26, 0.0  ;;  %v45_v40 = vmul.f32 %v112_v1, %v22_v22 }
   0x9   :  { %92 = vst [vmem:[%s257_s3] sm:$0xff] %v76_v23  ;;  %v80_v37 = vmax.f32 %v64_v24, 0.0  ;;  %93 = vst [vmem:[%s257_s3 + $0x8] sm:$0xff] %v77_v30  ;;  %v83_v42 = vmax.f32 %v67_v33, 0.0  ;;  %v46_v43 = vmul.f32 %v112_v1, %v23_v27  ;;  %v47_v44 = vmul.f32 %v112_v1, %v24_v28 }
   0xa   :  { %94 = vst [vmem:[%s257_s3 + $0x10] sm:$0xff] %v78_v31  ;;  %95 = vst [vmem:[%s257_s3 + $0x18] sm:$0xff] %v79_v32  ;;  %v48_v45 = vmul.f32 %v112_v1, %v25_v29  ;;  %v68_v46 = vadd.f32 %v143_v2, %v45_v40  ;;  %v49_v47 = vmul.f32 %v112_v1, %v26_v34 }
   0xb   :  { %96 = vst [vmem:[%s257_s3 + $0x20] sm:$0xff] %v80_v37  ;;  %97 = vst [vmem:[%s257_s3 + $0x28] sm:$0xff] %v81_v38  ;;  %v50_v48 = vmul.f32 %v112_v1, %v27_v35  ;;  %v51_v49 = vmul.f32 %v112_v1, %v28_v36  ;;  %v69_v50 = vadd.f32 %v143_v2, %v46_v43 }
   0xc   :  { %98 = vst [vmem:[%s257_s3 + $0x30] sm:$0xff] %v82_v39  ;;  %99 = vst [vmem:[%s257_s3 + $0x38] sm:$0xff] %v83_v42  ;;  %v70_v51 = vadd.f32 %v143_v2, %v47_v44  ;;  %v71_v52 = vadd.f32 %v143_v2, %v48_v45  ;;  %v52_v53 = vmul.f32 %v112_v1, %v29_v41  ;;  %v84_v54 = vmax.f32 %v68_v46, 0.0 }
   0xd   :  { %v72_v55 = vadd.f32 %v143_v2, %v49_v47  ;;  %v73_v56 = vadd.f32 %v143_v2, %v50_v48  ;;  %v74_v57 = vadd.f32 %v143_v2, %v51_v49  ;;  %v85_v58 = vmax.f32 %v69_v50, 0.0 }
   0xe   :  { %v86_v59 = vmax.f32 %v70_v51, 0.0  ;;  %v87_v60 = vmax.f32 %v71_v52, 0.0  ;;  %v75_v61 = vadd.f32 %v143_v2, %v52_v53  ;;  %100 = vst [vmem:[%s257_s3 + $0x40] sm:$0xff] %v84_v54 }
   0xf   :  { %v88_v62 = vmax.f32 %v72_v55, 0.0  ;;  %v89_v63 = vmax.f32 %v73_v56, 0.0  ;;  %v90_v0 = vmax.f32 %v74_v57, 0.0  ;;  %101 = vst [vmem:[%s257_s3 + $0x48] sm:$0xff] %v85_v58 }
  0x10   :  { %102 = vst [vmem:[%s257_s3 + $0x50] sm:$0xff] %v86_v59  ;;  %103 = vst [vmem:[%s257_s3 + $0x58] sm:$0xff] %v87_v60  ;;  %v91_v1 = vmax.f32 %v75_v61, 0.0 }
  0x11   :  { %104 = vst [vmem:[%s257_s3 + $0x60] sm:$0xff] %v88_v62  ;;  %105 = vst [vmem:[%s257_s3 + $0x68] sm:$0xff] %v89_v63 }
  0x12   :  { %106 = vst [vmem:[%s257_s3 + $0x70] sm:$0xff] %v90_v0  ;;  %107 = vst [vmem:[%s257_s3 + $0x78] sm:$0xff] %v91_v1 }

// kernel: cnn25d_forward.13
= control target key start
LH: loop header
LB: loop body
LE: loop exit
PB: predicated region body
PF: predicated region fallthrough
CT: control target
= control target key end

     0   :  { %vm318_vm0 = vcmask 261120   ;;  %vm537_vm1 = vcmask 523264   ;;  %s1020_s1 = inlined_call_operand.vmem [shape: bf16[288,64], index: 1, kind: input, shape index: {}]   ;;  %s1021_s0 = inlined_call_operand.vmem [shape: bf16[128,288], index: 0, kind: input, shape index: {}]   ;;  %s1022_s2 = inlined_call_operand.vmem [shape: f32[1,64], index: 2, kind: input, shape index: {}]   ;;  %s1023_s3 = inlined_call_operand.vmem [shape: f32[128,64], index: 3, kind: output, shape index: {}]  }
   0x1   :  { %v719_v0 = vld [vmem:[%s1020_s1 + $0x40] sm:$0xff]   ;;  %v721_v2 = vld [vmem:[%s1020_s1 + $0x48] sm:$0xff]   ;;  %v723_v4 = vld [vmem:[%s1020_s1 + $0x50] sm:$0xff]  }
   0x2   :  { %v720_v1 = vld [vmem:[%s1020_s1] sm:$0xff]   ;;  %609 = vmatprep.subr.bf16.mxu0 %v719_v0  ;;  %703 = vmatprep.subr.bf16.mxu1 %v719_v0  ;;  %v722_v3 = vld [vmem:[%s1020_s1 + $0x8] sm:$0xff]   ;;  %v724_v5 = vld [vmem:[%s1020_s1 + $0x10] sm:$0xff]  }
   0x3   :  { %610 = vmatpush3.bf16.msra.mxu0 %v720_v1  ;;  %711 = vmatpush3.bf16.msra.mxu1 %v720_v1  ;;  %v725_v6 = vld [vmem:[%s1020_s1 + $0x58] sm:$0xff]   ;;  %v727_v8 = vld [vmem:[%s1020_s1 + $0x60] sm:$0xff]   ;;  %v729_v10 = vld [vmem:[%s1020_s1 + $0x68] sm:$0xff]  }
   0x4   :  { %611 = vmatprep.subr.bf16.mxu0 %v721_v2  ;;  %704 = vmatprep.subr.bf16.mxu1 %v721_v2  ;;  %v726_v7 = vld [vmem:[%s1020_s1 + $0x18] sm:$0xff]   ;;  %v728_v9 = vld [vmem:[%s1020_s1 + $0x20] sm:$0xff]   ;;  %v730_v13 = vld [vmem:[%s1020_s1 + $0x28] sm:$0xff]  }
   0x5   :  { %v737_v11 = vld [vmem:[%s1021_s0 + $0x4] ss:$12 sps:$4 sm:$0xff]   ;;  %v740_v12 = vld [vmem:[%s1021_s0 + $0x94] ss:$12 sps:$4 sm:$0xff]   ;;  %v733_v16 = vld [vmem:[%s1020_s1 + $0x78] sm:$0xff]  }
   0x6   :  { %v731_v14 = vld [vmem:[%s1020_s1 + $0x70] sm:$0xff]   ;;  %375 = vmatprep.mubr.bf16.mxu0 %v737_v11  ;;  %423 = vmatprep.mubr.bf16.mxu1 %v740_v12  ;;  %v734_v17 = vld [vmem:[%s1020_s1 + $0x38] sm:$0xff]   ;;  %v735_v18 = vld [vmem:[%s1021_s0] ss:$12 sps:$4 sm:$0xff]  }
   0x7   :  { %612 = vmatpush3.bf16.msra.mxu0 %v722_v3  ;;  %712 = vmatpush3.bf16.msra.mxu1 %v722_v3  ;;  %v732_v15 = vld [vmem:[%s1020_s1 + $0x30] sm:$0xff]   ;;  %v741_v19 = vld [vmem:[%s1020_s1 + $0x80] sm:$0xff]   ;;  %v742_v21 = vld [vmem:[%s1021_s0 + $0x1c] ss:$12 sps:$4 sm:$0xff]  }
   0x8   :  { %613 = vmatprep.subr.bf16.mxu0 %v723_v4  ;;  %705 = vmatprep.subr.bf16.mxu1 %v723_v4  ;;  %v738_v20 = vld [vmem:[%s1021_s0 + $0x90] ss:$12 sps:$4 sm:$0xff]   ;;  %v744_v22 = vld [vmem:[%s1021_s0 + $0xac] ss:$12 sps:$4 sm:$0xff]   ;;  %v747_v25 = vld [vmem:[%s1021_s0 + $0xa8] ss:$12 sps:$4 sm:$0xff]  }
   0x9   :  { %v748_v23 = vld [vmem:[%s1020_s1 + $0x88] sm:$0xff]   ;;  %v746_v24 = vld [vmem:[%s1021_s0 + $0x18] ss:$12 sps:$4 sm:$0xff]   ;;  %v749_v26 = vld [vmem:[%s1021_s0 + $0x34] ss:$12 sps:$4 sm:$0xff]  }
   0xa   :  { %v751_v27 = vld [vmem:[%s1021_s0 + $0x8] ss:$12 sps:$4 sm:$0xff]   ;;  %v752_v28 = vld [vmem:[%s1021_s0 + $0x30] ss:$12 sps:$4 sm:$0xff]   ;;  %v753_v29 = vld [vmem:[%s1021_s0 + $0x20] ss:$12 sps:$4 sm:$0xff]  }
   0xb   :  { %614 = vmatpush3.bf16.msra.mxu0 %v724_v5  ;;  %713 = vmatpush3.bf16.msra.mxu1 %v724_v5  ;;  %v754_v30 = vld [vmem:[%s1021_s0 + $0x4c] ss:$12 sps:$4 sm:$0xff]   ;;  %v757_v32 = vld [vmem:[%s1021_s0 + $0x48] ss:$12 sps:$4 sm:$0xff]   ;;  %v758_v33 = vld [vmem:[%s1021_s0 + $0x50] ss:$12 sps:$4 sm:$0xff]  }
   0xc   :  { %615 = vmatprep.subr.bf16.mxu0 %v725_v6  ;;  %706 = vmatprep.subr.bf16.mxu1 %v725_v6  ;;  %v756_v31 = vld [vmem:[%s1021_s0 + $0x38] ss:$12 sps:$4 sm:$0xff]   ;;  %v761_v35 = vld [vmem:[%s1021_s0 + $0x68] ss:$12 sps:$4 sm:$0xff]   ;;  %v762_v36 = vld [vmem:[%s1021_s0 + $0x60] ss:$12 sps:$4 sm:$0xff]  }
   0xd   :  { %v759_v34 = vld [vmem:[%s1021_s0 + $0x64] ss:$12 sps:$4 sm:$0xff]   ;;  %v763_v37 = vld [vmem:[%s1021_s0 + $0x80] ss:$12 sps:$4 sm:$0xff]   ;;  %v764_v38 = vld [vmem:[%s1021_s0 + $0x7c] ss:$12 sps:$4 sm:$0xff]  }
   0xe   :  { %v766_v39 = vld [vmem:[%s1021_s0 + $0x98] ss:$12 sps:$4 sm:$0xff]   ;;  %v768_v41 = vld [vmem:[%s1021_s0 + $0xb0] ss:$12 sps:$4 sm:$0xff]   ;;  %v934_v2 = vld [vmem:[%s1022_s2] ss:$0 sm:$0xff] }
   0xf   :  { %616 = vmatpush3.bf16.msra.mxu0 %v726_v7  ;;  %714 = vmatpush3.bf16.msra.mxu1 %v726_v7  ;;  %v767_v40 = vld [vmem:[%s1021_s0 + $0x78] ss:$12 sps:$4 sm:$0xff]  }
  0x10   :  { %617 = vmatprep.subr.bf16.mxu0 %v727_v8  ;;  %707 = vmatprep.subr.bf16.mxu1 %v727_v8 }
  0x13   :  { %618 = vmatpush3.bf16.msra.mxu0 %v728_v9  ;;  %715 = vmatpush3.bf16.msra.mxu1 %v728_v9 }
  0x14   :  { %619 = vmatprep.subr.bf16.mxu0 %v729_v10  ;;  %708 = vmatprep.subr.bf16.mxu1 %v729_v10 }
  0x17   :  { %620 = vmatpush3.bf16.msra.mxu0 %v730_v13  ;;  %716 = vmatpush3.bf16.msra.mxu1 %v730_v13 }
  0x18   :  { %621 = vmatprep.subr.bf16.mxu0 %v731_v14  ;;  %709 = vmatprep.subr.bf16.mxu1 %v731_v14 }
  0x1b   :  { %622 = vmatpush3.bf16.msra.mxu0 %v732_v15  ;;  %717 = vmatpush3.bf16.msra.mxu1 %v732_v15 }
  0x1c   :  { %623 = vmatprep.subr.bf16.mxu0 %v733_v16  ;;  %710 = vmatprep.subr.bf16.mxu1 %v733_v16 }
  0x1f   :  { %624 = vmatpush3.bf16.msra.mxu0 %v734_v17  ;;  %718 = vmatpush3.bf16.msra.mxu1 %v734_v17 }
  0x20   :  { %683 = vmatprep.subr.bf16.mxu1 %v741_v19 }
  0x22   :  { %376 = vmatmul.mubr.bf16.vlgmr.msra.gmra.mrb[0].mxu0 %v735_v18  ;;  %424 = vmatmul.mubr.bf16.vlgmr.msra.gmra.mrb[0].mxu1 %v738_v20 }
  0x23   :  { %684 = vmatpush3.bf16.msra.mxu1 %v741_v19  ;;  %383 = vmatprep.mubr.bf16.mxu0 %v742_v21 }
  0x24   :  { %431 = vmatprep.mubr.bf16.mxu1 %v744_v22  ;;  %685 = vmatprep.subr.bf16.mxu1 %v748_v23 }
  0x27   :  { %686 = vmatpush3.bf16.msra.mxu1 %v748_v23 }
  0x2a   :  { %384 = vmatmul.mubr.bf16.gmra.mrb[4].mxu0 %v746_v24  ;;  %432 = vmatmul.mubr.bf16.gmra.mrb[4].mxu1 %v747_v25 }
  0x2b   :  { %391 = vmatprep.mubr.bf16.mxu0 %v749_v26  ;;  %687 = vmatprep.mubr.msk.bf16.mxu1 %vm318_vm0, %v751_v27 }
  0x32   :  { %392 = vmatmul.mubr.bf16.gmra.mrb[8].mxu0 %v752_v28  ;;  %688 = vmatmul.mubr.msk.bf16.vlgmr.msra.gmra.mrb[8].mxu1 %vm318_vm0, %v753_v29 }
  0x33   :  { %399 = vmatprep.mubr.bf16.mxu0 %v754_v30  ;;  %691 = vmatprep.mubr.msk.bf16.mxu1 %vm318_vm0, %v756_v31 }
  0x3a   :  { %400 = vmatmul.mubr.bf16.gmra.mrb[12].mxu0 %v757_v32  ;;  %692 = vmatmul.mubr.msk.bf16.gmra.mrb[12].mxu1 %vm318_vm0, %v758_v33 }
  0x3b   :  { %407 = vmatprep.mubr.bf16.mxu0 %v759_v34  ;;  %695 = vmatprep.mubr.msk.bf16.mxu1 %vm318_vm0, %v761_v35 }
  0x42   :  { %408 = vmatmul.mubr.bf16.gmra.mrb[16].mxu0 %v762_v36  ;;  %696 = vmatmul.mubr.msk.bf16.gmra.mrb[16].mxu1 %vm318_vm0, %v763_v37 }
  0x43   :  { %415 = vmatprep.mubr.bf16.mxu0 %v764_v38  ;;  %699 = vmatprep.mubr.msk.bf16.mxu1 %vm318_vm0, %v766_v39 }
  0x4a   :  { %416 = vmatmul.mubr.bf16.gmra.mrb[20].mxu0 %v767_v40  ;;  %700 = vmatmul.mubr.msk.bf16.gmra.mrb[20].mxu1 %vm318_vm0, %v768_v41 }
  0xf5   :  { %v625_v42 = vpop.f32.mrb[0].mxu0  ;;  %v661_v43 = vpop.f32.mrb[0].mxu1 }
  0xf6   :  { %v626_v44 = vpop.f32.mrb[1].mxu0  ;;  %v662_v45 = vpop.f32.mrb[1].mxu1 }
  0xf7   :  { %v627_v46 = vadd.f32 %v626_v44, %v625_v42  ;;  %v628_v47 = vpop.f32.mrb[2].mxu0  ;;  %v923_v48 = vadd.f32 %v662_v45, %v661_v43  ;;  %v664_v49 = vpop.f32.mrb[2].mxu1 }
  0xf8   :  { %v629_v50 = vpop.f32.mrb[3].mxu0  ;;  %v665_v51 = vpop.f32.mrb[3].mxu1 }
  0xf9   :  { %v630_v52 = vadd.f32 %v629_v50, %v628_v47  ;;  %v925_v53 = vadd.f32 %v665_v51, %v664_v49  ;;  %v378_v6 = vadd.f32 %v627_v46, %v934_v2 }
  0xfb   :  { %v381_v15 = vadd.f32 %v630_v52, %v934_v2 }
  0xfd   :  { %v631_v54 = vpop.f32.mrb[4].mxu0  ;;  %v667_v55 = vpop.f32.mrb[4].mxu1 }
  0xfe   :  { %v632_v56 = vpop.f32.mrb[5].mxu0  ;;  %v668_v57 = vpop.f32.mrb[5].mxu1 }
  0xff   :  { %v633_v58 = vadd.f32 %v632_v56, %v631_v54  ;;  %v634_v59 = vpop.f32.mrb[6].mxu0  ;;  %v927_v60 = vadd.f32 %v668_v57, %v667_v55  ;;  %v670_v61 = vpop.f32.mrb[6].mxu1 }
 0x100   :  { %v635_v62 = vpop.f32.mrb[7].mxu0  ;;  %v671_v63 = vpop.f32.mrb[7].mxu1 }
 0x101   :  { %v636_v0 = vadd.f32 %v635_v62, %v634_v59  ;;  %v929_v1 = vadd.f32 %v671_v63, %v670_v61  ;;  %v386_v3 = vadd.f32 %v633_v58, %v934_v2  ;;  %v434_v54 = vadd.f32 %v927_v60, %v934_v2 }
 0x102   :  { %v426_v58 = vadd.f32 %v923_v48, %v934_v2 }
 0x103   :  { %v389_v10 = vadd.f32 %v636_v0, %v934_v2  ;;  %v437_v63 = vadd.f32 %v929_v1, %v934_v2 }
 0x105   :  { %v637_v4 = vpop.f32.mrb[8].mxu0  ;;  %v689_v5 = vpop.f32.mrb[8].mxu1 }
 0x106   :  { %v483_v7 = vadd.f32 %v689_v5, %v386_v3  ;;  %v638_v8 = vpop.f32.mrb[9].mxu0  ;;  %v474_v9 = vpop.f32.mrb[9].mxu1  ;;  %v429_v5 = vadd.f32 %v925_v53, %v934_v2 }
 0x107   :  { %v639_v11 = vadd.f32 %v638_v8, %v637_v4  ;;  %v475_v12 = vadd.f32 %v474_v9, %v378_v6  ;;  %v640_v13 = vpop.f32.mrb[10].mxu0  ;;  %v690_v14 = vpop.f32.mrb[10].mxu1 }
 0x108   :  { %540 = vst.msk [vmem:[%s1023_s3 + $0x10] sm:$0xff] %vm537_vm1, %v483_v7  ;;  %v486_v16 = vadd.f32 %v690_v14, %v389_v10  ;;  %v641_v17 = vpop.f32.mrb[11].mxu0  ;;  %v477_v18 = vpop.f32.mrb[11].mxu1 }
 0x109   :  { %538 = vst.msk [vmem:[%s1023_s3] sm:$0xff] %vm537_vm1, %v475_v12  ;;  %v642_v19 = vadd.f32 %v641_v17, %v640_v13  ;;  %v478_v20 = vadd.f32 %v477_v18, %v381_v15  ;;  %v394_v23 = vadd.f32 %v639_v11, %v934_v2 }
 0x10a   :  { %541 = vst.msk [vmem:[%s1023_s3 + $0x18] sm:$0xff] %vm537_vm1, %v486_v16 }
 0x10b   :  { %539 = vst.msk [vmem:[%s1023_s3 + $0x8] sm:$0xff] %vm537_vm1, %v478_v20  ;;  %v397_v30 = vadd.f32 %v642_v19, %v934_v2 }
 0x10d   :  { %v643_v21 = vpop.f32.mrb[12].mxu0  ;;  %v693_v22 = vpop.f32.mrb[12].mxu1 }
 0x10e   :  { %v644_v24 = vpop.f32.mrb[13].mxu0  ;;  %v490_v25 = vpop.f32.mrb[13].mxu1 }
 0x10f   :  { %v645_v26 = vadd.f32 %v644_v24, %v643_v21  ;;  %v491_v27 = vadd.f32 %v490_v25, %v394_v23  ;;  %v646_v28 = vpop.f32.mrb[14].mxu0  ;;  %v694_v29 = vpop.f32.mrb[14].mxu1 }
 0x110   :  { %v647_v31 = vpop.f32.mrb[15].mxu0  ;;  %v493_v32 = vpop.f32.mrb[15].mxu1 }
 0x111   :  { %v402_v33 = vadd.f32 %v645_v26, %v934_v2  ;;  %542 = vst.msk [vmem:[%s1023_s3 + $0x20] sm:$0xff] %vm537_vm1, %v491_v27  ;;  %v648_v34 = vadd.f32 %v647_v31, %v646_v28  ;;  %v494_v35 = vadd.f32 %v493_v32, %v397_v30 }
 0x113   :  { %v499_v36 = vadd.f32 %v693_v22, %v402_v33  ;;  %v405_v37 = vadd.f32 %v648_v34, %v934_v2  ;;  %543 = vst.msk [vmem:[%s1023_s3 + $0x28] sm:$0xff] %vm537_vm1, %v494_v35 }
 0x115   :  { %544 = vst.msk [vmem:[%s1023_s3 + $0x30] sm:$0xff] %vm537_vm1, %v499_v36  ;;  %v502_v38 = vadd.f32 %v694_v29, %v405_v37  ;;  %v649_v39 = vpop.f32.mrb[16].mxu0  ;;  %v697_v40 = vpop.f32.mrb[16].mxu1 }
 0x116   :  { %v650_v41 = vpop.f32.mrb[17].mxu0  ;;  %v506_v42 = vpop.f32.mrb[17].mxu1 }
 0x117   :  { %545 = vst.msk [vmem:[%s1023_s3 + $0x38] sm:$0xff] %vm537_vm1, %v502_v38  ;;  %v651_v43 = vadd.f32 %v650_v41, %v649_v39  ;;  %v652_v44 = vpop.f32.mrb[18].mxu0  ;;  %v698_v45 = vpop.f32.mrb[18].mxu1 }
 0x118   :  { %v653_v46 = vpop.f32.mrb[19].mxu0  ;;  %v509_v47 = vpop.f32.mrb[19].mxu1 }
 0x119   :  { %v410_v49 = vadd.f32 %v651_v43, %v934_v2  ;;  %v654_v50 = vadd.f32 %v653_v46, %v652_v44 }
 0x11b   :  { %v507_v51 = vadd.f32 %v506_v42, %v410_v49  ;;  %v413_v52 = vadd.f32 %v654_v50, %v934_v2 }
 0x11d   :  { %546 = vst.msk [vmem:[%s1023_s3 + $0x40] sm:$0xff] %vm537_vm1, %v507_v51  ;;  %v510_v55 = vadd.f32 %v509_v47, %v413_v52  ;;  %v655_v56 = vpop.f32.mrb[20].mxu0  ;;  %v701_v57 = vpop.f32.mrb[20].mxu1 }
 0x11e   :  { %v531_v59 = vadd.f32 %v701_v57, %v434_v54  ;;  %v656_v61 = vpop.f32.mrb[21].mxu0  ;;  %v522_v62 = vpop.f32.mrb[21].mxu1 }
 0x11f   :  { %547 = vst.msk [vmem:[%s1023_s3 + $0x48] sm:$0xff] %vm537_vm1, %v510_v55  ;;  %v657_v60 = vadd.f32 %v656_v61, %v655_v56  ;;  %v523_v0 = vadd.f32 %v522_v62, %v426_v58  ;;  %v658_v3 = vpop.f32.mrb[22].mxu0  ;;  %v702_v4 = vpop.f32.mrb[22].mxu1 }
 0x120   :  { %552 = vst.msk [vmem:[%s1023_s3 + $0x70] sm:$0xff] %vm537_vm1, %v531_v59  ;;  %v534_v48 = vadd.f32 %v702_v4, %v437_v63  ;;  %v659_v6 = vpop.f32.mrb[23].mxu0  ;;  %v525_v1 = vpop.f32.mrb[23].mxu1 }
 0x121   :  { %v418_v7 = vadd.f32 %v657_v60, %v934_v2  ;;  %550 = vst.msk [vmem:[%s1023_s3 + $0x60] sm:$0xff] %vm537_vm1, %v523_v0  ;;  %v660_v8 = vadd.f32 %v659_v6, %v658_v3  ;;  %v526_v9 = vadd.f32 %v525_v1, %v429_v5 }
 0x122   :  { %553 = vst.msk [vmem:[%s1023_s3 + $0x78] sm:$0xff] %vm537_vm1, %v534_v48 }
 0x123   :  { %v515_v53 = vadd.f32 %v697_v40, %v418_v7  ;;  %v421_v10 = vadd.f32 %v660_v8, %v934_v2  ;;  %551 = vst.msk [vmem:[%s1023_s3 + $0x68] sm:$0xff] %vm537_vm1, %v526_v9 }
 0x125   :  { %548 = vst.msk [vmem:[%s1023_s3 + $0x50] sm:$0xff] %vm537_vm1, %v515_v53  ;;  %v518_v11 = vadd.f32 %v698_v45, %v421_v10 }
 0x127   :  { %549 = vst.msk [vmem:[%s1023_s3 + $0x58] sm:$0xff] %vm537_vm1, %v518_v11 }

// kernel: tile.33
= control target key start
LH: loop header
LB: loop body
LE: loop exit
PB: predicated region body
PF: predicated region fallthrough
CT: control target
= control target key end

     0   :  { %s22_s0 = inlined_call_operand.vmem [shape: f32[64], index: 0, kind: input, shape index: {}]   ;;  %s23_s1 = inlined_call_operand.vmem [shape: f32[2,64], index: 1, kind: output, shape index: {}]  }
   0x1   :  { %v4_v0 = vld [vmem:[%s22_s0] ss:$0 sm:$0xff] }
   0x2   :  { %5 = vst [vmem:[%s23_s1] sm:$0x3] %v4_v0 }

// kernel: tile.34
= control target key start
LH: loop header
LB: loop body
LE: loop exit
PB: predicated region body
PF: predicated region fallthrough
CT: control target
= control target key end

     0   :  { %vm7_vm0 = vcmask 523264   ;;  %vm13_vm1 = vcmask 1048064   ;;  %s39_s0 = inlined_call_operand.vmem [shape: f32[2,64], index: 0, kind: input, shape index: {}]   ;;  %s40_s1 = inlined_call_operand.vmem [shape: f32[1,128], index: 1, kind: output, shape index: {}]  }
   0x1   :  { %v4_v0 = vld [vmem:[%s39_s0] sm:$0x3]  ;;  %s22_s0 = smov 64  }
   0x2   :  { %5 = vst [vmem:[#allocation1] sm:$0x3] %v4_v0 }
   0x9   :  { %v10_v1 = vld [vmem:[#allocation1 + $0x1] sm:$0x1]   ;;  %v6_v2 = vld [vmem:[#allocation1] sm:$0x1]  }
   0xa   :  { %11 = vrot.lane.b32.xlu0 %v10_v1, %s22_s0  ;;  %8 = vst.msk [vmem:[#allocation0] sm:$0x1] %vm7_vm0, %v6_v2  }
  0x7c   :  { %v12_v3 = vpop.permute.xlu0 %11  }
  0x7d   :  { %14 = vst.msk [vmem:[#allocation0] sm:$0x1] %vm13_vm1, %v12_v3  }
  0x84   :  { %v18_v4 = vld [vmem:[#allocation0] sm:$0x1] }
  0x85   :  { %20 = vst [vmem:[%s40_s1] sm:$0x1] %v18_v4 }

// kernel: cnn25d_forward.15
= control target key start
LH: loop header
LB: loop body
LE: loop exit
PB: predicated region body
PF: predicated region fallthrough
CT: control target
= control target key end

     0   :  { %s104_s0 = inlined_call_operand.vmem [shape: f32[32,128], index: 0, kind: input, shape index: {}]   ;;  %s105_s1 = inlined_call_operand.vmem [shape: f32[1,128], index: 1, kind: input, shape index: {}]   ;;  %s106_s2 = inlined_call_operand.vmem [shape: f32[1,128], index: 2, kind: input, shape index: {}]   ;;  %s107_s3 = inlined_call_operand.vmem [shape: f32[32,128], index: 3, kind: output, shape index: {}]  }
   0x1   :  { %v14_v0 = vld [vmem:[%s104_s0] sm:$0xff]  ;;  %v15_v4 = vld [vmem:[%s104_s0 + $0x8] sm:$0xff]  ;;  %v16_v5 = vld [vmem:[%s104_s0 + $0x10] sm:$0xff] }
   0x2   :  { %v52_v1 = vld [vmem:[%s105_s1] ss:$0 sm:$0xff]  ;;  %v17_v6 = vld [vmem:[%s104_s0 + $0x18] sm:$0xff] }
   0x3   :  { %v53_v2 = vld [vmem:[%s106_s2] ss:$0 sm:$0xff]  ;;  %v25_v3 = vmul.f32 %v52_v1, %v14_v0  ;;  %v26_v7 = vmul.f32 %v52_v1, %v15_v4  ;;  %v27_v8 = vmul.f32 %v52_v1, %v16_v5  ;;  %v28_v9 = vmul.f32 %v52_v1, %v17_v6 }
   0x5   :  { %v36_v10 = vadd.f32 %v53_v2, %v25_v3  ;;  %v37_v11 = vadd.f32 %v53_v2, %v26_v7  ;;  %v38_v12 = vadd.f32 %v53_v2, %v27_v8  ;;  %v39_v13 = vadd.f32 %v53_v2, %v28_v9 }
   0x7   :  { %v40_v14 = vmax.f32 %v36_v10, 0.0  ;;  %v41_v15 = vmax.f32 %v37_v11, 0.0  ;;  %v42_v16 = vmax.f32 %v38_v12, 0.0  ;;  %v43_v17 = vmax.f32 %v39_v13, 0.0 }
   0x9   :  { %44 = vst [vmem:[%s107_s3] sm:$0xff] %v40_v14  ;;  %45 = vst [vmem:[%s107_s3 + $0x8] sm:$0xff] %v41_v15 }
   0xa   :  { %46 = vst [vmem:[%s107_s3 + $0x10] sm:$0xff] %v42_v16  ;;  %47 = vst [vmem:[%s107_s3 + $0x18] sm:$0xff] %v43_v17 }

// kernel: cnn25d_forward.14
= control target key start
LH: loop header
LB: loop body
LE: loop exit
PB: predicated region body
PF: predicated region fallthrough
CT: control target
= control target key end

     0   :  { %v526_v0 = vmov 0   ;;  %vm209_vm0 = vcmask 523264   ;;  %vm384_vm1 = vcmask 516096   ;;  %s776_s1 = inlined_call_operand.vmem [shape: bf16[192,64], index: 1, kind: input, shape index: {}]   ;;  %s777_s0 = inlined_call_operand.vmem [shape: bf16[128,192], index: 0, kind: input, shape index: {}]   ;;  %s778_s2 = inlined_call_operand.vmem [shape: f32[1,64], index: 2, kind: input, shape index: {}]   ;;  %s779_s3 = inlined_call_operand.vmem [shape: f32[64,64], index: 3, kind: output, shape index: {0}]   ;;  %s780_s4 = inlined_call_operand.vmem [shape: f32[1,1,64], index: 4, kind: output, shape index: {1}]   ;;  %s781_s5 = inlined_call_operand.vmem [shape: f32[1,1,64], index: 5, kind: output, shape index: {2}]  }
   0x1   :  { %234 = vmatprep.subr.bf16.mxu0 %v526_v0  ;;  %465 = vmatprep.subr.bf16.mxu1 %v526_v0  ;;  %v490_v1 = vld [vmem:[%s776_s1] sm:$0xff]   ;;  %v491_v2 = vld [vmem:[%s776_s1 + $0x8] sm:$0xff]   ;;  %v492_v3 = vld [vmem:[%s776_s1 + $0x10] sm:$0xff]  }
   0x2   :  { %235 = vmatpush1.bf16.msra.mxu0 %v490_v1  ;;  %477 = vmatpush1.bf16.msra.mxu1 %v490_v1  ;;  %v493_v4 = vld [vmem:[%s776_s1 + $0x18] sm:$0xff]   ;;  %v504_v5 = vld [vmem:[%s777_s0 + $0x4] ss:$8 sps:$4 sm:$0xff]   ;;  %v496_v9 = vld [vmem:[%s776_s1 + $0x30] sm:$0xff]  }
   0x3   :  { %236 = vmatprep.subr.bf16.mxu0 %v526_v0  ;;  %466 = vmatprep.subr.bf16.mxu1 %v526_v0  ;;  %v494_v6 = vld [vmem:[%s776_s1 + $0x20] sm:$0xff]   ;;  %v495_v8 = vld [vmem:[%s776_s1 + $0x28] sm:$0xff]   ;;  %v497_v10 = vld [vmem:[%s776_s1 + $0x38] sm:$0xff]  }
   0x4   :  { %v507_v7 = vld [vmem:[%s777_s0 + $0x44] ss:$8 sps:$4 sm:$0xff]   ;;  %457 = vmatprep.mubr.msk.bf16.mxu0 %vm209_vm0, %v504_v5  ;;  %v500_v13 = vld [vmem:[%s776_s1 + $0x50] sm:$0xff]   ;;  %v501_v14 = vld [vmem:[%s776_s1 + $0x58] sm:$0xff]  }
   0x5   :  { %461 = vmatprep.mubr.msk.bf16.mxu1 %vm209_vm0, %v507_v7  ;;  %v498_v11 = vld [vmem:[%s776_s1 + $0x40] sm:$0xff]   ;;  %v499_v12 = vld [vmem:[%s776_s1 + $0x48] sm:$0xff]   ;;  %v508_v17 = vld [vmem:[%s777_s0 + $0x14] ss:$8 sps:$4 sm:$0xff]  }
   0x6   :  { %237 = vmatpush1.bf16.msra.mxu0 %v491_v2  ;;  %478 = vmatpush1.bf16.msra.mxu1 %v491_v2  ;;  %v502_v15 = vld [vmem:[%s777_s0] ss:$8 sps:$4 sm:$0xff]   ;;  %v510_v18 = vld [vmem:[%s777_s0 + $0x54] ss:$8 sps:$4 sm:$0xff]   ;;  %v512_v19 = vld [vmem:[%s777_s0 + $0x10] ss:$8 sps:$4 sm:$0xff]  }
   0x7   :  { %238 = vmatprep.subr.bf16.mxu0 %v526_v0  ;;  %467 = vmatprep.subr.bf16.mxu1 %v526_v0  ;;  %v505_v16 = vld [vmem:[%s777_s0 + $0x40] ss:$8 sps:$4 sm:$0xff]   ;;  %v513_v20 = vld [vmem:[%s777_s0 + $0x50] ss:$8 sps:$4 sm:$0xff]   ;;  %v514_v21 = vld [vmem:[%s777_s0 + $0x24] ss:$8 sps:$4 sm:$0xff]  }
   0x8   :  { %v516_v22 = vld [vmem:[%s777_s0 + $0x64] ss:$8 sps:$4 sm:$0xff]   ;;  %v518_v23 = vld [vmem:[%s777_s0 + $0x20] ss:$8 sps:$4 sm:$0xff]   ;;  %v520_v25 = vld [vmem:[%s777_s0 + $0x34] ss:$8 sps:$4 sm:$0xff]  }
   0x9   :  { %v519_v24 = vld [vmem:[%s777_s0 + $0x60] ss:$8 sps:$4 sm:$0xff]   ;;  %v522_v26 = vld [vmem:[%s777_s0 + $0x74] ss:$8 sps:$4 sm:$0xff]   ;;  %v524_v27 = vld [vmem:[%s777_s0 + $0x30] ss:$8 sps:$4 sm:$0xff]  }
   0xa   :  { %239 = vmatpush1.bf16.msra.mxu0 %v492_v3  ;;  %479 = vmatpush1.bf16.msra.mxu1 %v492_v3  ;;  %v525_v28 = vld [vmem:[%s777_s0 + $0x70] ss:$8 sps:$4 sm:$0xff]   ;;  %v676_v35 = vld [vmem:[%s778_s2] ss:$0 sm:$0xff] }
   0xb   :  { %240 = vmatprep.subr.bf16.mxu0 %v526_v0  ;;  %468 = vmatprep.subr.bf16.mxu1 %v526_v0 }
   0xe   :  { %241 = vmatpush1.bf16.msra.mxu0 %v493_v4  ;;  %480 = vmatpush1.bf16.msra.mxu1 %v493_v4 }
   0xf   :  { %242 = vmatprep.subr.bf16.mxu0 %v526_v0  ;;  %469 = vmatprep.subr.bf16.mxu1 %v526_v0 }
  0x12   :  { %243 = vmatpush1.bf16.msra.mxu0 %v494_v6  ;;  %481 = vmatpush1.bf16.msra.mxu1 %v494_v6 }
  0x13   :  { %244 = vmatprep.subr.bf16.mxu0 %v526_v0  ;;  %470 = vmatprep.subr.bf16.mxu1 %v526_v0 }
  0x16   :  { %245 = vmatpush1.bf16.msra.mxu0 %v495_v8  ;;  %482 = vmatpush1.bf16.msra.mxu1 %v495_v8 }
  0x17   :  { %246 = vmatprep.subr.bf16.mxu0 %v526_v0  ;;  %471 = vmatprep.subr.bf16.mxu1 %v526_v0 }
  0x1a   :  { %247 = vmatpush1.bf16.msra.mxu0 %v496_v9  ;;  %483 = vmatpush1.bf16.msra.mxu1 %v496_v9 }
  0x1b   :  { %248 = vmatprep.subr.bf16.mxu0 %v526_v0  ;;  %472 = vmatprep.subr.bf16.mxu1 %v526_v0 }
  0x1e   :  { %249 = vmatpush1.bf16.msra.mxu0 %v497_v10  ;;  %484 = vmatpush1.bf16.msra.mxu1 %v497_v10 }
  0x1f   :  { %250 = vmatprep.subr.bf16.mxu0 %v526_v0  ;;  %473 = vmatprep.subr.bf16.mxu1 %v526_v0 }
  0x22   :  { %251 = vmatpush1.bf16.msra.mxu0 %v498_v11  ;;  %485 = vmatpush1.bf16.msra.mxu1 %v498_v11 }
  0x23   :  { %252 = vmatprep.subr.bf16.mxu0 %v526_v0  ;;  %474 = vmatprep.subr.bf16.mxu1 %v526_v0 }
  0x26   :  { %253 = vmatpush1.bf16.msra.mxu0 %v499_v12  ;;  %486 = vmatpush1.bf16.msra.mxu1 %v499_v12 }
  0x27   :  { %254 = vmatprep.subr.bf16.mxu0 %v526_v0  ;;  %475 = vmatprep.subr.bf16.mxu1 %v526_v0 }
  0x2a   :  { %255 = vmatpush1.bf16.msra.mxu0 %v500_v13  ;;  %487 = vmatpush1.bf16.msra.mxu1 %v500_v13 }
  0x2b   :  { %256 = vmatprep.subr.bf16.mxu0 %v526_v0  ;;  %476 = vmatprep.subr.bf16.mxu1 %v526_v0 }
  0x2e   :  { %257 = vmatpush1.bf16.msra.mxu0 %v501_v14  ;;  %488 = vmatpush1.bf16.msra.mxu1 %v501_v14 }
  0x31   :  { %267 = vmatmul.mubr.bf16.vlgmr.msra.gmra.mrb[0].mxu0 %v502_v15  ;;  %299 = vmatmul.mubr.bf16.vlgmr.msra.gmra.mrb[0].mxu1 %v505_v16 }
  0x32   :  { %458 = vmatprep.mubr.msk.bf16.mxu0 %vm209_vm0, %v508_v17  ;;  %462 = vmatprep.mubr.msk.bf16.mxu1 %vm209_vm0, %v510_v18 }
  0x39   :  { %275 = vmatmul.mubr.bf16.gmra.mrb[4].mxu0 %v512_v19  ;;  %307 = vmatmul.mubr.bf16.gmra.mrb[4].mxu1 %v513_v20 }
  0x3a   :  { %459 = vmatprep.mubr.msk.bf16.mxu0 %vm209_vm0, %v514_v21  ;;  %463 = vmatprep.mubr.msk.bf16.mxu1 %vm209_vm0, %v516_v22 }
  0x41   :  { %283 = vmatmul.mubr.bf16.gmra.mrb[8].mxu0 %v518_v23  ;;  %315 = vmatmul.mubr.bf16.gmra.mrb[8].mxu1 %v519_v24 }
  0x42   :  { %460 = vmatprep.mubr.msk.bf16.mxu0 %vm209_vm0, %v520_v25  ;;  %464 = vmatprep.mubr.msk.bf16.mxu1 %vm209_vm0, %v522_v26 }
  0x49   :  { %291 = vmatmul.mubr.bf16.gmra.mrb[12].mxu0 %v524_v27  ;;  %323 = vmatmul.mubr.bf16.gmra.mrb[12].mxu1 %v525_v28 }
 0x104   :  { %v268_v29 = vpop.f32.mrb[0].mxu0  ;;  %v300_v30 = vpop.f32.mrb[0].mxu1 }
 0x105   :  { %v270_v31 = vpop.f32.mrb[1].mxu0  ;;  %v302_v32 = vpop.f32.mrb[1].mxu1  ;;  %v301_v38 = vadd.f32 %v676_v35, %v300_v30  ;;  %v269_v39 = vadd.f32 %v676_v35, %v268_v29 }
 0x106   :  { %v271_v33 = vpop.f32.mrb[2].mxu0  ;;  %v303_v34 = vpop.f32.mrb[2].mxu1 }
 0x107   :  { %v273_v36 = vpop.f32.mrb[3].mxu0  ;;  %v305_v37 = vpop.f32.mrb[3].mxu1  ;;  %v343_v42 = vsel %vm209_vm0, %v301_v38, -inf  ;;  %v331_v47 = vsel %vm209_vm0, %v269_v39, -inf  ;;  %v272_v48 = vadd.f32 %v676_v35, %v271_v33  ;;  %v304_v49 = vadd.f32 %v676_v35, %v303_v34 }
 0x109   :  { %v334_v62 = vsel %vm209_vm0, %v272_v48, -inf  ;;  %v346_v63 = vsel %vm209_vm0, %v304_v49, -inf }
 0x10c   :  { %v276_v40 = vpop.f32.mrb[4].mxu0  ;;  %v308_v41 = vpop.f32.mrb[4].mxu1 }
 0x10d   :  { %v277_v43 = vadd.f32 %v676_v35, %v276_v40  ;;  %v309_v44 = vadd.f32 %v676_v35, %v308_v41  ;;  %v278_v45 = vpop.f32.mrb[5].mxu0  ;;  %v310_v46 = vpop.f32.mrb[5].mxu1 }
 0x10e   :  { %v279_v50 = vpop.f32.mrb[6].mxu0  ;;  %v311_v51 = vpop.f32.mrb[6].mxu1 }
 0x10f   :  { %v332_v52 = vsel %vm209_vm0, %v277_v43, -inf  ;;  %v344_v53 = vsel %vm209_vm0, %v309_v44, -inf  ;;  %v280_v54 = vadd.f32 %v676_v35, %v279_v50  ;;  %v312_v55 = vadd.f32 %v676_v35, %v311_v51  ;;  %v281_v56 = vpop.f32.mrb[7].mxu0  ;;  %v313_v57 = vpop.f32.mrb[7].mxu1 }
 0x110   :  { %v333_v58 = vmax.f32 %v331_v47, %v332_v52  ;;  %v690_v59 = vmax.f32 %v343_v42, %v344_v53 }
 0x111   :  { %v335_v60 = vsel %vm209_vm0, %v280_v54, -inf  ;;  %v347_v61 = vsel %vm209_vm0, %v312_v55, -inf }
 0x112   :  { %355 = vst.msk [vmem:[%s779_s3] sm:$0xff] %vm209_vm0, %v333_v58  ;;  %359 = vst.msk [vmem:[%s779_s3 + $0x20] sm:$0xff] %vm209_vm0, %v690_v59  ;;  %v386_v0 = vmul.f32 %v333_v58, %v333_v58  ;;  %v336_v1 = vmax.f32 %v334_v62, %v335_v60  ;;  %v705_v2 = vmax.f32 %v346_v63, %v347_v61  ;;  %v363_v5 = vsel %vm209_vm0, %v333_v58, 0.0 }
 0x113   :  { %v390_v50 = vmul.f32 %v690_v59, %v690_v59  ;;  %v370_v55 = vsel %vm209_vm0, %v690_v59, 0.0 }
 0x114   :  { %v284_v3 = vpop.f32.mrb[8].mxu0  ;;  %v316_v4 = vpop.f32.mrb[8].mxu1  ;;  %356 = vst.msk [vmem:[%s779_s3 + $0x8] sm:$0xff] %vm209_vm0, %v336_v1  ;;  %v364_v6 = vsel %vm209_vm0, %v336_v1, 0.0  ;;  %v387_v7 = vmul.f32 %v336_v1, %v336_v1  ;;  %360 = vst.msk [vmem:[%s779_s3 + $0x28] sm:$0xff] %vm209_vm0, %v705_v2  ;;  %v394_v13 = vsel %vm209_vm0, %v386_v0, 0.0  ;;  %v391_v56 = vmul.f32 %v705_v2, %v705_v2 }
 0x115   :  { %v286_v8 = vpop.f32.mrb[9].mxu0  ;;  %v318_v9 = vpop.f32.mrb[9].mxu1  ;;  %v365_v10 = vadd.f32 %v364_v6, %v363_v5  ;;  %v317_v18 = vadd.f32 %v676_v35, %v316_v4  ;;  %v285_v19 = vadd.f32 %v676_v35, %v284_v3  ;;  %v401_v61 = vsel %vm209_vm0, %v390_v50, 0.0 }
 0x116   :  { %v287_v11 = vpop.f32.mrb[10].mxu0  ;;  %v319_v12 = vpop.f32.mrb[10].mxu1  ;;  %v395_v14 = vsel %vm209_vm0, %v387_v7, 0.0  ;;  %v372_v62 = vsel %vm209_vm0, %v705_v2, 0.0  ;;  %v403_v3 = vsel %vm209_vm0, %v391_v56, 0.0 }
 0x117   :  { %v289_v15 = vpop.f32.mrb[11].mxu0  ;;  %v321_v16 = vpop.f32.mrb[11].mxu1  ;;  %v396_v17 = vadd.f32 %v395_v14, %v394_v13  ;;  %v349_v22 = vsel %vm209_vm0, %v317_v18, -inf  ;;  %v337_v27 = vsel %vm209_vm0, %v285_v19, -inf  ;;  %v288_v28 = vadd.f32 %v676_v35, %v287_v11 }
 0x118   :  { %v320_v29 = vadd.f32 %v676_v35, %v319_v12 }
 0x119   :  { %v340_v43 = vsel %vm209_vm0, %v288_v28, -inf }
 0x11a   :  { %v352_v44 = vsel %vm209_vm0, %v320_v29, -inf }
 0x11c   :  { %v292_v20 = vpop.f32.mrb[12].mxu0  ;;  %v324_v21 = vpop.f32.mrb[12].mxu1 }
 0x11d   :  { %v293_v23 = vadd.f32 %v676_v35, %v292_v20  ;;  %v325_v24 = vadd.f32 %v676_v35, %v324_v21  ;;  %v294_v25 = vpop.f32.mrb[13].mxu0  ;;  %v326_v26 = vpop.f32.mrb[13].mxu1 }
 0x11e   :  { %v295_v30 = vpop.f32.mrb[14].mxu0  ;;  %v327_v31 = vpop.f32.mrb[14].mxu1 }
 0x11f   :  { %v338_v32 = vsel %vm209_vm0, %v293_v23, -inf  ;;  %v350_v33 = vsel %vm209_vm0, %v325_v24, -inf  ;;  %v296_v34 = vadd.f32 %v676_v35, %v295_v30  ;;  %v328_v36 = vadd.f32 %v676_v35, %v327_v31  ;;  %v297_v37 = vpop.f32.mrb[15].mxu0  ;;  %v329_v38 = vpop.f32.mrb[15].mxu1 }
 0x120   :  { %v339_v39 = vmax.f32 %v337_v27, %v338_v32  ;;  %v351_v40 = vmax.f32 %v349_v22, %v350_v33 }
 0x121   :  { %v341_v41 = vsel %vm209_vm0, %v296_v34, -inf  ;;  %v353_v42 = vsel %vm209_vm0, %v328_v36, -inf }
 0x122   :  { %357 = vst.msk [vmem:[%s779_s3 + $0x10] sm:$0xff] %vm209_vm0, %v339_v39  ;;  %v366_v45 = vsel %vm209_vm0, %v339_v39, 0.0  ;;  %v388_v35 = vmul.f32 %v339_v39, %v339_v39  ;;  %361 = vst.msk [vmem:[%s779_s3 + $0x30] sm:$0xff] %vm209_vm0, %v351_v40  ;;  %v342_v47 = vmax.f32 %v340_v43, %v341_v41  ;;  %v354_v48 = vmax.f32 %v352_v44, %v353_v42 }
 0x123   :  { %v367_v46 = vadd.f32 %v366_v45, %v365_v10  ;;  %v392_v63 = vmul.f32 %v351_v40, %v351_v40  ;;  %v374_v4 = vsel %vm209_vm0, %v351_v40, 0.0 }
 0x124   :  { %v397_v49 = vsel %vm209_vm0, %v388_v35, 0.0  ;;  %358 = vst.msk [vmem:[%s779_s3 + $0x18] sm:$0xff] %vm209_vm0, %v342_v47  ;;  %v368_v52 = vsel %vm209_vm0, %v342_v47, 0.0  ;;  %v389_v53 = vmul.f32 %v342_v47, %v342_v47  ;;  %362 = vst.msk [vmem:[%s779_s3 + $0x38] sm:$0xff] %vm209_vm0, %v354_v48  ;;  %v393_v59 = vmul.f32 %v354_v48, %v354_v48 }
 0x125   :  { %v398_v51 = vadd.f32 %v397_v49, %v396_v17  ;;  %v369_v54 = vadd.f32 %v368_v52, %v367_v46  ;;  %v405_v7 = vsel %vm209_vm0, %v392_v63, 0.0  ;;  %v376_v8 = vsel %vm209_vm0, %v354_v48, 0.0 }
 0x126   :  { %v399_v57 = vsel %vm209_vm0, %v389_v53, 0.0  ;;  %v407_v11 = vsel %vm209_vm0, %v393_v59, 0.0 }
 0x127   :  { %v371_v58 = vadd.f32 %v370_v55, %v369_v54  ;;  %v400_v60 = vadd.f32 %v399_v57, %v398_v51 }
 0x129   :  { %v402_v0 = vadd.f32 %v401_v61, %v400_v60  ;;  %v373_v1 = vadd.f32 %v372_v62, %v371_v58 }
 0x12b   :  { %v375_v5 = vadd.f32 %v374_v4, %v373_v1  ;;  %v404_v6 = vadd.f32 %v403_v3, %v402_v0 }
 0x12d   :  { %v377_v9 = vadd.f32 %v376_v8, %v375_v5  ;;  %v406_v10 = vadd.f32 %v405_v7, %v404_v6 }
 0x12f   :  { %v378_v12 = vrot.slane %v377_v9, 4  ;;  %v408_v2 = vadd.f32 %v407_v11, %v406_v10 }
 0x131   :  { %v379_v13 = vadd.f32 %v378_v12, %v377_v9  ;;  %v409_v14 = vrot.slane %v408_v2, 4 }
 0x133   :  { %v380_v15 = vrot.slane %v379_v13, 2  ;;  %v410_v16 = vadd.f32 %v409_v14, %v408_v2 }
 0x135   :  { %v381_v17 = vadd.f32 %v380_v15, %v379_v13  ;;  %v411_v18 = vrot.slane %v410_v16, 2 }
 0x137   :  { %v382_v19 = vrot.slane %v381_v17, 1  ;;  %v412_v20 = vadd.f32 %v411_v18, %v410_v16 }
 0x139   :  { %v383_v21 = vadd.f32 %v382_v19, %v381_v17  ;;  %v413_v22 = vrot.slane %v412_v20, 1 }
 0x13b   :  { %385 = vst.msk [vmem:[%s780_s4] sm:$0x1] %vm384_vm1, %v383_v21  ;;  %v414_v23 = vadd.f32 %v413_v22, %v412_v20 }
 0x13d   :  { %415 = vst.msk [vmem:[%s781_s5] sm:$0x1] %vm384_vm1, %v414_v23 }

// kernel: cnn25d_forward.17
= control target key start
LH: loop header
LB: loop body
LE: loop exit
PB: predicated region body
PF: predicated region fallthrough
CT: control target
= control target key end

     0   :  { %s82_s0 = inlined_call_operand.vmem [shape: f32[16,128], index: 0, kind: input, shape index: {}]   ;;  %s83_s1 = inlined_call_operand.vmem [shape: f32[1,128], index: 1, kind: input, shape index: {}]   ;;  %s84_s2 = inlined_call_operand.vmem [shape: f32[1,128], index: 2, kind: input, shape index: {}]   ;;  %s85_s3 = inlined_call_operand.vmem [shape: f32[16,128], index: 3, kind: output, shape index: {}]  }
   0x1   :  { %v14_v0 = vld [vmem:[%s82_s0] sm:$0xff]  ;;  %v15_v4 = vld [vmem:[%s82_s0 + $0x8] sm:$0xff] }
   0x2   :  { %v42_v1 = vld [vmem:[%s83_s1] ss:$0 sm:$0xff] }
   0x3   :  { %v43_v2 = vld [vmem:[%s84_s2] ss:$0 sm:$0xff]  ;;  %v23_v3 = vmul.f32 %v42_v1, %v14_v0  ;;  %v24_v5 = vmul.f32 %v42_v1, %v15_v4 }
   0x5   :  { %v32_v6 = vadd.f32 %v43_v2, %v23_v3  ;;  %v33_v7 = vadd.f32 %v43_v2, %v24_v5 }
   0x7   :  { %v34_v8 = vmax.f32 %v32_v6, 0.0  ;;  %v35_v9 = vmax.f32 %v33_v7, 0.0 }
   0x9   :  { %36 = vst [vmem:[%s85_s3] sm:$0xff] %v34_v8  ;;  %37 = vst [vmem:[%s85_s3 + $0x8] sm:$0xff] %v35_v9 }

// kernel: cnn25d_forward.16
= control target key start
LH: loop header
LB: loop body
LE: loop exit
PB: predicated region body
PF: predicated region fallthrough
CT: control target
= control target key end

     0   :  { %v652_v33 = vmov 0.0   ;;  %vm653_vm0 = vmmov 0   ;;  %vm344_vm1 = vcmask 523264   ;;  %s822_s1 = inlined_call_operand.vmem [shape: bf16[576,128], index: 1, kind: input, shape index: {}]   ;;  %s823_s0 = inlined_call_operand.vmem [shape: bf16[16,576], index: 0, kind: input, shape index: {}]   ;;  %s824_s2 = inlined_call_operand.vmem [shape: f32[1,128], index: 2, kind: input, shape index: {}]   ;;  %s825_s3 = inlined_call_operand.vmem [shape: f32[16,128], index: 3, kind: output, shape index: {0}]   ;;  %s826_s4 = inlined_call_operand.vmem [shape: f32[1,1,128], index: 4, kind: output, shape index: {1}]   ;;  %s827_s5 = inlined_call_operand.vmem [shape: f32[1,1,128], index: 5, kind: output, shape index: {2}]  }
   0x1   :  { %v609_v0 = vld [vmem:[%s822_s1 + $0x40] sm:$0xff]   ;;  %v613_v4 = vld [vmem:[%s822_s1 + $0x48] sm:$0xff]   ;;  %v617_v8 = vld [vmem:[%s822_s1 + $0x50] sm:$0xff]  }
   0x2   :  { %v610_v1 = vld [vmem:[%s822_s1] sm:$0xff]   ;;  %546 = vmatprep.subr.bf16.mxu0 %v609_v0  ;;  %v614_v5 = vld [vmem:[%s822_s1 + $0x8] sm:$0xff]   ;;  %v618_v9 = vld [vmem:[%s822_s1 + $0x10] sm:$0xff]  }
   0x3   :  { %v611_v2 = vld [vmem:[%s822_s1 + $0xc0] sm:$0xff]   ;;  %547 = vmatpush3.bf16.msra.mxu0 %v610_v1  ;;  %v615_v6 = vld [vmem:[%s822_s1 + $0xc8] sm:$0xff]   ;;  %v619_v10 = vld [vmem:[%s822_s1 + $0xd0] sm:$0xff]  }
   0x4   :  { %v612_v3 = vld [vmem:[%s822_s1 + $0x80] sm:$0xff]   ;;  %568 = vmatprep.subr.bf16.mxu1 %v611_v2  ;;  %548 = vmatprep.subr.bf16.mxu0 %v613_v4  ;;  %v616_v7 = vld [vmem:[%s822_s1 + $0x88] sm:$0xff]   ;;  %v620_v11 = vld [vmem:[%s822_s1 + $0x90] sm:$0xff]  }
   0x5   :  { %569 = vmatpush3.bf16.msra.mxu1 %v612_v3  ;;  %v621_v12 = vld [vmem:[%s822_s1 + $0x58] sm:$0xff]   ;;  %v625_v16 = vld [vmem:[%s822_s1 + $0x60] sm:$0xff]   ;;  %v629_v20 = vld [vmem:[%s822_s1 + $0x68] sm:$0xff]  }
   0x6   :  { %570 = vmatprep.subr.bf16.mxu1 %v615_v6  ;;  %v622_v13 = vld [vmem:[%s822_s1 + $0x18] sm:$0xff]   ;;  %v626_v17 = vld [vmem:[%s822_s1 + $0x20] sm:$0xff]   ;;  %v630_v21 = vld [vmem:[%s822_s1 + $0x28] sm:$0xff]  }
   0x7   :  { %549 = vmatpush3.bf16.msra.mxu0 %v614_v5  ;;  %v623_v14 = vld [vmem:[%s822_s1 + $0xd8] sm:$0xff]   ;;  %v627_v18 = vld [vmem:[%s822_s1 + $0xe0] sm:$0xff]   ;;  %v631_v22 = vld [vmem:[%s822_s1 + $0xe8] sm:$0xff]  }
   0x8   :  { %550 = vmatprep.subr.bf16.mxu0 %v617_v8  ;;  %v624_v15 = vld [vmem:[%s822_s1 + $0x98] sm:$0xff]   ;;  %v628_v19 = vld [vmem:[%s822_s1 + $0xa0] sm:$0xff]   ;;  %v632_v23 = vld [vmem:[%s822_s1 + $0xa8] sm:$0xff]  }
   0x9   :  { %571 = vmatpush3.bf16.msra.mxu1 %v616_v7  ;;  %v633_v24 = vld [vmem:[%s822_s1 + $0x70] sm:$0xff]   ;;  %v637_v28 = vld [vmem:[%s822_s1 + $0x78] sm:$0xff]   ;;  %v646_v36 = vld [vmem:[%s823_s0 + $0xc] ss:$20 sps:$4 sm:$0xff]  }
   0xa   :  { %572 = vmatprep.subr.bf16.mxu1 %v619_v10  ;;  %v634_v25 = vld [vmem:[%s822_s1 + $0x30] sm:$0xff]   ;;  %v638_v29 = vld [vmem:[%s822_s1 + $0x38] sm:$0xff]   ;;  %v647_v37 = vld [vmem:[%s822_s1 + $0x100] sm:$0xff]   ;;  %421 = vmatprep.mubr.bf16.mxu1 %v646_v36 }
   0xb   :  { %551 = vmatpush3.bf16.msra.mxu0 %v618_v9  ;;  %v635_v26 = vld [vmem:[%s822_s1 + $0xf0] sm:$0xff]   ;;  %v639_v30 = vld [vmem:[%s822_s1 + $0xf8] sm:$0xff]   ;;  %v648_v38 = vld [vmem:[%s822_s1 + $0x108] sm:$0xff]  }
   0xc   :  { %552 = vmatprep.subr.bf16.mxu0 %v621_v12  ;;  %v636_v27 = vld [vmem:[%s822_s1 + $0xb0] sm:$0xff]   ;;  %v642_v32 = vld [vmem:[%s823_s0 + $0x4] ss:$20 sps:$4 sm:$0xff]   ;;  %v644_v35 = vld [vmem:[%s823_s0 + $0x8] ss:$20 sps:$4 sm:$0xff]  }
   0xd   :  { %573 = vmatpush3.bf16.msra.mxu1 %v620_v11  ;;  %v640_v31 = vld [vmem:[%s823_s0] ss:$20 sps:$4 sm:$0xff]   ;;  %v643_v34 = vld [vmem:[%s822_s1 + $0xb8] sm:$0xff]   ;;  %380 = vmatprep.mubr.bf16.mxu0 %v642_v32  ;;  %v651_v41 = vld [vmem:[%s823_s0 + $0x10] ss:$20 sps:$4 sm:$0xff]  }
   0xe   :  { %574 = vmatprep.subr.bf16.mxu1 %v623_v14  ;;  %v649_v39 = vld [vmem:[%s822_s1 + $0x110] sm:$0xff]   ;;  %v650_v40 = vld [vmem:[%s822_s1 + $0x118] sm:$0xff]   ;;  %v503_v43 = vld [vmem:[%s824_s2] ss:$0 sm:$0xff] }
   0xf   :  { %553 = vmatpush3.bf16.msra.mxu0 %v622_v13 }
  0x10   :  { %554 = vmatprep.subr.bf16.mxu0 %v625_v16 }
  0x11   :  { %575 = vmatpush3.bf16.msra.mxu1 %v624_v15 }
  0x12   :  { %576 = vmatprep.subr.bf16.mxu1 %v627_v18 }
  0x13   :  { %555 = vmatpush3.bf16.msra.mxu0 %v626_v17 }
  0x14   :  { %556 = vmatprep.subr.bf16.mxu0 %v629_v20 }
  0x15   :  { %577 = vmatpush3.bf16.msra.mxu1 %v628_v19 }
  0x16   :  { %578 = vmatprep.subr.bf16.mxu1 %v631_v22 }
  0x17   :  { %557 = vmatpush3.bf16.msra.mxu0 %v630_v21 }
  0x18   :  { %558 = vmatprep.subr.bf16.mxu0 %v633_v24 }
  0x19   :  { %579 = vmatpush3.bf16.msra.mxu1 %v632_v23 }
  0x1a   :  { %580 = vmatprep.subr.bf16.mxu1 %v635_v26 }
  0x1b   :  { %559 = vmatpush3.bf16.msra.mxu0 %v634_v25 }
  0x1c   :  { %560 = vmatprep.subr.bf16.mxu0 %v637_v28 }
  0x1d   :  { %581 = vmatpush3.bf16.msra.mxu1 %v636_v27 }
  0x1e   :  { %582 = vmatprep.subr.bf16.mxu1 %v639_v30 }
  0x1f   :  { %561 = vmatpush3.bf16.msra.mxu0 %v638_v29 }
  0x20   :  { %595 = vmatprep.subr.bf16.mxu0 %v652_v33 }
  0x21   :  { %583 = vmatpush3.bf16.msra.mxu1 %v643_v34 }
  0x22   :  { %381 = vmatmul.mubr.bf16.vlgmr.msra.gmra.mrb[0].mxu0 %v640_v31 }
  0x23   :  { %603 = vmatprep.mubr.msk.bf16.mxu0 %vm653_vm0, %v652_v33  ;;  %596 = vmatpush3.bf16.msra.mxu0 %v647_v37 }
  0x24   :  { %422 = vmatmul.mubr.bf16.vlgmr.msra.gmra.mrb[0].mxu1 %v644_v35  ;;  %597 = vmatprep.subr.bf16.mxu0 %v652_v33 }
  0x27   :  { %598 = vmatpush3.bf16.msra.mxu0 %v648_v38 }
  0x28   :  { %599 = vmatprep.subr.bf16.mxu0 %v652_v33 }
  0x2b   :  { %600 = vmatpush3.bf16.msra.mxu0 %v649_v39 }
  0x2c   :  { %601 = vmatprep.subr.bf16.mxu0 %v652_v33 }
  0x2f   :  { %602 = vmatpush3.bf16.msra.mxu0 %v650_v40 }
  0x32   :  { %604 = vmatmul.mubr.msk.bf16.vlgmr.msra.gmra.mrb[4].mxu0 %vm344_vm1, %v651_v41 }
  0xf5   :  { %v562_v42 = vpop.f32.mrb[0].mxu0 }
  0xf6   :  { %v563_v44 = vpop.f32.mrb[1].mxu0 }
  0xf7   :  { %v564_v45 = vadd.f32 %v563_v44, %v562_v42  ;;  %v565_v46 = vpop.f32.mrb[2].mxu0  ;;  %v584_v47 = vpop.f32.mrb[0].mxu1 }
  0xf8   :  { %v566_v48 = vpop.f32.mrb[3].mxu0  ;;  %v585_v51 = vpop.f32.mrb[1].mxu1 }
  0xf9   :  { %v383_v49 = vadd.f32 %v564_v45, %v503_v43  ;;  %v567_v50 = vadd.f32 %v566_v48, %v565_v46  ;;  %v586_v52 = vadd.f32 %v585_v51, %v584_v47  ;;  %v587_v53 = vpop.f32.mrb[2].mxu1 }
  0xfa   :  { %v588_v55 = vpop.f32.mrb[3].mxu1 }
  0xfb   :  { %v386_v54 = vadd.f32 %v567_v50, %v503_v43  ;;  %v589_v56 = vadd.f32 %v588_v55, %v587_v53  ;;  %v424_v57 = vadd.f32 %v586_v52, %v383_v49 }
  0xfd   :  { %v427_v58 = vadd.f32 %v589_v56, %v386_v54 }
 0x105   :  { %v464_v59 = vpop.f32.mrb[4].mxu0 }
 0x106   :  { %v465_v60 = vadd.f32 %v464_v59, %v424_v57  ;;  %v605_v61 = vpop.f32.mrb[5].mxu0 }
 0x107   :  { %v467_v62 = vpop.f32.mrb[6].mxu0 }
 0x108   :  { %471 = vst [vmem:[%s825_s3] sm:$0xff] %v465_v60  ;;  %v468_v63 = vadd.f32 %v467_v62, %v427_v58  ;;  %v606_v0 = vpop.f32.mrb[7].mxu0  ;;  %v481_v1 = vmul.f32 %v465_v60, %v465_v60 }
 0x10a   :  { %472 = vst [vmem:[%s825_s3 + $0x8] sm:$0xff] %v468_v63  ;;  %v473_v2 = vadd.f32 %v468_v63, %v465_v60  ;;  %v482_v3 = vmul.f32 %v468_v63, %v468_v63 }
 0x10c   :  { %v474_v4 = vrot.slane %v473_v2, 4  ;;  %v483_v5 = vadd.f32 %v482_v3, %v481_v1 }
 0x10e   :  { %v475_v6 = vadd.f32 %v474_v4, %v473_v2  ;;  %v484_v7 = vrot.slane %v483_v5, 4 }
 0x110   :  { %v476_v8 = vrot.slane %v475_v6, 2  ;;  %v485_v9 = vadd.f32 %v484_v7, %v483_v5 }
 0x112   :  { %v477_v10 = vadd.f32 %v476_v8, %v475_v6  ;;  %v486_v11 = vrot.slane %v485_v9, 2 }
 0x114   :  { %v478_v12 = vrot.slane %v477_v10, 1  ;;  %v487_v13 = vadd.f32 %v486_v11, %v485_v9 }
 0x116   :  { %v479_v14 = vadd.f32 %v478_v12, %v477_v10  ;;  %v488_v15 = vrot.slane %v487_v13, 1 }
 0x118   :  { %480 = vst [vmem:[%s826_s4] sm:$0x1] %v479_v14  ;;  %v489_v16 = vadd.f32 %v488_v15, %v487_v13 }
 0x11a   :  { %490 = vst [vmem:[%s827_s5] sm:$0x1] %v489_v16 }

// kernel: cnn25d_forward.19
= control target key start
LH: loop header
LB: loop body
LE: loop exit
PB: predicated region body
PF: predicated region fallthrough
CT: control target
= control target key end

     0   :  { %v17_v0 = vlaneseq  ;;  %s79_s1 = inlined_call_operand.vmem [shape: f32[1,256], index: 1, kind: input, shape index: {}]   ;;  %s80_s2 = inlined_call_operand.vmem [shape: f32[1,256], index: 2, kind: input, shape index: {}]   ;;  %s81_s0 = inlined_call_operand.vmem [shape: f32[4,256], index: 0, kind: input, shape index: {}]   ;;  %s82_s3 = inlined_call_operand.vmem [shape: f32[4,256], index: 3, kind: output, shape index: {}]  }
   0x1   :  { %v15_v2 = vld [vmem:[%s79_s1] sm:$0x3] }
   0x2   :  { %v18_v1 = vshrl.u32 %v17_v0, 7  ;;  %v28_v3 = vld [vmem:[%s80_s2] sm:$0x3] }
   0x3   :  { %v14_v10 = vld [vmem:[%s81_s0] sm:$0xff] }
   0x4   :  { %v19_v4 = vsub.s32 0, %v18_v1  ;;  %v23_v5 = vsub.s32 1, %v18_v1 }
   0x6   :  { %v20_v6 = vrot.slane %v15_v2, %v19_v4  ;;  %v24_v7 = vrot.slane %v15_v2, %v23_v5  ;;  %v33_v8 = vrot.slane %v28_v3, %v19_v4  ;;  %v37_v9 = vrot.slane %v28_v3, %v23_v5 }
   0x8   :  { %v25_v11 = vcombine.low %v20_v6, %v24_v7  ;;  %v38_v12 = vcombine.low %v33_v8, %v37_v9 }
   0xa   :  { %v27_v13 = vmul.f32 %v25_v11, %v14_v10 }
   0xc   :  { %v40_v14 = vadd.f32 %v38_v12, %v27_v13 }
   0xe   :  { %v41_v15 = vmax.f32 %v40_v14, 0.0 }
  0x10   :  { %42 = vst [vmem:[%s82_s3] sm:$0xff] %v41_v15 }

// kernel: cnn25d_forward.18
= control target key start
LH: loop header
LB: loop body
LE: loop exit
PB: predicated region body
PF: predicated region fallthrough
CT: control target
= control target key end

     0   :  { %v167_v36 = vlaneseq  ;;  %v1627_v37 = vmov 1983009808   ;;  %vm1160_vm0 = vcmask 1043456   ;;  %s2135_s1 = inlined_call_operand.vmem [shape: bf16[1152,256], index: 1, kind: input, shape index: {}]   ;;  %s2136_s0 = inlined_call_operand.vmem [shape: bf16[4,1152], index: 0, kind: input, shape index: {}]   ;;  %s2137_s2 = inlined_call_operand.vmem [shape: f32[1,256], index: 2, kind: input, shape index: {}]   ;;  %s2138_s3 = inlined_call_operand.vmem [shape: f32[4,256], index: 3, kind: output, shape index: {0}]   ;;  %s2139_s4 = inlined_call_operand.vmem [shape: f32[1,1,256], index: 4, kind: output, shape index: {1}]   ;;  %s2140_s5 = inlined_call_operand.vmem [shape: f32[1,1,256], index: 5, kind: output, shape index: {2}]  }
   0x1   :  { %v1409_v0 = vld [vmem:[%s2135_s1 + $0x4] ss:$8 sps:$4 sm:$0xff]   ;;  %v1413_v2 = vld [vmem:[%s2135_s1] ss:$8 sps:$4 sm:$0xff]   ;;  %v1415_v4 = vld [vmem:[%s2135_s1 + $0x14] ss:$8 sps:$4 sm:$0xff]   ;;  %v182_v38 = vunpack.c.l.s4 %v1627_v37 }
   0x2   :  { %v1411_v1 = vld [vmem:[%s2135_s1 + $0x204] ss:$8 sps:$4 sm:$0xff]   ;;  %950 = vmatprep.subr.bf16.mxu1 %v1409_v0  ;;  %v1414_v3 = vld [vmem:[%s2135_s1 + $0x200] ss:$8 sps:$4 sm:$0xff]   ;;  %v1417_v5 = vld [vmem:[%s2135_s1 + $0x214] ss:$8 sps:$4 sm:$0xff]  }
   0x3   :  { %1032 = vmatprep.subr.bf16.mxu0 %v1411_v1  ;;  %951 = vmatpush1.bf16.msra.mxu1 %v1413_v2  ;;  %v1419_v6 = vld [vmem:[%s2135_s1 + $0x10] ss:$8 sps:$4 sm:$0xff]   ;;  %v1421_v8 = vld [vmem:[%s2135_s1 + $0x24] ss:$8 sps:$4 sm:$0xff]   ;;  %v1425_v10 = vld [vmem:[%s2135_s1 + $0x20] ss:$8 sps:$4 sm:$0xff]   ;;  %v183_v43 = vunpack.c.0.s8 %v182_v38 }
   0x4   :  { %1033 = vmatpush1.bf16.msra.mxu0 %v1414_v3  ;;  %952 = vmatprep.subr.bf16.mxu1 %v1415_v4  ;;  %v1420_v7 = vld [vmem:[%s2135_s1 + $0x210] ss:$8 sps:$4 sm:$0xff]   ;;  %v1423_v9 = vld [vmem:[%s2135_s1 + $0x224] ss:$8 sps:$4 sm:$0xff]   ;;  %v1426_v11 = vld [vmem:[%s2135_s1 + $0x220] ss:$8 sps:$4 sm:$0xff]  }
   0x5   :  { %1034 = vmatprep.subr.bf16.mxu0 %v1417_v5  ;;  %v1427_v12 = vld [vmem:[%s2135_s1 + $0x34] ss:$8 sps:$4 sm:$0xff]   ;;  %v1431_v14 = vld [vmem:[%s2135_s1 + $0x30] ss:$8 sps:$4 sm:$0xff]   ;;  %v1433_v16 = vld [vmem:[%s2135_s1 + $0x44] ss:$8 sps:$4 sm:$0xff]  }
   0x6   :  { %v1429_v13 = vld [vmem:[%s2135_s1 + $0x234] ss:$8 sps:$4 sm:$0xff]   ;;  %v1432_v15 = vld [vmem:[%s2135_s1 + $0x230] ss:$8 sps:$4 sm:$0xff]   ;;  %v1435_v17 = vld [vmem:[%s2135_s1 + $0x244] ss:$8 sps:$4 sm:$0xff]  }
   0x7   :  { %953 = vmatpush1.bf16.msra.mxu1 %v1419_v6  ;;  %v1437_v18 = vld [vmem:[%s2135_s1 + $0x40] ss:$8 sps:$4 sm:$0xff]   ;;  %v1439_v20 = vld [vmem:[%s2135_s1 + $0x54] ss:$8 sps:$4 sm:$0xff]   ;;  %v1443_v22 = vld [vmem:[%s2135_s1 + $0x50] ss:$8 sps:$4 sm:$0xff]  }
   0x8   :  { %1035 = vmatpush1.bf16.msra.mxu0 %v1420_v7  ;;  %954 = vmatprep.subr.bf16.mxu1 %v1421_v8  ;;  %v1438_v19 = vld [vmem:[%s2135_s1 + $0x240] ss:$8 sps:$4 sm:$0xff]   ;;  %v1441_v21 = vld [vmem:[%s2135_s1 + $0x254] ss:$8 sps:$4 sm:$0xff]   ;;  %v1444_v23 = vld [vmem:[%s2135_s1 + $0x250] ss:$8 sps:$4 sm:$0xff]  }
   0x9   :  { %1036 = vmatprep.subr.bf16.mxu0 %v1423_v9  ;;  %v1445_v24 = vld [vmem:[%s2135_s1 + $0x64] ss:$8 sps:$4 sm:$0xff]   ;;  %v1449_v26 = vld [vmem:[%s2135_s1 + $0x60] ss:$8 sps:$4 sm:$0xff]   ;;  %v1451_v28 = vld [vmem:[%s2135_s1 + $0x74] ss:$8 sps:$4 sm:$0xff]  }
   0xa   :  { %v1447_v25 = vld [vmem:[%s2135_s1 + $0x264] ss:$8 sps:$4 sm:$0xff]   ;;  %v1450_v27 = vld [vmem:[%s2135_s1 + $0x260] ss:$8 sps:$4 sm:$0xff]   ;;  %v1453_v29 = vld [vmem:[%s2135_s1 + $0x274] ss:$8 sps:$4 sm:$0xff]  }
   0xb   :  { %955 = vmatpush1.bf16.msra.mxu1 %v1425_v10  ;;  %v1455_v30 = vld [vmem:[%s2135_s1 + $0x70] ss:$8 sps:$4 sm:$0xff]   ;;  %v1457_v32 = vld [vmem:[%s2135_s1 + $0x84] ss:$8 sps:$4 sm:$0xff]   ;;  %v1461_v34 = vld [vmem:[%s2135_s1 + $0x80] ss:$8 sps:$4 sm:$0xff]  }
   0xc   :  { %1037 = vmatpush1.bf16.msra.mxu0 %v1426_v11  ;;  %956 = vmatprep.subr.bf16.mxu1 %v1427_v12  ;;  %v1456_v31 = vld [vmem:[%s2135_s1 + $0x270] ss:$8 sps:$4 sm:$0xff]   ;;  %v1459_v33 = vld [vmem:[%s2135_s1 + $0x284] ss:$8 sps:$4 sm:$0xff]   ;;  %v1462_v35 = vld [vmem:[%s2135_s1 + $0x280] ss:$8 sps:$4 sm:$0xff]  }
   0xd   :  { %1038 = vmatprep.subr.bf16.mxu0 %v1429_v13  ;;  %v1463_v39 = vld [vmem:[%s2135_s1 + $0x94] ss:$8 sps:$4 sm:$0xff]   ;;  %v1467_v41 = vld [vmem:[%s2135_s1 + $0x90] ss:$8 sps:$4 sm:$0xff]   ;;  %v1778_v42 = vshrl.u32 %v167_v36, 7  ;;  %v18_v52 = vld [vmem:[%s2136_s0] sm:$0xff] }
   0xe   :  { %v1465_v40 = vld [vmem:[%s2135_s1 + $0x294] ss:$8 sps:$4 sm:$0xff]   ;;  %v1468_v44 = vld [vmem:[%s2135_s1 + $0x290] ss:$8 sps:$4 sm:$0xff]   ;;  %v1469_v45 = vld [vmem:[%s2135_s1 + $0xa4] ss:$8 sps:$4 sm:$0xff]   ;;  %v180_v10 = vcombine.high %v18_v52, %v18_v52 }
   0xf   :  { %957 = vmatpush1.bf16.msra.mxu1 %v1431_v14  ;;  %v1471_v46 = vld [vmem:[%s2135_s1 + $0x2a4] ss:$8 sps:$4 sm:$0xff]   ;;  %v1473_v47 = vld [vmem:[%s2135_s1 + $0xa0] ss:$8 sps:$4 sm:$0xff]   ;;  %v186_v49 = vsub.s32 %v183_v43, %v1778_v42  ;;  %v1475_v50 = vld [vmem:[%s2135_s1 + $0xb4] ss:$8 sps:$4 sm:$0xff]  }
  0x10   :  { %1039 = vmatpush1.bf16.msra.mxu0 %v1432_v15  ;;  %958 = vmatprep.subr.bf16.mxu1 %v1433_v16  ;;  %v1474_v48 = vld [vmem:[%s2135_s1 + $0x2a0] ss:$8 sps:$4 sm:$0xff]   ;;  %v1477_v51 = vld [vmem:[%s2135_s1 + $0x2b4] ss:$8 sps:$4 sm:$0xff]   ;;  %v1479_v53 = vld [vmem:[%s2135_s1 + $0xb0] ss:$8 sps:$4 sm:$0xff]  }
  0x11   :  { %1040 = vmatprep.subr.bf16.mxu0 %v1435_v17  ;;  %v187_v54 = vrot.slane %v18_v52, %v186_v49  ;;  %v1480_v55 = vld [vmem:[%s2135_s1 + $0x2b0] ss:$8 sps:$4 sm:$0xff]   ;;  %v19_v56 = vld [vmem:[%s2136_s0 + $0x8] sm:$0xff]  ;;  %v1487_v0 = vld [vmem:[%s2135_s1 + $0xd4] ss:$8 sps:$4 sm:$0xff]   ;;  %v1868_v16 = vrot.slane %v180_v10, %v186_v49  ;;  %vm1195_vm1 = vcmp.lt.s32.totalorder %v167_v36, 256 }
  0x12   :  { %v1481_v57 = vld [vmem:[%s2135_s1 + $0xc4] ss:$8 sps:$4 sm:$0xff]   ;;  %v204_v60 = vrot.slane %v19_v56, %v186_v49  ;;  %v1485_v62 = vld [vmem:[%s2135_s1 + $0xc0] ss:$8 sps:$4 sm:$0xff]   ;;  %v1489_v1 = vld [vmem:[%s2135_s1 + $0x2d4] ss:$8 sps:$4 sm:$0xff]   ;;  %v197_v11 = vcombine.high %v19_v56, %v19_v56 }
  0x13   :  { %959 = vmatpush1.bf16.msra.mxu1 %v1437_v18  ;;  %v1483_v58 = vld [vmem:[%s2135_s1 + $0x2c4] ss:$8 sps:$4 sm:$0xff]   ;;  %v195_v59 = vcombine.high %v187_v54, %v187_v54  ;;  %v1486_v63 = vld [vmem:[%s2135_s1 + $0x2c0] ss:$8 sps:$4 sm:$0xff]   ;;  %v1491_v2 = vld [vmem:[%s2135_s1 + $0xd0] ss:$8 sps:$4 sm:$0xff]  }
  0x14   :  { %1041 = vmatpush1.bf16.msra.mxu0 %v1438_v19  ;;  %960 = vmatprep.subr.bf16.mxu1 %v1439_v20  ;;  %v212_v61 = vcombine.high %v204_v60, %v204_v60  ;;  %v1492_v3 = vld [vmem:[%s2135_s1 + $0x2d0] ss:$8 sps:$4 sm:$0xff]   ;;  %v1493_v4 = vld [vmem:[%s2135_s1 + $0xe4] ss:$8 sps:$4 sm:$0xff]   ;;  %v1497_v6 = vld [vmem:[%s2135_s1 + $0xe0] ss:$8 sps:$4 sm:$0xff]   ;;  %v1870_v17 = vrot.slane %v197_v11, %v186_v49 }
  0x15   :  { %1042 = vmatprep.subr.bf16.mxu0 %v1441_v21  ;;  %982 = vmatprep.mubr.bf16.mxu1 %v195_v59  ;;  %v1495_v5 = vld [vmem:[%s2135_s1 + $0x2e4] ss:$8 sps:$4 sm:$0xff]   ;;  %v1498_v7 = vld [vmem:[%s2135_s1 + $0x2e0] ss:$8 sps:$4 sm:$0xff]   ;;  %v1499_v8 = vld [vmem:[%s2135_s1 + $0xf4] ss:$8 sps:$4 sm:$0xff]  }
  0x16   :  { %1064 = vmatprep.mubr.bf16.mxu0 %v212_v61  ;;  %v1501_v9 = vld [vmem:[%s2135_s1 + $0x2f4] ss:$8 sps:$4 sm:$0xff]   ;;  %v1503_v12 = vld [vmem:[%s2135_s1 + $0xf0] ss:$8 sps:$4 sm:$0xff]   ;;  %v1508_v14 = vld [vmem:[%s2135_s1 + $0x104] ss:$8 sps:$4 sm:$0xff]  }
  0x17   :  { %961 = vmatpush1.bf16.msra.mxu1 %v1443_v22  ;;  %v1504_v13 = vld [vmem:[%s2135_s1 + $0x2f0] ss:$8 sps:$4 sm:$0xff]   ;;  %v1512_v15 = vld [vmem:[%s2135_s1 + $0x304] ss:$8 sps:$4 sm:$0xff]   ;;  %v1506_v18 = vld [vmem:[%s2135_s1 + $0x100] ss:$8 sps:$4 sm:$0xff]   ;;  %v196_v22 = vcombine.high %v1868_v16, %v1868_v16 }
  0x18   :  { %1043 = vmatpush1.bf16.msra.mxu0 %v1444_v23  ;;  %962 = vmatprep.subr.bf16.mxu1 %v1445_v24  ;;  %v1510_v19 = vld [vmem:[%s2135_s1 + $0x300] ss:$8 sps:$4 sm:$0xff]   ;;  %v1515_v20 = vld [vmem:[%s2135_s1 + $0x114] ss:$8 sps:$4 sm:$0xff]   ;;  %v213_v23 = vcombine.high %v1870_v17, %v1870_v17  ;;  %v1513_v24 = vld [vmem:[%s2135_s1 + $0x110] ss:$8 sps:$4 sm:$0xff]  }
  0x19   :  { %1044 = vmatprep.subr.bf16.mxu0 %v1447_v25  ;;  %v1518_v21 = vld [vmem:[%s2135_s1 + $0x314] ss:$8 sps:$4 sm:$0xff]   ;;  %v1516_v25 = vld [vmem:[%s2135_s1 + $0x310] ss:$8 sps:$4 sm:$0xff]   ;;  %v1531_v37 = vld [vmem:[%s2135_s1 + $0x140] ss:$8 sps:$4 sm:$0xff]  }
  0x1a   :  { %v1534_v38 = vld [vmem:[%s2135_s1 + $0x340] ss:$8 sps:$4 sm:$0xff]   ;;  %v1540_v43 = vld [vmem:[%s2135_s1 + $0x350] ss:$8 sps:$4 sm:$0xff]   ;;  %v1554_v49 = vld [vmem:[%s2135_s1 + $0x374] ss:$8 sps:$4 sm:$0xff]  }
  0x1b   :  { %963 = vmatpush1.bf16.msra.mxu1 %v1449_v26  ;;  %v1521_v26 = vld [vmem:[%s2135_s1 + $0x124] ss:$8 sps:$4 sm:$0xff]   ;;  %v1563_v56 = vld [vmem:[%s2135_s1 + $0x194] ss:$8 sps:$4 sm:$0xff]   ;;  %v1564_v59 = vld [vmem:[%s2135_s1 + $0x390] ss:$8 sps:$4 sm:$0xff]  }
  0x1c   :  { %1045 = vmatpush1.bf16.msra.mxu0 %v1450_v27  ;;  %964 = vmatprep.subr.bf16.mxu1 %v1451_v28  ;;  %v1524_v27 = vld [vmem:[%s2135_s1 + $0x324] ss:$8 sps:$4 sm:$0xff]   ;;  %v1519_v28 = vld [vmem:[%s2135_s1 + $0x120] ss:$8 sps:$4 sm:$0xff]   ;;  %v1585_v10 = vld [vmem:[%s2135_s1 + $0x1d0] ss:$8 sps:$4 sm:$0xff]  }
  0x1d   :  { %1046 = vmatprep.subr.bf16.mxu0 %v1453_v29  ;;  %v1522_v29 = vld [vmem:[%s2135_s1 + $0x320] ss:$8 sps:$4 sm:$0xff]   ;;  %v1557_v52 = vld [vmem:[%s2135_s1 + $0x184] ss:$8 sps:$4 sm:$0xff]   ;;  %v1588_v11 = vld [vmem:[%s2135_s1 + $0x3d0] ss:$8 sps:$4 sm:$0xff]  }
  0x1e   :  { %v1572_v61 = vld [vmem:[%s2135_s1 + $0x3a4] ss:$8 sps:$4 sm:$0xff]  }
  0x1f   :  { %965 = vmatpush1.bf16.msra.mxu1 %v1455_v30  ;;  %v1527_v30 = vld [vmem:[%s2135_s1 + $0x134] ss:$8 sps:$4 sm:$0xff]  }
  0x20   :  { %1047 = vmatpush1.bf16.msra.mxu0 %v1456_v31  ;;  %966 = vmatprep.subr.bf16.mxu1 %v1457_v32  ;;  %v1530_v31 = vld [vmem:[%s2135_s1 + $0x334] ss:$8 sps:$4 sm:$0xff]   ;;  %v1525_v32 = vld [vmem:[%s2135_s1 + $0x130] ss:$8 sps:$4 sm:$0xff]  }
  0x21   :  { %1048 = vmatprep.subr.bf16.mxu0 %v1459_v33  ;;  %v1528_v33 = vld [vmem:[%s2135_s1 + $0x330] ss:$8 sps:$4 sm:$0xff]  }
  0x23   :  { %967 = vmatpush1.bf16.msra.mxu1 %v1461_v34  ;;  %v1533_v34 = vld [vmem:[%s2135_s1 + $0x144] ss:$8 sps:$4 sm:$0xff]  }
  0x24   :  { %1049 = vmatpush1.bf16.msra.mxu0 %v1462_v35  ;;  %968 = vmatprep.subr.bf16.mxu1 %v1463_v39  ;;  %v1536_v35 = vld [vmem:[%s2135_s1 + $0x344] ss:$8 sps:$4 sm:$0xff]   ;;  %v1539_v39 = vld [vmem:[%s2135_s1 + $0x154] ss:$8 sps:$4 sm:$0xff]  }
  0x25   :  { %1050 = vmatprep.subr.bf16.mxu0 %v1465_v40  ;;  %v1542_v40 = vld [vmem:[%s2135_s1 + $0x354] ss:$8 sps:$4 sm:$0xff]  }
  0x27   :  { %969 = vmatpush1.bf16.msra.mxu1 %v1467_v41  ;;  %v1537_v41 = vld [vmem:[%s2135_s1 + $0x150] ss:$8 sps:$4 sm:$0xff]  }
  0x28   :  { %1051 = vmatpush1.bf16.msra.mxu0 %v1468_v44  ;;  %970 = vmatprep.subr.bf16.mxu1 %v1469_v45  ;;  %v1545_v44 = vld [vmem:[%s2135_s1 + $0x164] ss:$8 sps:$4 sm:$0xff]  }
  0x29   :  { %1052 = vmatprep.subr.bf16.mxu0 %v1471_v46  ;;  %v1548_v45 = vld [vmem:[%s2135_s1 + $0x364] ss:$8 sps:$4 sm:$0xff]   ;;  %v1543_v46 = vld [vmem:[%s2135_s1 + $0x160] ss:$8 sps:$4 sm:$0xff]  }
  0x2b   :  { %971 = vmatpush1.bf16.msra.mxu1 %v1473_v47  ;;  %v1546_v47 = vld [vmem:[%s2135_s1 + $0x360] ss:$8 sps:$4 sm:$0xff]  }
  0x2c   :  { %1053 = vmatpush1.bf16.msra.mxu0 %v1474_v48  ;;  %972 = vmatprep.subr.bf16.mxu1 %v1475_v50  ;;  %v1551_v48 = vld [vmem:[%s2135_s1 + $0x174] ss:$8 sps:$4 sm:$0xff]   ;;  %v1549_v50 = vld [vmem:[%s2135_s1 + $0x170] ss:$8 sps:$4 sm:$0xff]  }
  0x2d   :  { %1054 = vmatprep.subr.bf16.mxu0 %v1477_v51  ;;  %v1552_v51 = vld [vmem:[%s2135_s1 + $0x370] ss:$8 sps:$4 sm:$0xff]  }
  0x2f   :  { %973 = vmatpush1.bf16.msra.mxu1 %v1479_v53  ;;  %v1560_v53 = vld [vmem:[%s2135_s1 + $0x384] ss:$8 sps:$4 sm:$0xff]  }
  0x30   :  { %1055 = vmatpush1.bf16.msra.mxu0 %v1480_v55  ;;  %974 = vmatprep.subr.bf16.mxu1 %v1481_v57  ;;  %v1558_v55 = vld [vmem:[%s2135_s1 + $0x380] ss:$8 sps:$4 sm:$0xff]   ;;  %v1566_v57 = vld [vmem:[%s2135_s1 + $0x394] ss:$8 sps:$4 sm:$0xff]  }
  0x31   :  { %1056 = vmatprep.subr.bf16.mxu0 %v1483_v58  ;;  %v1561_v58 = vld [vmem:[%s2135_s1 + $0x190] ss:$8 sps:$4 sm:$0xff]  }
  0x33   :  { %975 = vmatpush1.bf16.msra.mxu1 %v1485_v62  ;;  %v1567_v62 = vld [vmem:[%s2135_s1 + $0x1a0] ss:$8 sps:$4 sm:$0xff]  }
  0x34   :  { %1057 = vmatpush1.bf16.msra.mxu0 %v1486_v63  ;;  %976 = vmatprep.subr.bf16.mxu1 %v1487_v0  ;;  %v1570_v63 = vld [vmem:[%s2135_s1 + $0x3a0] ss:$8 sps:$4 sm:$0xff]   ;;  %v1575_v0 = vld [vmem:[%s2135_s1 + $0x1b4] ss:$8 sps:$4 sm:$0xff]  }
  0x35   :  { %1058 = vmatprep.subr.bf16.mxu0 %v1489_v1  ;;  %v1578_v1 = vld [vmem:[%s2135_s1 + $0x3b4] ss:$8 sps:$4 sm:$0xff]  }
  0x37   :  { %977 = vmatpush1.bf16.msra.mxu1 %v1491_v2  ;;  %v1573_v2 = vld [vmem:[%s2135_s1 + $0x1b0] ss:$8 sps:$4 sm:$0xff]  }
  0x38   :  { %1059 = vmatpush1.bf16.msra.mxu0 %v1492_v3  ;;  %978 = vmatprep.subr.bf16.mxu1 %v1493_v4  ;;  %v1576_v3 = vld [vmem:[%s2135_s1 + $0x3b0] ss:$8 sps:$4 sm:$0xff]   ;;  %v1581_v4 = vld [vmem:[%s2135_s1 + $0x1c4] ss:$8 sps:$4 sm:$0xff]  }
  0x39   :  { %1060 = vmatprep.subr.bf16.mxu0 %v1495_v5  ;;  %v1584_v5 = vld [vmem:[%s2135_s1 + $0x3c4] ss:$8 sps:$4 sm:$0xff]  }
  0x3b   :  { %979 = vmatpush1.bf16.msra.mxu1 %v1497_v6  ;;  %v1579_v6 = vld [vmem:[%s2135_s1 + $0x1c0] ss:$8 sps:$4 sm:$0xff]  }
  0x3c   :  { %1061 = vmatpush1.bf16.msra.mxu0 %v1498_v7  ;;  %980 = vmatprep.subr.bf16.mxu1 %v1499_v8  ;;  %v1582_v7 = vld [vmem:[%s2135_s1 + $0x3c0] ss:$8 sps:$4 sm:$0xff]   ;;  %v1587_v8 = vld [vmem:[%s2135_s1 + $0x1d4] ss:$8 sps:$4 sm:$0xff]  }
  0x3d   :  { %1062 = vmatprep.subr.bf16.mxu0 %v1501_v9  ;;  %v1590_v9 = vld [vmem:[%s2135_s1 + $0x3d4] ss:$8 sps:$4 sm:$0xff]  }
  0x3f   :  { %981 = vmatpush1.bf16.msra.mxu1 %v1503_v12  ;;  %v1593_v12 = vld [vmem:[%s2135_s1 + $0x1e4] ss:$8 sps:$4 sm:$0xff]  }
  0x40   :  { %1063 = vmatpush1.bf16.msra.mxu0 %v1504_v13  ;;  %991 = vmatprep.subr.bf16.mxu1 %v1508_v14  ;;  %v1596_v13 = vld [vmem:[%s2135_s1 + $0x3e4] ss:$8 sps:$4 sm:$0xff]   ;;  %v1591_v14 = vld [vmem:[%s2135_s1 + $0x1e0] ss:$8 sps:$4 sm:$0xff]  }
  0x41   :  { %1073 = vmatprep.subr.bf16.mxu0 %v1512_v15  ;;  %v1594_v15 = vld [vmem:[%s2135_s1 + $0x3e0] ss:$8 sps:$4 sm:$0xff]  }
  0x42   :  { %983 = vmatmul.mubr.bf16.vlgmr.msra.gmra.mrb[0].mxu1 %v187_v54  ;;  %v1555_v54 = vld [vmem:[%s2135_s1 + $0x180] ss:$8 sps:$4 sm:$0xff]  }
  0x43   :  { %1065 = vmatmul.mubr.bf16.vlgmr.msra.gmra.mrb[0].mxu0 %v204_v60  ;;  %992 = vmatpush1.bf16.msra.mxu1 %v1506_v18  ;;  %v1569_v60 = vld [vmem:[%s2135_s1 + $0x1a4] ss:$8 sps:$4 sm:$0xff]   ;;  %v1599_v18 = vld [vmem:[%s2135_s1 + $0x1f4] ss:$8 sps:$4 sm:$0xff]  }
  0x44   :  { %1074 = vmatpush1.bf16.msra.mxu0 %v1510_v19  ;;  %993 = vmatprep.subr.bf16.mxu1 %v1515_v20  ;;  %v1602_v19 = vld [vmem:[%s2135_s1 + $0x3f4] ss:$8 sps:$4 sm:$0xff]   ;;  %v1597_v20 = vld [vmem:[%s2135_s1 + $0x1f0] ss:$8 sps:$4 sm:$0xff]  }
  0x45   :  { %1075 = vmatprep.subr.bf16.mxu0 %v1518_v21  ;;  %1023 = vmatprep.mubr.bf16.mxu1 %v196_v22  ;;  %v1600_v21 = vld [vmem:[%s2135_s1 + $0x3f0] ss:$8 sps:$4 sm:$0xff]   ;;  %v1605_v22 = vld [vmem:[%s2135_s1 + $0x404] ss:$8 sps:$4 sm:$0xff]  }
  0x46   :  { %1105 = vmatprep.mubr.bf16.mxu0 %v213_v23  ;;  %v1603_v23 = vld [vmem:[%s2135_s1 + $0x400] ss:$8 sps:$4 sm:$0xff]  }
  0x47   :  { %994 = vmatpush1.bf16.msra.mxu1 %v1513_v24  ;;  %v1608_v24 = vld [vmem:[%s2135_s1 + $0x414] ss:$8 sps:$4 sm:$0xff]  }
  0x48   :  { %1076 = vmatpush1.bf16.msra.mxu0 %v1516_v25  ;;  %995 = vmatprep.subr.bf16.mxu1 %v1521_v26  ;;  %v1606_v25 = vld [vmem:[%s2135_s1 + $0x410] ss:$8 sps:$4 sm:$0xff]   ;;  %v1628_v26 = vmov 0  }
  0x49   :  { %1077 = vmatprep.subr.bf16.mxu0 %v1524_v27  ;;  %v1611_v27 = vld [vmem:[%s2135_s1 + $0x424] ss:$8 sps:$4 sm:$0xff]  }
  0x4b   :  { %996 = vmatpush1.bf16.msra.mxu1 %v1519_v28  ;;  %v1609_v28 = vld [vmem:[%s2135_s1 + $0x420] ss:$8 sps:$4 sm:$0xff]  }
  0x4c   :  { %1078 = vmatpush1.bf16.msra.mxu0 %v1522_v29  ;;  %997 = vmatprep.subr.bf16.mxu1 %v1527_v30  ;;  %v1617_v29 = vld [vmem:[%s2135_s1 + $0x444] ss:$8 sps:$4 sm:$0xff]   ;;  %v1615_v30 = vld [vmem:[%s2135_s1 + $0x440] ss:$8 sps:$4 sm:$0xff]  }
  0x4d   :  { %1079 = vmatprep.subr.bf16.mxu0 %v1530_v31  ;;  %v1620_v31 = vld [vmem:[%s2135_s1 + $0x454] ss:$8 sps:$4 sm:$0xff]  }
  0x4f   :  { %998 = vmatpush1.bf16.msra.mxu1 %v1525_v32  ;;  %v1618_v32 = vld [vmem:[%s2135_s1 + $0x450] ss:$8 sps:$4 sm:$0xff]  }
  0x50   :  { %1080 = vmatpush1.bf16.msra.mxu0 %v1528_v33  ;;  %999 = vmatprep.subr.bf16.mxu1 %v1533_v34  ;;  %v1623_v33 = vld [vmem:[%s2135_s1 + $0x464] ss:$8 sps:$4 sm:$0xff]   ;;  %v1621_v34 = vld [vmem:[%s2135_s1 + $0x460] ss:$8 sps:$4 sm:$0xff]  }
  0x51   :  { %1081 = vmatprep.subr.bf16.mxu0 %v1536_v35  ;;  %v1626_v35 = vld [vmem:[%s2135_s1 + $0x474] ss:$8 sps:$4 sm:$0xff]  }
  0x53   :  { %1000 = vmatpush1.bf16.msra.mxu1 %v1531_v37  ;;  %v1624_v37 = vld [vmem:[%s2135_s1 + $0x470] ss:$8 sps:$4 sm:$0xff]  }
  0x54   :  { %1082 = vmatpush1.bf16.msra.mxu0 %v1534_v38  ;;  %1001 = vmatprep.subr.bf16.mxu1 %v1539_v39  ;;  %v1245_v38 = vld.sshfl [vmem:[%s2136_s0 + $0x10] sm:$0x3 pattern:$0x76325410] }
  0x55   :  { %1083 = vmatprep.subr.bf16.mxu0 %v1542_v40 }
  0x57   :  { %1002 = vmatpush1.bf16.msra.mxu1 %v1537_v41 }
  0x58   :  { %1084 = vmatpush1.bf16.msra.mxu0 %v1540_v43  ;;  %1003 = vmatprep.subr.bf16.mxu1 %v1545_v44  ;;  %v169_v44 = vsub.s32 0, %v1778_v42 }
  0x59   :  { %1085 = vmatprep.subr.bf16.mxu0 %v1548_v45  ;;  %v165_v45 = vld [vmem:[%s2137_s2] sm:$0x3] }
  0x5b   :  { %1004 = vmatpush1.bf16.msra.mxu1 %v1543_v46  ;;  %v173_v46 = vsub.s32 1, %v1778_v42 }
  0x5c   :  { %1086 = vmatpush1.bf16.msra.mxu0 %v1546_v47  ;;  %1005 = vmatprep.subr.bf16.mxu1 %v1551_v48  ;;  %v170_v47 = vrot.slane %v165_v45, %v169_v44 }
  0x5d   :  { %1087 = vmatprep.subr.bf16.mxu0 %v1554_v49  ;;  %v174_v48 = vrot.slane %v165_v45, %v173_v46 }
  0x5f   :  { %1006 = vmatpush1.bf16.msra.mxu1 %v1549_v50 }
  0x60   :  { %1088 = vmatpush1.bf16.msra.mxu0 %v1552_v51  ;;  %1007 = vmatprep.subr.bf16.mxu1 %v1557_v52 }
  0x61   :  { %1089 = vmatprep.subr.bf16.mxu0 %v1560_v53 }
  0x63   :  { %1008 = vmatpush1.bf16.msra.mxu1 %v1555_v54 }
  0x64   :  { %1090 = vmatpush1.bf16.msra.mxu0 %v1558_v55  ;;  %1009 = vmatprep.subr.bf16.mxu1 %v1563_v56 }
  0x65   :  { %1091 = vmatprep.subr.bf16.mxu0 %v1566_v57 }
  0x67   :  { %1010 = vmatpush1.bf16.msra.mxu1 %v1561_v58 }
  0x68   :  { %1092 = vmatpush1.bf16.msra.mxu0 %v1564_v59  ;;  %1011 = vmatprep.subr.bf16.mxu1 %v1569_v60 }
  0x69   :  { %1093 = vmatprep.subr.bf16.mxu0 %v1572_v61 }
  0x6b   :  { %1012 = vmatpush1.bf16.msra.mxu1 %v1567_v62 }
  0x6c   :  { %1094 = vmatpush1.bf16.msra.mxu0 %v1570_v63  ;;  %1013 = vmatprep.subr.bf16.mxu1 %v1575_v0 }
  0x6d   :  { %1095 = vmatprep.subr.bf16.mxu0 %v1578_v1 }
  0x6f   :  { %1014 = vmatpush1.bf16.msra.mxu1 %v1573_v2 }
  0x70   :  { %1096 = vmatpush1.bf16.msra.mxu0 %v1576_v3  ;;  %1015 = vmatprep.subr.bf16.mxu1 %v1581_v4 }
  0x71   :  { %1097 = vmatprep.subr.bf16.mxu0 %v1584_v5  ;;  %v1629_v5 = vmov 1966171168  }
  0x73   :  { %1016 = vmatpush1.bf16.msra.mxu1 %v1579_v6  ;;  %v1179_v6 = vunpack.c.l.s4 %v1629_v5 }
  0x74   :  { %1098 = vmatpush1.bf16.msra.mxu0 %v1582_v7  ;;  %1017 = vmatprep.subr.bf16.mxu1 %v1587_v8 }
  0x75   :  { %1099 = vmatprep.subr.bf16.mxu0 %v1590_v9 }
  0x77   :  { %1018 = vmatpush1.bf16.msra.mxu1 %v1585_v10 }
  0x78   :  { %1100 = vmatpush1.bf16.msra.mxu0 %v1588_v11  ;;  %1019 = vmatprep.subr.bf16.mxu1 %v1593_v12 }
  0x79   :  { %1101 = vmatprep.subr.bf16.mxu0 %v1596_v13 }
  0x7b   :  { %1020 = vmatpush1.bf16.msra.mxu1 %v1591_v14 }
  0x7c   :  { %1102 = vmatpush1.bf16.msra.mxu0 %v1594_v15  ;;  %1021 = vmatprep.subr.bf16.mxu1 %v1599_v18  ;;  %v1180_v15 = vunpack.c.0.s8 %v1179_v6 }
  0x7d   :  { %1103 = vmatprep.subr.bf16.mxu0 %v1602_v19 }
  0x7f   :  { %1022 = vmatpush1.bf16.msra.mxu1 %v1597_v20 }
  0x80   :  { %1104 = vmatpush1.bf16.msra.mxu0 %v1600_v21 }
  0x81   :  { %1114 = vmatprep.subr.bf16.mxu0 %v1605_v22 }
  0x82   :  { %1024 = vmatmul.mubr.bf16.vlgmr.msra.gmra.mrb[0].mxu1 %v1868_v16  ;;  %v1614_v16 = vld [vmem:[%s2135_s1 + $0x434] ss:$8 sps:$4 sm:$0xff]  }
  0x83   :  { %1106 = vmatmul.mubr.bf16.vlgmr.msra.gmra.mrb[0].mxu0 %v1870_v17  ;;  %v1612_v17 = vld [vmem:[%s2135_s1 + $0x430] ss:$8 sps:$4 sm:$0xff]  }
  0x84   :  { %1115 = vmatpush1.bf16.msra.mxu0 %v1603_v23  ;;  %1146 = vmatprep.mubr.bf16.mxu0 %v1628_v26  ;;  %v1183_v26 = vsub.s32 %v1180_v15, %v1778_v42 }
  0x85   :  { %1116 = vmatprep.subr.bf16.mxu0 %v1608_v24 }
  0x88   :  { %1117 = vmatpush1.bf16.msra.mxu0 %v1606_v25 }
  0x89   :  { %1118 = vmatprep.subr.bf16.mxu0 %v1611_v27 }
  0x8c   :  { %1119 = vmatpush1.bf16.msra.mxu0 %v1609_v28 }
  0x8d   :  { %1120 = vmatprep.subr.bf16.mxu0 %v1614_v16 }
  0x90   :  { %1121 = vmatpush1.bf16.msra.mxu0 %v1612_v17 }
  0x91   :  { %1122 = vmatprep.subr.bf16.mxu0 %v1617_v29 }
  0x94   :  { %1123 = vmatpush1.bf16.msra.mxu0 %v1615_v30 }
  0x95   :  { %1124 = vmatprep.subr.bf16.mxu0 %v1620_v31 }
  0x98   :  { %1125 = vmatpush1.bf16.msra.mxu0 %v1618_v32 }
  0x99   :  { %1126 = vmatprep.subr.bf16.mxu0 %v1623_v33 }
  0x9c   :  { %1127 = vmatpush1.bf16.msra.mxu0 %v1621_v34 }
  0x9d   :  { %1128 = vmatprep.subr.bf16.mxu0 %v1626_v35 }
  0xa0   :  { %1129 = vmatpush1.bf16.msra.mxu0 %v1624_v37 }
  0xa3   :  { %1147 = vmatmul.mubr.bf16.vlgmr.msra.gmra.mrb[0].mxu0 %v1245_v38 }
 0x155   :  { %v1025_v39 = vpop.f32.mrb[0].mxu1 }
 0x156   :  { %v1027_v40 = vpop.f32.mrb[1].mxu1  ;;  %v1390_v49 = vadd.f32 %v1025_v39, %v170_v47 }
 0x157   :  { %v1029_v41 = vpop.f32.mrb[2].mxu1  ;;  %v1392_v50 = vadd.f32 %v1027_v40, %v174_v48 }
 0x158   :  { %v1030_v43 = vpop.f32.mrb[3].mxu1 }
 0x176   :  { %v1148_v51 = vpop.f32.mrb[0].mxu0 }
 0x177   :  { %v1391_v52 = vadd.f32 %v1390_v49, %v1148_v51  ;;  %v1150_v53 = vpop.f32.mrb[1].mxu0 }
 0x178   :  { %v1393_v54 = vadd.f32 %v1392_v50, %v1150_v53  ;;  %v1152_v55 = vpop.f32.mrb[2].mxu0 }
 0x179   :  { %v1161_v56 = vsel %vm1160_vm0, %v1391_v52, 0.0  ;;  %v1198_v57 = vmul.f32 %v1391_v52, %v1391_v52  ;;  %v1153_v58 = vpop.f32.mrb[3].mxu0 }
 0x17a   :  { %v1162_v59 = vrot.slane %v1161_v56, 4  ;;  %v1157_v60 = vcombine.low %v1391_v52, %v1393_v54  ;;  %v1168_v61 = vsel %vm1160_vm0, %v1393_v54, 0.0  ;;  %v1199_v62 = vmul.f32 %v1393_v54, %v1393_v54 }
 0x17b   :  { %v1200_v63 = vsel %vm1160_vm0, %v1198_v57, 0.0  ;;  %v1169_v0 = vrot.slane %v1168_v61, 4 }
 0x17c   :  { %v1163_v1 = vadd.f32 %v1162_v59, %v1161_v56  ;;  %v1201_v2 = vrot.slane %v1200_v63, 4  ;;  %1159 = vst [vmem:[%s2138_s3] sm:$0xff] %v1157_v60  ;;  %v1207_v3 = vsel %vm1160_vm0, %v1199_v62, 0.0 }
 0x17d   :  { %v1170_v4 = vadd.f32 %v1169_v0, %v1168_v61  ;;  %v1208_v7 = vrot.slane %v1207_v3, 4 }
 0x17e   :  { %v1164_v8 = vrot.slane %v1163_v1, 2  ;;  %v1202_v9 = vadd.f32 %v1201_v2, %v1200_v63 }
 0x17f   :  { %v1171_v10 = vrot.slane %v1170_v4, 2  ;;  %v1209_v11 = vadd.f32 %v1208_v7, %v1207_v3 }
 0x180   :  { %v1165_v12 = vadd.f32 %v1164_v8, %v1163_v1  ;;  %v1203_v13 = vrot.slane %v1202_v9, 2 }
 0x181   :  { %v1172_v14 = vadd.f32 %v1171_v10, %v1170_v4  ;;  %v1210_v18 = vrot.slane %v1209_v11, 2 }
 0x182   :  { %v1166_v19 = vrot.slane %v1165_v12, 1  ;;  %v1204_v20 = vadd.f32 %v1203_v13, %v1202_v9 }
 0x183   :  { %v1173_v21 = vrot.slane %v1172_v14, 1  ;;  %v1211_v22 = vadd.f32 %v1210_v18, %v1209_v11 }
 0x184   :  { %v1167_v23 = vadd.f32 %v1166_v19, %v1165_v12  ;;  %v1205_v24 = vrot.slane %v1204_v20, 1 }
 0x185   :  { %v1174_v25 = vadd.f32 %v1173_v21, %v1172_v14  ;;  %v1212_v27 = vrot.slane %v1211_v22, 1 }
 0x186   :  { %v1206_v28 = vadd.f32 %v1205_v24, %v1204_v20 }
 0x187   :  { %v1177_v16 = vcombine.low %v1167_v23, %v1174_v25  ;;  %v1213_v17 = vadd.f32 %v1212_v27, %v1211_v22 }
 0x189   :  { %v1184_v29 = vrot.slane %v1177_v16, %v1183_v26  ;;  %v1216_v30 = vcombine.low %v1206_v28, %v1213_v17 }
 0x18b   :  { %v1191_v31 = vrot.slane %v1184_v29, %v1183_v26  ;;  %v1223_v32 = vrot.slane %v1216_v30, %v1183_v26 }
 0x18d   :  { %1197 = vst.msk [vmem:[%s2139_s4] sm:$0x3] %vm1195_vm1, %v1191_v31  ;;  %v1230_v33 = vrot.slane %v1223_v32, %v1183_v26 }
 0x18f   :  { %1232 = vst.msk [vmem:[%s2140_s5] sm:$0x3] %vm1195_vm1, %v1230_v33 }

</bundles_post_ra>
